<compile_context>
chip_gen: v5e
topology: v5e:2x2
jax: 0.10.0
libtpu: 0.0.40
codegen_flags: <defaults>
</compile_context>

<pallas_src>
import functools

import jax
import jax.numpy as jnp
from jax.experimental import pallas as pl
from jax.experimental.pallas import tpu as pltpu


def _round_up(x, m):
    return ((x + m - 1) // m) * m


def _tpu_budgets():
    """Generation-aware VMEM budgets: v7x has 64 MiB VMEM, v5e/v6e have 128."""
    try:
        vmem = pltpu.get_tpu_info().vmem_capacity_bytes
    except Exception:
        vmem = 64 * 1024 * 1024  # conservative (v7x-safe) fallback
    if vmem >= 100 * 1024 * 1024:  # v5e / v6e (128 MiB VMEM)
        return {"weight_db_budget": 48 << 20, "vmem_limit": 72 << 20, "tn_cap": 1024}
    # v7x (64 MiB VMEM): keep the double-buffered weight tile <= 24 MiB.
    return {"weight_db_budget": 24 << 20, "vmem_limit": 48 << 20, "tn_cap": 512}


_BUDGETS = _tpu_budgets()


def _choose_tiles(k_pad, n_out, weight_bytes=2):
    """Pick (tn, n_pad, tk) for a (k_pad, n_out) weight; bandwidth-bound regime.

    k_pad is FIXED (it equals the previous layer's padded N so layers chain
    without re-padding); tk must divide k_pad.
    """
    tn_cap = _BUDGETS["tn_cap"]
    if n_out <= 256:
        tn = _round_up(n_out, 128)
    else:
        # >= 2 N tiles when possible so the parallel N axis can split across
        # v7x's two TensorCores; lane-dense (multiple-of-128) output stores.
        tn = min(tn_cap, _round_up(-(-n_out // 2), 128))
    n_pad = _round_up(n_out, tn)

    # K tile: as large as the double-buffered weight budget allows (ideally all
    # of K -> single reduction step, multi-MiB DMAs near the HBM roofline).
    max_tk = (_BUDGETS["weight_db_budget"] // (2 * tn * weight_bytes)) // 128 * 128
    max_tk = max(max_tk, 128)  # guard: never produce a zero tile
    c = k_pad // 128           # k_pad is always a multiple of 128
    n_chunks = -(-k_pad // max_tk)
    while c % n_chunks != 0:   # tk must divide k_pad and be a multiple of 128
        n_chunks += 1
    tk = k_pad // n_chunks
    return tn, n_pad, tk


def _linear_relu_kernel_1k(x_ref, w_ref, b_ref, o_ref):
    """Single-K-step specialization: no accumulator scratch, no phases."""
    y = jnp.dot(x_ref[...], w_ref[...], preferred_element_type=jnp.float32)
    y = y + b_ref[...]                       # f32 bias broadcast over rows
    o_ref[...] = jnp.maximum(y, 0.0).astype(o_ref.dtype)


def _linear_relu_kernel_acc(x_ref, w_ref, b_ref, o_ref, acc_ref):
    """Generic path: K reduction is the last grid axis, output block is
    k-invariant so it stays resident; only written in the final-k epilogue."""
    k = pl.program_id(2)

    @pl.when(k == 0)
    def _():
        acc_ref[...] = jnp.zeros_like(acc_ref)

    acc_ref[...] += jnp.dot(
        x_ref[...], w_ref[...], preferred_element_type=jnp.float32
    )

    @pl.when(k == pl.num_programs(2) - 1)
    def _():
        y = acc_ref[...] + b_ref[...]
        o_ref[...] = jnp.maximum(y, 0.0).astype(o_ref.dtype)


def linear_relu_padded(x_p, w_p, b_p, tn, tk, out_dtype):
    """relu(x_p @ w_p + b_p) on fully padded operands.

    x_p: (M_pad, K_pad) bf16, w_p: (K_pad, N_pad) bf16, b_p: (1, N_pad) f32.
    Returns (M_pad, N_pad) in out_dtype (bf16 for chained layers, f32 last).
    """
    M_pad, K_pad = x_p.shape
    K_w, N_pad = w_p.shape
    assert K_w == K_pad and N_pad % tn == 0 and K_pad % tk == 0

    tm = min(M_pad, 256)
    assert M_pad % tm == 0

    k_steps = K_pad // tk
    grid = (M_pad // tm, N_pad // tn, k_steps)

    cost = pl.CostEstimate(
        flops=2 * M_pad * K_pad * N_pad,
        transcendentals=0,
        bytes_accessed=(
            M_pad * K_pad * x_p.dtype.itemsize
            + K_pad * N_pad * w_p.dtype.itemsize
            + N_pad * 4
            + M_pad * N_pad * jnp.dtype(out_dtype).itemsize
        ),
    )

    in_specs = [
        pl.BlockSpec((tm, tk), lambda i, j, k: (i, k)),   # x tile (bf16)
        pl.BlockSpec((tk, tn), lambda i, j, k: (k, j)),   # w tile (bf16)
        pl.BlockSpec((1, tn), lambda i, j, k: (0, j)),    # bias (f32), k-invariant
    ]
    out_spec = pl.BlockSpec((tm, tn), lambda i, j, k: (i, j))

    common = dict(
        out_shape=jax.ShapeDtypeStruct((M_pad, N_pad), out_dtype),
        compiler_params=pltpu.CompilerParams(
            # Pin megacore partitioning to the N axis: the M axis has a single
            # program at batch=4, so letting the partitioner pick it would idle
            # a TensorCore on v7x.
            dimension_semantics=("arbitrary", "parallel", "arbitrary"),
            vmem_limit_bytes=_BUDGETS["vmem_limit"],
        ),
        cost_estimate=cost,
    )

    if k_steps == 1:
        return pl.pallas_call(
            _linear_relu_kernel_1k,
            grid_spec=pltpu.PrefetchScalarGridSpec(
                num_scalar_prefetch=0,
                grid=grid,
                in_specs=in_specs,
                out_specs=out_spec,
            ),
            **common,
        )(x_p, w_p, b_p)

    return pl.pallas_call(
        _linear_relu_kernel_acc,
        grid_spec=pltpu.PrefetchScalarGridSpec(
            num_scalar_prefetch=0,
            grid=grid,
            in_specs=in_specs,
            out_specs=out_spec,
            scratch_shapes=[pltpu.VMEM((tm, tn), jnp.float32)],
        ),
        **common,
    )(x_p, w_p, b_p)


def init_params(key, dims):
    """nn.Linear-style init (uniform +/- 1/sqrt(fan_in)); weights stored
    transposed (in, out), cast to bf16 and zero-padded ONCE here.  Each layer's
    K padding equals the previous layer's N padding so padded bf16 activations
    chain between pallas_calls with no per-layer pad/cast.  Zero padding is
    semantically neutral: padded K rows of W are zero (and the corresponding
    padded activation columns are zero), padded N columns get bias 0 so the
    padded outputs are relu(0) = 0."""
    weights = []
    meta = []
    keys = jax.random.split(key, 2 * (len(dims) - 1))
    k_pad0 = _round_up(dims[0], 128)
    k_pad = k_pad0
    for li, (fan_in, fan_out) in enumerate(zip(dims[:-1], dims[1:])):
        kw, kb = keys[2 * li], keys[2 * li + 1]
        bound = float(fan_in) ** -0.5
        w_t = jax.random.uniform(kw, (fan_in, fan_out), jnp.float32, -bound, bound)
        b = jax.random.uniform(kb, (fan_out,), jnp.float32, -bound, bound)

        tn, n_pad, tk = _choose_tiles(k_pad, fan_out)
        w_pd = jnp.pad(w_t, ((0, k_pad - fan_in), (0, n_pad - fan_out)))
        w_pd = w_pd.astype(jnp.bfloat16)
        # Bias stored pre-reshaped to (1, N_pad) f32 (no per-call reshape).
        b_pd = jnp.pad(b, (0, n_pad - fan_out)).reshape(1, n_pad)

        weights.append((w_pd, b_pd))
        meta.append((fan_in, fan_out, tn, tk))
        k_pad = n_pad  # chain: next layer consumes this layer's padded output
    return tuple(weights), tuple(meta), k_pad0


@functools.partial(jax.jit, static_argnames=("meta", "k_pad0", "max_nonzero"))
def model_forward(x, weights, meta, k_pad0, max_nonzero):
    M, K = x.shape
    M_pad = _round_up(M, 16)          # bf16 sublane packing
    if M_pad > 256:
        M_pad = _round_up(M, 256)

    # Pad/cast the tiny activation matrix exactly once; every intermediate
    # stays padded bf16 and feeds the next pallas_call directly.
    h = jnp.pad(x.astype(jnp.bfloat16), ((0, M_pad - M), (0, k_pad0 - K)))

    n_layers = len(meta)
    for li, ((w_p, b_p), (_fan_in, _fan_out, tn, tk)) in enumerate(zip(weights, meta)):
        last = li == n_layers - 1
        h = linear_relu_padded(
            h, w_p, b_p, tn, tk,
            out_dtype=jnp.float32 if last else jnp.bfloat16,
        )

    n_out = meta[-1][1]
    out = h[:M, :n_out]               # only the final layer is sliced

    # torch.nonzero equivalent: JAX needs a static size, so we return a fixed
    # (max_nonzero, 2) index array (valid rows first, padding = (0,0)) plus the
    # true count nnz; downstream consumers must truncate with nnz.
    # TODO(synk): nnz could be accumulated in an SMEM scalar inside the last
    # layer's epilogue to skip one full pass over `out`.
    rows, cols = jnp.nonzero(out, size=max_nonzero, fill_value=0)
    nonzero = jnp.stack([rows, cols], axis=-1).astype(jnp.int32)
    nnz = jnp.sum(out != 0).astype(jnp.int32)
    return out, nonzero, nnz


def ref_forward(x, weights, meta):
    """Plain-JAX reference using the same bf16 weights / f32 accumulation."""
    h = x
    for (w_p, b_p), (fan_in, fan_out, _tn, _tk) in zip(weights, meta):
        hw = jnp.dot(h.astype(jnp.bfloat16), w_p[:fan_in, :fan_out],
                     preferred_element_type=jnp.float32)
        h = jnp.maximum(hw + b_p[0, :fan_out], 0.0)
    return h


if __name__ == "__main__":
    # Small, deliberately non-tile-aligned stand-ins for the module dims
    # (1000 -> 5000 -> 10000 -> 10000), batch = 4.
    BATCH, D_IN, D_H1, D_H2, D_OUT = 4, 200, 500, 1000, 1000

    key = jax.random.PRNGKey(0)
    kx, kp = jax.random.split(key)
    x = jax.random.normal(kx, (BATCH, D_IN), jnp.float32)
    weights, meta, k_pad0 = init_params(kp, (D_IN, D_H1, D_H2, D_OUT))

    max_nonzero = BATCH * D_OUT
    out, nonzero, nnz = model_forward(x, weights, meta, k_pad0, max_nonzero)
    jax.block_until_ready((out, nonzero, nnz))

    # Correctness check vs plain-JAX reference.
    ref = ref_forward(x, weights, meta)
    assert out.shape == (BATCH, D_OUT)
    assert jnp.allclose(out, ref, atol=1e-2, rtol=1e-2), "mismatch vs reference"
    assert int(nnz) > 0
    # First nnz rows of `nonzero` must index genuinely nonzero entries.
    r0, c0 = int(nonzero[0, 0]), int(nonzero[0, 1])
    assert float(out[r0, c0]) != 0.0

    print("KERNEL_OK")
</pallas_src>

<mosaic_0001>
module attributes {stable_mosaic.version = 11 : i64} {
  func.func @_linear_relu_kernel_1k(%arg0: i32, %arg1: i32, %arg2: i32, %arg3: memref<16x512xbf16, #tpu.memory_space<vmem>>, %arg4: memref<512x512xbf16, #tpu.memory_space<vmem>>, %arg5: memref<1x512xf32, #tpu.memory_space<vmem>>, %arg6: memref<16x512xbf16, #tpu.memory_space<vmem>>) attributes {dimension_semantics = [#tpu.dimension_semantics<arbitrary>, #tpu.dimension_semantics<parallel>, #tpu.dimension_semantics<arbitrary>], iteration_bounds = array<i64: 1, 2, 1>, scalar_prefetch = 0 : i64, scratch_operands = 0 : i64, tpu.core_type = #tpu.core_type<tc>, window_params = [{transform_indices = @transform_0, window_bounds = array<i64: 16, 512>}, {transform_indices = @transform_1, window_bounds = array<i64: 512, 512>}, {transform_indices = @transform_2, window_bounds = array<i64: 1, 512>}, {transform_indices = @transform_3, window_bounds = array<i64: 16, 512>}]} {
    %c0 = arith.constant 0 : index
    %c0_0 = arith.constant 0 : index
    %0 = vector.load %arg3[%c0, %c0_0] : memref<16x512xbf16, #tpu.memory_space<vmem>>, vector<16x512xbf16>
    %c0_1 = arith.constant 0 : index
    %c0_2 = arith.constant 0 : index
    %1 = vector.load %arg4[%c0_1, %c0_2] : memref<512x512xbf16, #tpu.memory_space<vmem>>, vector<512x512xbf16>
    %cst = arith.constant dense<0.000000e+00> : vector<16x512xf32>
    %2 = tpu.matmul %0, %1, %cst {dimension_numbers = #tpu.dot_dimension_numbers<[1], [0], [0], [1], [0, 0, 1, 1], [], []>} : vector<16x512xbf16>, vector<512x512xbf16>, vector<16x512xf32> -> vector<16x512xf32>
    %c0_3 = arith.constant 0 : index
    %c0_4 = arith.constant 0 : index
    %3 = vector.load %arg5[%c0_3, %c0_4] : memref<1x512xf32, #tpu.memory_space<vmem>>, vector<1x512xf32>
    %4 = vector.broadcast %3 : vector<1x512xf32> to vector<16x512xf32>
    %5 = arith.addf %2, %4 : vector<16x512xf32>
    %cst_5 = arith.constant 0.000000e+00 : f32
    %6 = vector.broadcast %cst_5 : f32 to vector<16x512xf32>
    %7 = arith.maximumf %5, %6 : vector<16x512xf32>
    %8 = arith.truncf %7 : vector<16x512xf32> to vector<16x512xbf16>
    %c0_6 = arith.constant 0 : index
    %c0_7 = arith.constant 0 : index
    %9 = vector.load %arg6[%c0_6, %c0_7] : memref<16x512xbf16, #tpu.memory_space<vmem>>, vector<16x512xbf16>
    tpu.vector_store %arg6[%c0_6, %c0_7], %8 {strides = array<i32>} : memref<16x512xbf16, #tpu.memory_space<vmem>>, vector<16x512xbf16>,
    return
  }
  func.func @transform_0(%arg0: i32, %arg1: i32, %arg2: i32) -> (i32, i32) {
    %c0_i32 = arith.constant 0 : i32
    return %arg0, %arg2 : i32, i32
  }
  func.func @transform_1(%arg0: i32, %arg1: i32, %arg2: i32) -> (i32, i32) {
    %c0_i32 = arith.constant 0 : i32
    return %arg2, %arg1 : i32, i32
  }
  func.func @transform_2(%arg0: i32, %arg1: i32, %arg2: i32) -> (i32, i32) {
    %c0_i32 = arith.constant 0 : i32
    %c0_i32_0 = arith.constant 0 : i32
    return %c0_i32, %arg1 : i32, i32
  }
  func.func @transform_3(%arg0: i32, %arg1: i32, %arg2: i32) -> (i32, i32) {
    %c0_i32 = arith.constant 0 : i32
    return %arg0, %arg1 : i32, i32
  }
}

module attributes {stable_mosaic.version = 11 : i64} {
  func.func @_linear_relu_kernel_1k(%arg0: i32, %arg1: i32, %arg2: i32, %arg3: memref<16x256xbf16, #tpu.memory_space<vmem>>, %arg4: memref<256x256xbf16, #tpu.memory_space<vmem>>, %arg5: memref<1x256xf32, #tpu.memory_space<vmem>>, %arg6: memref<16x256xbf16, #tpu.memory_space<vmem>>) attributes {dimension_semantics = [#tpu.dimension_semantics<arbitrary>, #tpu.dimension_semantics<parallel>, #tpu.dimension_semantics<arbitrary>], iteration_bounds = array<i64: 1, 2, 1>, scalar_prefetch = 0 : i64, scratch_operands = 0 : i64, tpu.core_type = #tpu.core_type<tc>, window_params = [{transform_indices = @transform_0, window_bounds = array<i64: 16, 256>}, {transform_indices = @transform_1, window_bounds = array<i64: 256, 256>}, {transform_indices = @transform_2, window_bounds = array<i64: 1, 256>}, {transform_indices = @transform_3, window_bounds = array<i64: 16, 256>}]} {
    %c0 = arith.constant 0 : index
    %c0_0 = arith.constant 0 : index
    %0 = vector.load %arg3[%c0, %c0_0] : memref<16x256xbf16, #tpu.memory_space<vmem>>, vector<16x256xbf16>
    %c0_1 = arith.constant 0 : index
    %c0_2 = arith.constant 0 : index
    %1 = vector.load %arg4[%c0_1, %c0_2] : memref<256x256xbf16, #tpu.memory_space<vmem>>, vector<256x256xbf16>
    %cst = arith.constant dense<0.000000e+00> : vector<16x256xf32>
    %2 = tpu.matmul %0, %1, %cst {dimension_numbers = #tpu.dot_dimension_numbers<[1], [0], [0], [1], [0, 0, 1, 1], [], []>} : vector<16x256xbf16>, vector<256x256xbf16>, vector<16x256xf32> -> vector<16x256xf32>
    %c0_3 = arith.constant 0 : index
    %c0_4 = arith.constant 0 : index
    %3 = vector.load %arg5[%c0_3, %c0_4] : memref<1x256xf32, #tpu.memory_space<vmem>>, vector<1x256xf32>
    %4 = vector.broadcast %3 : vector<1x256xf32> to vector<16x256xf32>
    %5 = arith.addf %2, %4 : vector<16x256xf32>
    %cst_5 = arith.constant 0.000000e+00 : f32
    %6 = vector.broadcast %cst_5 : f32 to vector<16x256xf32>
    %7 = arith.maximumf %5, %6 : vector<16x256xf32>
    %8 = arith.truncf %7 : vector<16x256xf32> to vector<16x256xbf16>
    %c0_6 = arith.constant 0 : index
    %c0_7 = arith.constant 0 : index
    %9 = vector.load %arg6[%c0_6, %c0_7] : memref<16x256xbf16, #tpu.memory_space<vmem>>, vector<16x256xbf16>
    tpu.vector_store %arg6[%c0_6, %c0_7], %8 {strides = array<i32>} : memref<16x256xbf16, #tpu.memory_space<vmem>>, vector<16x256xbf16>,
    return
  }
  func.func @transform_0(%arg0: i32, %arg1: i32, %arg2: i32) -> (i32, i32) {
    %c0_i32 = arith.constant 0 : i32
    return %arg0, %arg2 : i32, i32
  }
  func.func @transform_1(%arg0: i32, %arg1: i32, %arg2: i32) -> (i32, i32) {
    %c0_i32 = arith.constant 0 : i32
    return %arg2, %arg1 : i32, i32
  }
  func.func @transform_2(%arg0: i32, %arg1: i32, %arg2: i32) -> (i32, i32) {
    %c0_i32 = arith.constant 0 : i32
    %c0_i32_0 = arith.constant 0 : i32
    return %c0_i32, %arg1 : i32, i32
  }
  func.func @transform_3(%arg0: i32, %arg1: i32, %arg2: i32) -> (i32, i32) {
    %c0_i32 = arith.constant 0 : i32
    return %arg0, %arg1 : i32, i32
  }
}

module attributes {stable_mosaic.version = 11 : i64} {
  func.func @_linear_relu_kernel_1k(%arg0: i32, %arg1: i32, %arg2: i32, %arg3: memref<16x1024xbf16, #tpu.memory_space<vmem>>, %arg4: memref<1024x512xbf16, #tpu.memory_space<vmem>>, %arg5: memref<1x512xf32, #tpu.memory_space<vmem>>, %arg6: memref<16x512xf32, #tpu.memory_space<vmem>>) attributes {dimension_semantics = [#tpu.dimension_semantics<arbitrary>, #tpu.dimension_semantics<parallel>, #tpu.dimension_semantics<arbitrary>], iteration_bounds = array<i64: 1, 2, 1>, scalar_prefetch = 0 : i64, scratch_operands = 0 : i64, tpu.core_type = #tpu.core_type<tc>, window_params = [{transform_indices = @transform_0, window_bounds = array<i64: 16, 1024>}, {transform_indices = @transform_1, window_bounds = array<i64: 1024, 512>}, {transform_indices = @transform_2, window_bounds = array<i64: 1, 512>}, {transform_indices = @transform_3, window_bounds = array<i64: 16, 512>}]} {
    %c0 = arith.constant 0 : index
    %c0_0 = arith.constant 0 : index
    %0 = vector.load %arg3[%c0, %c0_0] : memref<16x1024xbf16, #tpu.memory_space<vmem>>, vector<16x1024xbf16>
    %c0_1 = arith.constant 0 : index
    %c0_2 = arith.constant 0 : index
    %1 = vector.load %arg4[%c0_1, %c0_2] : memref<1024x512xbf16, #tpu.memory_space<vmem>>, vector<1024x512xbf16>
    %cst = arith.constant dense<0.000000e+00> : vector<16x512xf32>
    %2 = tpu.matmul %0, %1, %cst {dimension_numbers = #tpu.dot_dimension_numbers<[1], [0], [0], [1], [0, 0, 1, 1], [], []>} : vector<16x1024xbf16>, vector<1024x512xbf16>, vector<16x512xf32> -> vector<16x512xf32>
    %c0_3 = arith.constant 0 : index
    %c0_4 = arith.constant 0 : index
    %3 = vector.load %arg5[%c0_3, %c0_4] : memref<1x512xf32, #tpu.memory_space<vmem>>, vector<1x512xf32>
    %4 = vector.broadcast %3 : vector<1x512xf32> to vector<16x512xf32>
    %5 = arith.addf %2, %4 : vector<16x512xf32>
    %cst_5 = arith.constant 0.000000e+00 : f32
    %6 = vector.broadcast %cst_5 : f32 to vector<16x512xf32>
    %7 = arith.maximumf %5, %6 : vector<16x512xf32>
    %c0_6 = arith.constant 0 : index
    %c0_7 = arith.constant 0 : index
    %8 = vector.load %arg6[%c0_6, %c0_7] : memref<16x512xf32, #tpu.memory_space<vmem>>, vector<16x512xf32>
    tpu.vector_store %arg6[%c0_6, %c0_7], %7 {strides = array<i32>} : memref<16x512xf32, #tpu.memory_space<vmem>>, vector<16x512xf32>,
    return
  }
  func.func @transform_0(%arg0: i32, %arg1: i32, %arg2: i32) -> (i32, i32) {
    %c0_i32 = arith.constant 0 : i32
    return %arg0, %arg2 : i32, i32
  }
  func.func @transform_1(%arg0: i32, %arg1: i32, %arg2: i32) -> (i32, i32) {
    %c0_i32 = arith.constant 0 : i32
    return %arg2, %arg1 : i32, i32
  }
  func.func @transform_2(%arg0: i32, %arg1: i32, %arg2: i32) -> (i32, i32) {
    %c0_i32 = arith.constant 0 : i32
    %c0_i32_0 = arith.constant 0 : i32
    return %c0_i32, %arg1 : i32, i32
  }
  func.func @transform_3(%arg0: i32, %arg1: i32, %arg2: i32) -> (i32, i32) {
    %c0_i32 = arith.constant 0 : i32
    return %arg0, %arg1 : i32, i32
  }
}

</mosaic_0001>

<bundles_post_ra>
// kernel: model_forward.3
= control target key start
LH: loop header
LB: loop body
LE: loop exit
PB: predicated region body
PF: predicated region fallthrough
CT: control target
= control target key end

     0   :  { %8 = vsyncpa [#allocation3], 0  ;;  %s1341_s0 = inlined_call_operand.vmem [shape: bf16[16,256], index: 0, kind: input, shape index: {}]   ;;  %s1342_s1 = inlined_call_operand.hbm [shape: bf16[256,512], index: 1, kind: input, shape index: {}]   ;;  %s1343_s2 = inlined_call_operand.hbm [shape: f32[1,512], index: 2, kind: input, shape index: {}]   ;;  %s1344_s3 = inlined_call_operand.vmem [shape: bf16[16,512], index: 3, kind: output, shape index: {}]  }
   0x1   :  { %10 = vsyncpa [#allocation3 + $0x1], 0 }
   0x2   :  { %11 = vsyncpa [#allocation5], 0 }
   0x3   :  { %13 = vsyncpa [#allocation5 + $0x1], 0  ;;  %s1138_s12 = smov 0   ;;  %s1140_s13 = smov 0  }
   0x4   :  { %s1142_s14 = smov 0   ;;  %s1144_s15 = smov 0  }
   0x5   :  { %s1146_s16 = smov 0   ;;  %s1148_s17 = smov 0  }
   0x6 LB: > { %s745_s18 = sadd.s32 4294967295, %s1113_s17   ;;  %s34_s19 = sadd.s32 1, %s1109_s16  ;;  %s1113_s17 = sphi %s1148_s17, %s19_s17   ;;  %s1109_s16 = sphi %s1146_s16, %s1353_s16   ;;  %s1105_s15 = sphi %s1144_s15, %s1352_s15   ;;  %s1101_s14 = sphi %s1142_s14, %s1351_s14   ;;  %s1097_s13 = sphi %s1140_s13, %s1350_s13   ;;  %s1093_s12 = sphi %s1138_s12, %s1349_s12  }
   0x7   : > { %p36_p0 = scmp.ge.s32.totalorder %s34_s19, 2  ;;  %s75_s20 = sadd.s32 1, %s1101_s14 }
   0x8   : > { %p82_p1 = scmp.ne.s32.totalorder %s1101_s14, %s1097_s13  ;;  %p83_p2 = scmp.eq.s32.totalorder %s1113_s17, 0 }
   0x9   : > { %s1355_s19 = smov (%p36_p0, %s34_s19), 0  ;;  %p88_p4 = scmp.ne.s32.totalorder %s1097_s13, %s1093_s12 }
   0xa   : > { %p1174_p3 = por %p83_p2, %p82_p1  ;;  %s71_s22 = ssub.s32 %s1109_s16, %s1355_s19 }
   0xb   : > { %p89_p5 = scmp.eq.s32.totalorder %s745_s18, 0  ;;  %p73_p6 = scmp.eq.s32.totalorder %s71_s22, 0 }
   0xc   : > { %p140_p7 = scmp.eq.s32.totalorder %s745_s18, 1  ;;  %p947_p10 = scmp.lt.s32.totalorder %s1113_s17, 2 }
   0xd   : > { %p1181_p8 = por %p89_p5, %p88_p4  ;;  %s1194_s26 = sand.u32 1, %s1101_s14  }
   0xe   : > { %s1186_s24 = scalar_select %p73_p6, %s1101_s14, %s75_s20  }
   0xf   : > { %p1188_p9 = por %p140_p7, %p82_p1  ;;  %s900_s27 = sshll.u32 %s1109_s16, 3 }
  0x10   : > { %s750_s28 = sshll.u32 %s1194_s26, 8  ;;  %s193_s4 = scalar_lea.hbm %s1342_s1, %s900_s27 }
  0x11   : > { %s194_s5 = sshll.u32 %s193_s4, 4  ;;  %s185_s6 = scalar_lea.vmem [#allocation2], %s750_s28  ;;  %s195_s5 = int_to_ptr.hbm [resolvable:$true] %s194_s5 }
  0x12   : > { %s196_s7 = sshll.u32 %s185_s6, 4  ;;  %p1203_p11 = pnand %p947_p10, %p1174_p3  ;;  %s197_s7 = int_to_ptr.vmem [resolvable:$true] %s196_s7 }
  0x13   : > { %p755_p12 = scmp.ge.s32.totalorder %s1113_s17, 1  ;;  %s182_s9 = scalar_lea.sflag [#allocation3], %s1194_s26 }
  0x14   : > { %s1115_s10 = smov 256   ;;  %s1116_s11 = smov 128  }
  0x15   : > { %s1117_s12 = smov 8   ;;  %p223_p13 = scmp.lt.s32.totalorder %s1113_s17, 3 }
  0x16   : > { %943 = dma.hbm_to_vmem [thread:$0]  (!%p1203_p11), %s195_s5, 4096, %s197_s7, %s182_s9, %s1115_s10, %s1116_s11, %s1117_s12  }
  0x17   : > { %s753_s18 = sshll.u32 %s1194_s26, 1  ;;  %s754_s20 = sshll.u32 %s1109_s16, 1 }
  0x18   : > { %p224_p0 = pnand %p755_p12, %p223_p13  ;;  %s214_s27 = scalar_lea.hbm %s1343_s2, %s754_s20 }
  0x19   : > { %s210_s28 = scalar_lea.vmem [#allocation4], %s753_s18  ;;  %s216_s30 = sshll.u32 %s214_s27, 4  ;;  %s217_s30 = int_to_ptr.hbm [resolvable:$true] %s216_s30 }
  0x1a   : > { %s218_s29 = sshll.u32 %s210_s28, 4  ;;  %s207_s4 = scalar_lea.sflag [#allocation5], %s1194_s26  ;;  %s219_s29 = int_to_ptr.vmem [resolvable:$true] %s218_s29 }
  0x1b   : > { %946 = dma.hbm_to_vmem [thread:$0]  (!%p1203_p11), %s217_s30, 32, %s219_s29, %s207_s4  }
  0x1c   : > { %227 = sbr.rel (%p224_p0) target bundleno = 230 (0xe6), region = 32  ;;  %s1221_s5 = sand.u32 (!%p224_p0), 1, %s1097_s13  }
  0x1d   : > { %s756_s6 = sshll.u32 (!%p224_p0), %s1221_s5, 8  ;;  %s230_s7 = scalar_lea.sflag (!%p224_p0), [#allocation3], %s1221_s5 }
  0x1e   : > { %s1225_s9 = scalar_lea.vmem (!%p224_p0), [#allocation2], %s756_s6 }
  0x21   : > { %1084 = dma.done.wait (%p1181_p8), %s230_s7, 4096  }
  0x22   : > { %1086 = vsyncadd (%p1181_p8), %s230_s7, 4294963200  ;;  %s757_s26 = sshll.u32 %s1221_s5, 1  ;;  %s240_s8 = scalar_lea.sflag [#allocation5], %s1221_s5 }
  0x23   : > { %s1233_s10 = scalar_lea.vmem [#allocation4], %s757_s26 }
  0x24   : > { %1088 = dma.done.wait (%p1181_p8), %s240_s8, 32  }
  0x25   : > { %1090 = vsyncadd (%p1181_p8), %s240_s8, 4294967264  ;;  %v825_v0 = vld [vmem:[%s1225_s9 + $0x70] sm:$0xf]  ;;  %v918_v1 = vld [vmem:[%s1225_s9 + $0x74] sm:$0xf0]  ;;  %s758_s28 = sshll.u32 %s1221_s5, 4 }
  0x26   : > { %v889_v2 = vld [vmem:[%s1225_s9 + $0xf0] sm:$0xf]  ;;  %v826_v3 = vor.u32 %v918_v1, %v825_v0  ;;  %v934_v4 = vld [vmem:[%s1225_s9 + $0xf4] sm:$0xf0]  ;;  %v917_v5 = vld [vmem:[%s1225_s9 + $0x74] sm:$0xf] }
  0x27   : > { %v827_v6 = vld [vmem:[%s1225_s9 + $0x78] sm:$0xf0]  ;;  %v890_v7 = vor.u32 %v934_v4, %v889_v2  ;;  %v933_v9 = vld [vmem:[%s1225_s9 + $0xf4] sm:$0xf]  ;;  %v817_v11 = vld [vmem:[%s1225_s9 + $0x60] sm:$0xf] }
  0x28   : > { %v830_v8 = vor.u32 %v917_v5, %v827_v6  ;;  %v891_v10 = vld [vmem:[%s1225_s9 + $0xf8] sm:$0xf0]  ;;  %508 = vmatpush.bf16.msra.mxu0 %v826_v3  ;;  %v916_v13 = vld [vmem:[%s1225_s9 + $0x64] sm:$0xf0]  ;;  %v881_v14 = vld [vmem:[%s1225_s9 + $0xe0] sm:$0xf] }
  0x29   : > { %v894_v12 = vor.u32 %v933_v9, %v891_v10  ;;  %v932_v15 = vld [vmem:[%s1225_s9 + $0xe4] sm:$0xf0]  ;;  %522 = vmatpush.bf16.msra.mxu1 %v890_v7  ;;  %v818_v16 = vor.u32 %v916_v13, %v817_v11  ;;  %v915_v18 = vld [vmem:[%s1225_s9 + $0x64] sm:$0xf]  ;;  %v819_v19 = vld [vmem:[%s1225_s9 + $0x68] sm:$0xf0] }
  0x2a   : > { %536 = vmatpush.bf16.msra.mxu2 %v830_v8  ;;  %v882_v17 = vor.u32 %v932_v15, %v881_v14  ;;  %v931_v20 = vld [vmem:[%s1225_s9 + $0xe4] sm:$0xf]  ;;  %v822_v21 = vor.u32 %v915_v18, %v819_v19  ;;  %v883_v22 = vld [vmem:[%s1225_s9 + $0xe8] sm:$0xf0]  ;;  %v809_v23 = vld [vmem:[%s1225_s9 + $0x50] sm:$0xf] }
  0x2b   : > { %550 = vmatpush.bf16.msra.mxu3 %v894_v12  ;;  %v914_v24 = vld [vmem:[%s1225_s9 + $0x54] sm:$0xf0]  ;;  %v886_v25 = vor.u32 %v931_v20, %v883_v22  ;;  %v873_v26 = vld [vmem:[%s1225_s9 + $0xd0] sm:$0xf]  ;;  %v913_v28 = vld [vmem:[%s1225_s9 + $0x54] sm:$0xf] }
  0x2c   : > { %v930_v27 = vld [vmem:[%s1225_s9 + $0xd4] sm:$0xf0]  ;;  %509 = vmatpush.bf16.msra.mxu0 %v818_v16  ;;  %v810_v29 = vor.u32 %v914_v24, %v809_v23  ;;  %v811_v30 = vld [vmem:[%s1225_s9 + $0x58] sm:$0xf0]  ;;  %v929_v31 = vld [vmem:[%s1225_s9 + $0xd4] sm:$0xf] }
  0x2d   : > { %v875_v32 = vld [vmem:[%s1225_s9 + $0xd8] sm:$0xf0]  ;;  %523 = vmatpush.bf16.msra.mxu1 %v882_v17  ;;  %v874_v33 = vor.u32 %v930_v27, %v873_v26  ;;  %v814_v34 = vor.u32 %v913_v28, %v811_v30  ;;  %v801_v35 = vld [vmem:[%s1225_s9 + $0x40] sm:$0xf]  ;;  %v912_v36 = vld [vmem:[%s1225_s9 + $0x44] sm:$0xf0] }
  0x2e   : > { %537 = vmatpush.bf16.msra.mxu2 %v822_v21  ;;  %v865_v37 = vld [vmem:[%s1225_s9 + $0xc0] sm:$0xf]  ;;  %v878_v38 = vor.u32 %v929_v31, %v875_v32  ;;  %v928_v39 = vld [vmem:[%s1225_s9 + $0xc4] sm:$0xf0]  ;;  %v911_v40 = vld [vmem:[%s1225_s9 + $0x44] sm:$0xf]  ;;  %v802_v44 = vor.u32 %v912_v36, %v801_v35 }
  0x2f   : > { %551 = vmatpush.bf16.msra.mxu3 %v886_v25  ;;  %v803_v41 = vld [vmem:[%s1225_s9 + $0x48] sm:$0xf0]  ;;  %v927_v42 = vld [vmem:[%s1225_s9 + $0xc4] sm:$0xf]  ;;  %v866_v45 = vor.u32 %v928_v39, %v865_v37  ;;  %v793_v47 = vld [vmem:[%s1225_s9 + $0x30] sm:$0xf] }
  0x30   : > { %v867_v43 = vld [vmem:[%s1225_s9 + $0xc8] sm:$0xf0]  ;;  %510 = vmatpush.bf16.msra.mxu0 %v810_v29  ;;  %v806_v46 = vor.u32 %v911_v40, %v803_v41  ;;  %v910_v48 = vld [vmem:[%s1225_s9 + $0x34] sm:$0xf0]  ;;  %v857_v49 = vld [vmem:[%s1225_s9 + $0xb0] sm:$0xf] }
  0x31   : > { %524 = vmatpush.bf16.msra.mxu1 %v874_v33  ;;  %v870_v50 = vor.u32 %v927_v42, %v867_v43  ;;  %v926_v51 = vld [vmem:[%s1225_s9 + $0xb4] sm:$0xf0]  ;;  %v909_v52 = vld [vmem:[%s1225_s9 + $0x34] sm:$0xf]  ;;  %v795_v53 = vld [vmem:[%s1225_s9 + $0x38] sm:$0xf0]  ;;  %v794_v56 = vor.u32 %v910_v48, %v793_v47 }
  0x32   : > { %538 = vmatpush.bf16.msra.mxu2 %v814_v34  ;;  %v925_v54 = vld [vmem:[%s1225_s9 + $0xb4] sm:$0xf]  ;;  %v859_v55 = vld [vmem:[%s1225_s9 + $0xb8] sm:$0xf0]  ;;  %v858_v57 = vor.u32 %v926_v51, %v857_v49  ;;  %v798_v58 = vor.u32 %v909_v52, %v795_v53  ;;  %v785_v59 = vld [vmem:[%s1225_s9 + $0x20] sm:$0xf] }
  0x33   : > { %552 = vmatpush.bf16.msra.mxu3 %v878_v38  ;;  %v908_v60 = vld [vmem:[%s1225_s9 + $0x24] sm:$0xf0]  ;;  %v849_v61 = vld [vmem:[%s1225_s9 + $0xa0] sm:$0xf]  ;;  %v862_v62 = vor.u32 %v925_v54, %v859_v55  ;;  %v907_v0 = vld [vmem:[%s1225_s9 + $0x24] sm:$0xf] }
  0x34   : > { %511 = vmatpush.bf16.msra.mxu0 %v802_v44  ;;  %v924_v63 = vld [vmem:[%s1225_s9 + $0xa4] sm:$0xf0]  ;;  %v787_v1 = vld [vmem:[%s1225_s9 + $0x28] sm:$0xf0]  ;;  %v923_v2 = vld [vmem:[%s1225_s9 + $0xa4] sm:$0xf]  ;;  %v786_v4 = vor.u32 %v908_v60, %v785_v59 }
  0x35   : > { %525 = vmatpush.bf16.msra.mxu1 %v866_v45  ;;  %v851_v3 = vld [vmem:[%s1225_s9 + $0xa8] sm:$0xf0]  ;;  %v850_v5 = vor.u32 %v924_v63, %v849_v61  ;;  %v790_v6 = vor.u32 %v907_v0, %v787_v1  ;;  %v777_v7 = vld [vmem:[%s1225_s9 + $0x10] sm:$0xf]  ;;  %v906_v8 = vld [vmem:[%s1225_s9 + $0x14] sm:$0xf0] }
  0x36   : > { %539 = vmatpush.bf16.msra.mxu2 %v806_v46  ;;  %v841_v9 = vld [vmem:[%s1225_s9 + $0x90] sm:$0xf]  ;;  %v854_v10 = vor.u32 %v923_v2, %v851_v3  ;;  %v922_v11 = vld [vmem:[%s1225_s9 + $0x94] sm:$0xf0]  ;;  %v905_v12 = vld [vmem:[%s1225_s9 + $0x14] sm:$0xf]  ;;  %v778_v16 = vor.u32 %v906_v8, %v777_v7 }
  0x37   : > { %553 = vmatpush.bf16.msra.mxu3 %v870_v50  ;;  %v779_v13 = vld [vmem:[%s1225_s9 + $0x18] sm:$0xf0]  ;;  %v921_v14 = vld [vmem:[%s1225_s9 + $0x94] sm:$0xf]  ;;  %v842_v17 = vor.u32 %v922_v11, %v841_v9  ;;  %v769_v19 = vld [vmem:[%s1225_s9] sm:$0xf] }
  0x38   : > { %512 = vmatpush.bf16.msra.mxu0 %v794_v56  ;;  %v843_v15 = vld [vmem:[%s1225_s9 + $0x98] sm:$0xf0]  ;;  %v782_v18 = vor.u32 %v905_v12, %v779_v13  ;;  %v904_v20 = vld [vmem:[%s1225_s9 + $0x4] sm:$0xf0]  ;;  %v833_v21 = vld [vmem:[%s1225_s9 + $0x80] sm:$0xf] }
  0x39   : > { %526 = vmatpush.bf16.msra.mxu1 %v858_v57  ;;  %v846_v22 = vor.u32 %v921_v14, %v843_v15  ;;  %v920_v23 = vld [vmem:[%s1225_s9 + $0x84] sm:$0xf0]  ;;  %v903_v24 = vld [vmem:[%s1225_s9 + $0x4] sm:$0xf]  ;;  %v771_v25 = vld [vmem:[%s1225_s9 + $0x8] sm:$0xf0]  ;;  %v770_v28 = vor.u32 %v904_v20, %v769_v19 }
  0x3a   : > { %540 = vmatpush.bf16.msra.mxu2 %v798_v58  ;;  %v919_v26 = vld [vmem:[%s1225_s9 + $0x84] sm:$0xf]  ;;  %v835_v27 = vld [vmem:[%s1225_s9 + $0x88] sm:$0xf0]  ;;  %v761_v29 = vld [vmem:[%s1341_s0] sm:$0xf]  ;;  %v834_v31 = vor.u32 %v920_v23, %v833_v21  ;;  %v774_v32 = vor.u32 %v903_v24, %v771_v25 }
  0x3b   : > { %554 = vmatpush.bf16.msra.mxu3 %v862_v62  ;;  %v902_v30 = vld [vmem:[%s1341_s0 + $0x4] sm:$0xf0]  ;;  %v901_v33 = vld [vmem:[%s1341_s0 + $0x4] sm:$0xf]  ;;  %v763_v34 = vld [vmem:[%s1341_s0 + $0x8] sm:$0xf0]  ;;  %v838_v35 = vor.u32 %v919_v26, %v835_v27 }
  0x3c   : > { %513 = vmatpush.bf16.msra.mxu0 %v786_v4  ;;  %v762_v36 = vor.u32 %v902_v30, %v761_v29  ;;  %v766_v37 = vor.u32 %v901_v33, %v763_v34  ;;  %v332_v38 = vld [vmem:[%s1233_s10] sm:$0x3]  ;;  %s280_s29 = scalar_lea.vmem [#allocation6], %s758_s28  ;;  %s935_s30 = sshll.u32 (%p1188_p9), %s1105_s15, 3 }
  0x3d   : > { %527 = vmatpush.bf16.msra.mxu1 %v850_v5  ;;  %v334_v39 = vperm.slane %v332_v38, 0  ;;  %v335_v42 = vperm.slane %v332_v38, 1  ;;  %s584_s6 = scalar_lea.vmem (%p1188_p9), %s1344_s3, %s935_s30 }
  0x3e   : > { %541 = vmatpush.bf16.msra.mxu2 %v790_v6 }
  0x3f   : > { %555 = vmatpush.bf16.msra.mxu3 %v854_v10 }
  0x40   : > { %514 = vmatpush.bf16.msra.mxu0 %v778_v16 }
  0x41   : > { %528 = vmatpush.bf16.msra.mxu1 %v842_v17 }
  0x42   : > { %542 = vmatpush.bf16.msra.mxu2 %v782_v18 }
  0x43   : > { %556 = vmatpush.bf16.msra.mxu3 %v846_v22 }
  0x44   : > { %515 = vmatpush.bf16.msra.mxu0 %v770_v28 }
  0x45   : > { %529 = vmatpush.bf16.msra.mxu1 %v834_v31 }
  0x46   : > { %543 = vmatpush.bf16.msra.mxu2 %v774_v32 }
  0x47   : > { %557 = vmatpush.bf16.msra.mxu3 %v838_v35  ;;  %516 = vmatmul.bf16.vlgmr.msra.gmra.mxu0 %v762_v36 }
  0x48   : > { %530 = vmatmul.bf16.vlgmr.msra.gmra.mxu1 %v766_v37 }
  0x49   : > { %544 = vmatmul.bf16.vlgmr.msra.gmra.mxu2 %v762_v36 }
  0x4a   : > { %558 = vmatmul.bf16.vlgmr.msra.gmra.mxu3 %v766_v37 }
  0xc4   : > { %v517_v40 = vpop.f32.mrf.mxu0 }
  0xc5   : > { %v518_v41 = vadd.f32 %v517_v40, %v334_v39  ;;  %v531_v43 = vpop.f32.mrf.mxu1 }
  0xc7   : > { %v532_v44 = vadd.f32 %v531_v43, %v518_v41 }
  0xc9   : > { %v564_v49 = vmax.f32 %v532_v44, 0.0 }
  0xcc   : > { %v545_v45 = vpop.f32.mrf.mxu2  ;;  %v519_v48 = vpop.f32.mrf.mxu0 }
  0xcd   : > { %v546_v46 = vadd.f32 %v545_v45, %v335_v42  ;;  %v559_v47 = vpop.f32.mrf.mxu3  ;;  %v520_v52 = vadd.f32 %v519_v48, %v334_v39  ;;  %v533_v54 = vpop.f32.mrf.mxu1 }
  0xcf   : > { %v560_v50 = vadd.f32 %v559_v47, %v546_v46  ;;  %v534_v56 = vadd.f32 %v533_v54, %v520_v52 }
  0xd1   : > { %v565_v51 = vmax.f32 %v560_v50, 0.0  ;;  %v566_v60 = vmax.f32 %v534_v56, 0.0 }
  0xd3   : > { %v568_v53 = vpack.c.bf16 %v565_v51, %v564_v49 }
  0xd4   : > { %v547_v55 = vpop.f32.mrf.mxu2 }
  0xd5   : > { %570 = vst [vmem:[%s280_s29] sm:$0xff] %v568_v53  ;;  %v548_v57 = vadd.f32 %v547_v55, %v335_v42  ;;  %v561_v58 = vpop.f32.mrf.mxu3 }
  0xd7   : > { %v562_v59 = vadd.f32 %v561_v58, %v548_v57 }
  0xd9   : > { %v567_v61 = vmax.f32 %v562_v59, 0.0  ;;  %578 = sbr.rel (!%p1188_p9) target bundleno = 230 (0xe6), region = 44 }
  0xdb   : > { %v569_v62 = vpack.c.bf16 %v567_v61, %v566_v60 }
  0xdc   : > { %v615_v63 = vld [vmem:[%s280_s29] sm:$0xff] (%p1188_p9) }
  0xdd   : > { %571 = vst [vmem:[%s280_s29 + $0x8] sm:$0xff] %v569_v62 }
  0xde   : > { %616 = vst [vmem:[%s584_s6] sm:$0xff] %v615_v63 }
  0xe4   : > { %v617_v0 = vld [vmem:[%s280_s29 + $0x8] sm:$0xff] }
  0xe5   : > { %618 = vst [vmem:[%s584_s6 + $0x10] sm:$0xff] %v617_v0 }
  0xe6 PF: > { %s19_s17 = sadd.s32 1, %s1113_s17   ;;  %s1349_s12 = smov %s1097_s13 }
  0xe7   : > { %p16_p1 = scmp.ge.s32.totalorder %s19_s17, 4   ;;  %s1350_s13 = smov %s1101_s14 }
  0xe8   : > { %s1351_s14 = smov %s1186_s24  ;;  %s1352_s15 = smov %s1109_s16 }
  0xe9   : > { %s1353_s16 = smov %s1355_s19  ;;  %18 = sbr.rel (!%p16_p1) target bundleno = 6 (0x6), region = 126 }
  0xee   :  { %634 = vsyncpa [#allocation3], 1 }
  0xef   :  { %636 = vsyncpa [#allocation3 + $0x1], 1 }
  0xf0   :  { %637 = vsyncpa [#allocation5], 1 }
  0xf1   :  { %639 = vsyncpa [#allocation5 + $0x1], 1 }

// kernel: model_forward.4
= control target key start
LH: loop header
LB: loop body
LE: loop exit
PB: predicated region body
PF: predicated region fallthrough
CT: control target
= control target key end

     0   :  { %8 = vsyncpa [#allocation3], 0  ;;  %s2829_s0 = inlined_call_operand.vmem [shape: bf16[16,512], index: 0, kind: input, shape index: {}]   ;;  %s2830_s1 = inlined_call_operand.hbm [shape: bf16[512,1024], index: 1, kind: input, shape index: {}]   ;;  %s2831_s2 = inlined_call_operand.hbm [shape: f32[1,1024], index: 2, kind: input, shape index: {}]   ;;  %s2832_s3 = inlined_call_operand.vmem [shape: bf16[16,1024], index: 3, kind: output, shape index: {}]  }
   0x1   :  { %10 = vsyncpa [#allocation3 + $0x1], 0 }
   0x2   :  { %11 = vsyncpa [#allocation5], 0 }
   0x3   :  { %13 = vsyncpa [#allocation5 + $0x1], 0  ;;  %s2382_s12 = smov 0   ;;  %s2384_s13 = smov 0  }
   0x4   :  { %s2386_s14 = smov 0   ;;  %s2388_s15 = smov 0  }
   0x5   :  { %s2390_s16 = smov 0   ;;  %s2392_s17 = smov 0  }
   0x6 LB: > { %s1499_s18 = sadd.s32 4294967295, %s2357_s17   ;;  %s34_s19 = sadd.s32 1, %s2353_s16  ;;  %s2357_s17 = sphi %s2392_s17, %s19_s17   ;;  %s2353_s16 = sphi %s2390_s16, %s2841_s16   ;;  %s2349_s15 = sphi %s2388_s15, %s2840_s15   ;;  %s2345_s14 = sphi %s2386_s14, %s2839_s14   ;;  %s2341_s13 = sphi %s2384_s13, %s2838_s13   ;;  %s2337_s12 = sphi %s2382_s12, %s2837_s12  }
   0x7   : > { %p36_p0 = scmp.ge.s32.totalorder %s34_s19, 2  ;;  %s75_s20 = sadd.s32 1, %s2345_s14 }
   0x8   : > { %p82_p1 = scmp.ne.s32.totalorder %s2345_s14, %s2341_s13  ;;  %p83_p2 = scmp.eq.s32.totalorder %s2357_s17, 0 }
   0x9   : > { %s2843_s19 = smov (%p36_p0, %s34_s19), 0  ;;  %p88_p4 = scmp.ne.s32.totalorder %s2341_s13, %s2337_s12 }
   0xa   : > { %p2418_p3 = por %p83_p2, %p82_p1  ;;  %s71_s22 = ssub.s32 %s2353_s16, %s2843_s19 }
   0xb   : > { %p89_p5 = scmp.eq.s32.totalorder %s1499_s18, 0  ;;  %p73_p6 = scmp.eq.s32.totalorder %s71_s22, 0 }
   0xc   : > { %p140_p7 = scmp.eq.s32.totalorder %s1499_s18, 1  ;;  %p2191_p10 = scmp.lt.s32.totalorder %s2357_s17, 2 }
   0xd   : > { %p2425_p8 = por %p89_p5, %p88_p4  ;;  %s2438_s26 = sand.u32 1, %s2345_s14  }
   0xe   : > { %s2430_s24 = scalar_select %p73_p6, %s2345_s14, %s75_s20  }
   0xf   : > { %p2432_p9 = por %p140_p7, %p82_p1  ;;  %s2046_s27 = sshll.u32 %s2353_s16, 4 }
  0x10   : > { %s1504_s28 = sshll.u32 %s2438_s26, 10  ;;  %s193_s4 = scalar_lea.hbm %s2830_s1, %s2046_s27 }
  0x11   : > { %s194_s5 = sshll.u32 %s193_s4, 4  ;;  %s185_s6 = scalar_lea.vmem [#allocation2], %s1504_s28  ;;  %s195_s5 = int_to_ptr.hbm [resolvable:$true] %s194_s5 }
  0x12   : > { %s196_s7 = sshll.u32 %s185_s6, 4  ;;  %p2447_p11 = pnand %p2191_p10, %p2418_p3  ;;  %s197_s7 = int_to_ptr.vmem [resolvable:$true] %s196_s7 }
  0x13   : > { %p1509_p12 = scmp.ge.s32.totalorder %s2357_s17, 1  ;;  %s182_s9 = scalar_lea.sflag [#allocation3], %s2438_s26 }
  0x14   : > { %s2359_s10 = smov 512   ;;  %s2360_s11 = smov 256  }
  0x15   : > { %s2361_s12 = smov 16   ;;  %p223_p13 = scmp.lt.s32.totalorder %s2357_s17, 3 }
  0x16   : > { %2187 = dma.hbm_to_vmem [thread:$0]  (!%p2447_p11), %s195_s5, 16384, %s197_s7, %s182_s9, %s2359_s10, %s2360_s11, %s2361_s12  }
  0x17   : > { %s1507_s18 = sshll.u32 %s2438_s26, 2  ;;  %s1508_s20 = sshll.u32 %s2353_s16, 2 }
  0x18   : > { %p224_p0 = pnand %p1509_p12, %p223_p13  ;;  %s214_s27 = scalar_lea.hbm %s2831_s2, %s1508_s20 }
  0x19   : > { %s210_s28 = scalar_lea.vmem [#allocation4], %s1507_s18  ;;  %s216_s30 = sshll.u32 %s214_s27, 4  ;;  %s217_s30 = int_to_ptr.hbm [resolvable:$true] %s216_s30 }
  0x1a   : > { %s218_s29 = sshll.u32 %s210_s28, 4  ;;  %s207_s4 = scalar_lea.sflag [#allocation5], %s2438_s26  ;;  %s219_s29 = int_to_ptr.vmem [resolvable:$true] %s218_s29 }
  0x1b   : > { %2190 = dma.hbm_to_vmem [thread:$0]  (!%p2447_p11), %s217_s30, 64, %s219_s29, %s207_s4  }
  0x1c   : > { %227 = sbr.rel (%p224_p0) target bundleno = 326 (0x146), region = 32  ;;  %s2465_s5 = sand.u32 (!%p224_p0), 1, %s2341_s13  }
  0x1d   : > { %s1510_s6 = sshll.u32 (!%p224_p0), %s2465_s5, 10  ;;  %s230_s7 = scalar_lea.sflag (!%p224_p0), [#allocation3], %s2465_s5 }
  0x1e   : > { %s2469_s9 = scalar_lea.vmem (!%p224_p0), [#allocation2], %s1510_s6 }
  0x21   : > { %2328 = dma.done.wait (%p2425_p8), %s230_s7, 16384  }
  0x22   : > { %2330 = vsyncadd (%p2425_p8), %s230_s7, 4294950912  ;;  %s1511_s26 = sshll.u32 %s2465_s5, 2  ;;  %s240_s8 = scalar_lea.sflag [#allocation5], %s2465_s5 }
  0x23   : > { %s2477_s10 = scalar_lea.vmem [#allocation4], %s1511_s26 }
  0x24   : > { %2332 = dma.done.wait (%p2425_p8), %s240_s8, 64  }
  0x25   : > { %2334 = vsyncadd (%p2425_p8), %s240_s8, 4294967232  ;;  %v1643_v0 = vld [vmem:[%s2469_s9 + $0xe0] sm:$0xf]  ;;  %v2081_v1 = vld [vmem:[%s2469_s9 + $0xec] sm:$0xf0] }
  0x26   : > { %v1771_v2 = vld [vmem:[%s2469_s9 + $0x1e0] sm:$0xf]  ;;  %v1644_v3 = vor.u32 %v2081_v1, %v1643_v0  ;;  %v2113_v4 = vld [vmem:[%s2469_s9 + $0x1ec] sm:$0xf0] }
  0x27   : > { %v1899_v5 = vld [vmem:[%s2469_s9 + $0x2e0] sm:$0xf]  ;;  %v2145_v6 = vld [vmem:[%s2469_s9 + $0x2ec] sm:$0xf0]  ;;  %v1772_v7 = vor.u32 %v2113_v4, %v1771_v2 }
  0x28   : > { %v1900_v8 = vor.u32 %v2145_v6, %v1899_v5  ;;  %v2027_v9 = vld [vmem:[%s2469_s9 + $0x3e0] sm:$0xf]  ;;  %v2177_v10 = vld [vmem:[%s2469_s9 + $0x3ec] sm:$0xf0]  ;;  %1100 = vmatpush.bf16.msra.mxu0 %v1644_v3 }
  0x29   : > { %v1627_v11 = vld [vmem:[%s2469_s9 + $0xc0] sm:$0xf]  ;;  %v2028_v12 = vor.u32 %v2177_v10, %v2027_v9  ;;  %v2077_v13 = vld [vmem:[%s2469_s9 + $0xcc] sm:$0xf0]  ;;  %1114 = vmatpush.bf16.msra.mxu1 %v1772_v7 }
  0x2a   : > { %v1755_v14 = vld [vmem:[%s2469_s9 + $0x1c0] sm:$0xf]  ;;  %v2109_v15 = vld [vmem:[%s2469_s9 + $0x1cc] sm:$0xf0]  ;;  %1128 = vmatpush.bf16.msra.mxu2 %v1900_v8  ;;  %v1628_v16 = vor.u32 %v2077_v13, %v1627_v11 }
  0x2b   : > { %v1756_v17 = vor.u32 %v2109_v15, %v1755_v14  ;;  %v1883_v18 = vld [vmem:[%s2469_s9 + $0x2c0] sm:$0xf]  ;;  %v2141_v19 = vld [vmem:[%s2469_s9 + $0x2cc] sm:$0xf0]  ;;  %1142 = vmatpush.bf16.msra.mxu3 %v2028_v12 }
  0x2c   : > { %v2011_v20 = vld [vmem:[%s2469_s9 + $0x3c0] sm:$0xf]  ;;  %v1884_v21 = vor.u32 %v2141_v19, %v1883_v18  ;;  %v2173_v22 = vld [vmem:[%s2469_s9 + $0x3cc] sm:$0xf0]  ;;  %1101 = vmatpush.bf16.msra.mxu0 %v1628_v16 }
  0x2d   : > { %v1611_v23 = vld [vmem:[%s2469_s9 + $0xa0] sm:$0xf]  ;;  %v2073_v24 = vld [vmem:[%s2469_s9 + $0xac] sm:$0xf0]  ;;  %v2012_v25 = vor.u32 %v2173_v22, %v2011_v20  ;;  %1115 = vmatpush.bf16.msra.mxu1 %v1756_v17 }
  0x2e   : > { %v1739_v26 = vld [vmem:[%s2469_s9 + $0x1a0] sm:$0xf]  ;;  %v2105_v27 = vld [vmem:[%s2469_s9 + $0x1ac] sm:$0xf0]  ;;  %v1612_v29 = vor.u32 %v2073_v24, %v1611_v23  ;;  %1129 = vmatpush.bf16.msra.mxu2 %v1884_v21 }
  0x2f   : > { %v1867_v28 = vld [vmem:[%s2469_s9 + $0x2a0] sm:$0xf]  ;;  %v2137_v30 = vld [vmem:[%s2469_s9 + $0x2ac] sm:$0xf0]  ;;  %v1740_v33 = vor.u32 %v2105_v27, %v1739_v26  ;;  %1143 = vmatpush.bf16.msra.mxu3 %v2012_v25 }
  0x30   : > { %v1995_v31 = vld [vmem:[%s2469_s9 + $0x3a0] sm:$0xf]  ;;  %v2169_v32 = vld [vmem:[%s2469_s9 + $0x3ac] sm:$0xf0]  ;;  %v1868_v34 = vor.u32 %v2137_v30, %v1867_v28  ;;  %1102 = vmatpush.bf16.msra.mxu0 %v1612_v29  ;;  %v2079_v28 = vld [vmem:[%s2469_s9 + $0xe4] sm:$0xf] }
  0x31   : > { %v1595_v35 = vld [vmem:[%s2469_s9 + $0x80] sm:$0xf]  ;;  %v2069_v36 = vld [vmem:[%s2469_s9 + $0x8c] sm:$0xf0]  ;;  %v1996_v38 = vor.u32 %v2169_v32, %v1995_v31  ;;  %1116 = vmatpush.bf16.msra.mxu1 %v1740_v33  ;;  %v1645_v29 = vld [vmem:[%s2469_s9 + $0xf0] sm:$0xf0] }
  0x32   : > { %v1723_v37 = vld [vmem:[%s2469_s9 + $0x180] sm:$0xf]  ;;  %v2101_v39 = vld [vmem:[%s2469_s9 + $0x18c] sm:$0xf0]  ;;  %v1596_v44 = vor.u32 %v2069_v36, %v1595_v35  ;;  %1130 = vmatpush.bf16.msra.mxu2 %v1868_v34  ;;  %v2111_v30 = vld [vmem:[%s2469_s9 + $0x1e4] sm:$0xf] }
  0x33   : > { %v1851_v40 = vld [vmem:[%s2469_s9 + $0x280] sm:$0xf]  ;;  %v2133_v41 = vld [vmem:[%s2469_s9 + $0x28c] sm:$0xf0]  ;;  %v1724_v45 = vor.u32 %v2101_v39, %v1723_v37  ;;  %1144 = vmatpush.bf16.msra.mxu3 %v1996_v38  ;;  %v1773_v32 = vld [vmem:[%s2469_s9 + $0x1f0] sm:$0xf0] }
  0x34   : > { %v1979_v42 = vld [vmem:[%s2469_s9 + $0x380] sm:$0xf]  ;;  %v2165_v43 = vld [vmem:[%s2469_s9 + $0x38c] sm:$0xf0]  ;;  %v1852_v46 = vor.u32 %v2133_v41, %v1851_v40  ;;  %1103 = vmatpush.bf16.msra.mxu0 %v1596_v44  ;;  %v2143_v33 = vld [vmem:[%s2469_s9 + $0x2e4] sm:$0xf]  ;;  %v1648_v40 = vor.u32 %v2079_v28, %v1645_v29 }
  0x35   : > { %v1579_v47 = vld [vmem:[%s2469_s9 + $0x60] sm:$0xf]  ;;  %v2065_v48 = vld [vmem:[%s2469_s9 + $0x6c] sm:$0xf0]  ;;  %v1980_v50 = vor.u32 %v2165_v43, %v1979_v42  ;;  %1117 = vmatpush.bf16.msra.mxu1 %v1724_v45  ;;  %v1901_v34 = vld [vmem:[%s2469_s9 + $0x2f0] sm:$0xf0]  ;;  %v1776_v43 = vor.u32 %v2111_v30, %v1773_v32 }
  0x36   : > { %v1707_v49 = vld [vmem:[%s2469_s9 + $0x160] sm:$0xf]  ;;  %v2097_v51 = vld [vmem:[%s2469_s9 + $0x16c] sm:$0xf0]  ;;  %v1580_v56 = vor.u32 %v2065_v48, %v1579_v47  ;;  %1131 = vmatpush.bf16.msra.mxu2 %v1852_v46  ;;  %v2175_v37 = vld [vmem:[%s2469_s9 + $0x3e4] sm:$0xf]  ;;  %v1904_v44 = vor.u32 %v2143_v33, %v1901_v34 }
  0x37   : > { %v1835_v52 = vld [vmem:[%s2469_s9 + $0x260] sm:$0xf]  ;;  %v2129_v53 = vld [vmem:[%s2469_s9 + $0x26c] sm:$0xf0]  ;;  %v1708_v57 = vor.u32 %v2097_v51, %v1707_v49  ;;  %1145 = vmatpush.bf16.msra.mxu3 %v1980_v50  ;;  %v2029_v38 = vld [vmem:[%s2469_s9 + $0x3f0] sm:$0xf0] }
  0x38   : > { %v1963_v54 = vld [vmem:[%s2469_s9 + $0x360] sm:$0xf]  ;;  %v2161_v55 = vld [vmem:[%s2469_s9 + $0x36c] sm:$0xf0]  ;;  %v1836_v58 = vor.u32 %v2129_v53, %v1835_v52  ;;  %1104 = vmatpush.bf16.msra.mxu0 %v1580_v56  ;;  %v2075_v41 = vld [vmem:[%s2469_s9 + $0xc4] sm:$0xf]  ;;  %v2032_v48 = vor.u32 %v2175_v37, %v2029_v38 }
  0x39   : > { %v1563_v59 = vld [vmem:[%s2469_s9 + $0x40] sm:$0xf]  ;;  %v2061_v60 = vld [vmem:[%s2469_s9 + $0x4c] sm:$0xf0]  ;;  %v1964_v62 = vor.u32 %v2161_v55, %v1963_v54  ;;  %1118 = vmatpush.bf16.msra.mxu1 %v1708_v57  ;;  %v1629_v42 = vld [vmem:[%s2469_s9 + $0xd0] sm:$0xf0] }
  0x3a   : > { %v1691_v61 = vld [vmem:[%s2469_s9 + $0x140] sm:$0xf]  ;;  %v2093_v63 = vld [vmem:[%s2469_s9 + $0x14c] sm:$0xf0]  ;;  %v1564_v4 = vor.u32 %v2061_v60, %v1563_v59  ;;  %1132 = vmatpush.bf16.msra.mxu2 %v1836_v58  ;;  %v2107_v45 = vld [vmem:[%s2469_s9 + $0x1c4] sm:$0xf]  ;;  %v1632_v55 = vor.u32 %v2075_v41, %v1629_v42 }
  0x3b   : > { %v1819_v0 = vld [vmem:[%s2469_s9 + $0x240] sm:$0xf]  ;;  %v2125_v1 = vld [vmem:[%s2469_s9 + $0x24c] sm:$0xf0]  ;;  %v1692_v5 = vor.u32 %v2093_v63, %v1691_v61  ;;  %1146 = vmatpush.bf16.msra.mxu3 %v1964_v62  ;;  %v1757_v46 = vld [vmem:[%s2469_s9 + $0x1d0] sm:$0xf0] }
  0x3c   : > { %v1947_v2 = vld [vmem:[%s2469_s9 + $0x340] sm:$0xf]  ;;  %v2157_v3 = vld [vmem:[%s2469_s9 + $0x34c] sm:$0xf0]  ;;  %v1820_v6 = vor.u32 %v2125_v1, %v1819_v0  ;;  %1105 = vmatpush.bf16.msra.mxu0 %v1564_v4  ;;  %v2139_v47 = vld [vmem:[%s2469_s9 + $0x2c4] sm:$0xf]  ;;  %v1760_v60 = vor.u32 %v2107_v45, %v1757_v46 }
  0x3d   : > { %v1547_v7 = vld [vmem:[%s2469_s9 + $0x20] sm:$0xf]  ;;  %v2057_v8 = vld [vmem:[%s2469_s9 + $0x2c] sm:$0xf0]  ;;  %v1948_v10 = vor.u32 %v2157_v3, %v1947_v2  ;;  %1119 = vmatpush.bf16.msra.mxu1 %v1692_v5  ;;  %v1885_v49 = vld [vmem:[%s2469_s9 + $0x2d0] sm:$0xf0] }
  0x3e   : > { %v1675_v9 = vld [vmem:[%s2469_s9 + $0x120] sm:$0xf]  ;;  %v2089_v11 = vld [vmem:[%s2469_s9 + $0x12c] sm:$0xf0]  ;;  %v1548_v16 = vor.u32 %v2057_v8, %v1547_v7  ;;  %1133 = vmatpush.bf16.msra.mxu2 %v1820_v6  ;;  %v2171_v50 = vld [vmem:[%s2469_s9 + $0x3c4] sm:$0xf]  ;;  %v1888_v61 = vor.u32 %v2139_v47, %v1885_v49 }
  0x3f   : > { %v1803_v12 = vld [vmem:[%s2469_s9 + $0x220] sm:$0xf]  ;;  %v2121_v13 = vld [vmem:[%s2469_s9 + $0x22c] sm:$0xf0]  ;;  %v1676_v19 = vor.u32 %v2089_v11, %v1675_v9  ;;  %1147 = vmatpush.bf16.msra.mxu3 %v1948_v10  ;;  %v2013_v51 = vld [vmem:[%s2469_s9 + $0x3d0] sm:$0xf0] }
  0x40   : > { %v1931_v14 = vld [vmem:[%s2469_s9 + $0x320] sm:$0xf]  ;;  %v2153_v15 = vld [vmem:[%s2469_s9 + $0x32c] sm:$0xf0]  ;;  %v1804_v20 = vor.u32 %v2121_v13, %v1803_v12  ;;  %1106 = vmatpush.bf16.msra.mxu0 %v1548_v16  ;;  %v2071_v52 = vld [vmem:[%s2469_s9 + $0xa4] sm:$0xf]  ;;  %v2016_v1 = vor.u32 %v2171_v50, %v2013_v51 }
  0x41   : > { %v1531_v17 = vld [vmem:[%s2469_s9] sm:$0xf]  ;;  %v2053_v18 = vld [vmem:[%s2469_s9 + $0xc] sm:$0xf0]  ;;  %v1932_v24 = vor.u32 %v2153_v15, %v1931_v14  ;;  %1120 = vmatpush.bf16.msra.mxu1 %v1676_v19  ;;  %v1523_v53 = vld [vmem:[%s2829_s0 + $0x8] sm:$0xf] }
  0x42   : > { %v1659_v21 = vld [vmem:[%s2469_s9 + $0x100] sm:$0xf]  ;;  %v2085_v22 = vld [vmem:[%s2469_s9 + $0x10c] sm:$0xf0]  ;;  %v1532_v31 = vor.u32 %v2053_v18, %v1531_v17  ;;  %1134 = vmatpush.bf16.msra.mxu2 %v1804_v20  ;;  %v2050_v54 = vld [vmem:[%s2829_s0 + $0x14] sm:$0xf0] }
  0x43   : > { %v1787_v23 = vld [vmem:[%s2469_s9 + $0x200] sm:$0xf]  ;;  %v2117_v25 = vld [vmem:[%s2469_s9 + $0x20c] sm:$0xf0]  ;;  %v1660_v35 = vor.u32 %v2085_v22, %v1659_v21  ;;  %1148 = vmatpush.bf16.msra.mxu3 %v1932_v24  ;;  %v1613_v56 = vld [vmem:[%s2469_s9 + $0xb0] sm:$0xf0]  ;;  %v2573_v59 = vor.u32 %v2050_v54, %v1523_v53 }
  0x44   : > { %v1915_v26 = vld [vmem:[%s2469_s9 + $0x300] sm:$0xf]  ;;  %v2149_v27 = vld [vmem:[%s2469_s9 + $0x30c] sm:$0xf0]  ;;  %v1788_v36 = vor.u32 %v2117_v25, %v1787_v23  ;;  %1107 = vmatpush.bf16.msra.mxu0 %v1532_v31  ;;  %v2103_v57 = vld [vmem:[%s2469_s9 + $0x1a4] sm:$0xf]  ;;  %v1616_v9 = vor.u32 %v2071_v52, %v1613_v56 }
  0x45   : > { %v1916_v39 = vor.u32 %v2149_v27, %v1915_v26  ;;  %1121 = vmatpush.bf16.msra.mxu1 %v1660_v35  ;;  %v1741_v58 = vld [vmem:[%s2469_s9 + $0x1b0] sm:$0xf0]  ;;  %v2135_v62 = vld [vmem:[%s2469_s9 + $0x2a4] sm:$0xf]  ;;  %v1515_v3 = vld [vmem:[%s2829_s0] sm:$0xf] }
  0x46   : > { %1135 = vmatpush.bf16.msra.mxu2 %v1788_v36  ;;  %v1869_v63 = vld [vmem:[%s2469_s9 + $0x2b0] sm:$0xf0]  ;;  %v2167_v0 = vld [vmem:[%s2469_s9 + $0x3a4] sm:$0xf]  ;;  %v2049_v4 = vld [vmem:[%s2829_s0 + $0xc] sm:$0xf0]  ;;  %v1744_v12 = vor.u32 %v2103_v57, %v1741_v58 }
  0x47   : > { %1149 = vmatpush.bf16.msra.mxu3 %v1916_v39  ;;  %v1997_v2 = vld [vmem:[%s2469_s9 + $0x3b0] sm:$0xf0]  ;;  %v2586_v5 = vor.u32 %v2049_v4, %v1515_v3  ;;  %v2048_v6 = vld [vmem:[%s2829_s0 + $0xc] sm:$0xf]  ;;  %v1525_v7 = vld [vmem:[%s2829_s0 + $0x18] sm:$0xf0]  ;;  %v1872_v13 = vor.u32 %v2135_v62, %v1869_v63 }
  0x48   : > { %1156 = vmatpush.bf16.msrb.mxu0 %v1648_v40  ;;  %v2047_v8 = vld [vmem:[%s2829_s0 + $0x4] sm:$0xf]  ;;  %v2597_v10 = vor.u32 %v2048_v6, %v1525_v7  ;;  %v1517_v11 = vld [vmem:[%s2829_s0 + $0x10] sm:$0xf0]  ;;  %v2000_v18 = vor.u32 %v2167_v0, %v1997_v2 }
  0x49   : > { %1170 = vmatpush.bf16.msrb.mxu1 %v1776_v43  ;;  %1136 = vmatmul.bf16.vlgmr.msra.gmra.mxu2 %v2573_v59  ;;  %v2067_v14 = vld [vmem:[%s2469_s9 + $0x84] sm:$0xf]  ;;  %v1597_v15 = vld [vmem:[%s2469_s9 + $0x90] sm:$0xf0]  ;;  %v2605_v17 = vor.u32 %v2047_v8, %v1517_v11  ;;  %v1651_v11 = vld [vmem:[%s2469_s9 + $0xe8] sm:$0xf] }
  0x4a   : > { %1184 = vmatpush.bf16.msrb.mxu2 %v1904_v44  ;;  %v2099_v16 = vld [vmem:[%s2469_s9 + $0x184] sm:$0xf]  ;;  %v1725_v19 = vld [vmem:[%s2469_s9 + $0x190] sm:$0xf0]  ;;  %1108 = vmatmul.bf16.vlgmr.msra.gmra.mxu0 %v2586_v5  ;;  %v1600_v24 = vor.u32 %v2067_v14, %v1597_v15  ;;  %v2114_v15 = vld [vmem:[%s2469_s9 + $0x1f4] sm:$0xf0] }
  0x4b   : > { %1198 = vmatpush.bf16.msrb.mxu3 %v2032_v48  ;;  %v2131_v20 = vld [vmem:[%s2469_s9 + $0x284] sm:$0xf]  ;;  %v1853_v21 = vld [vmem:[%s2469_s9 + $0x290] sm:$0xf0]  ;;  %1122 = vmatmul.bf16.vlgmr.msra.gmra.mxu1 %v2605_v17  ;;  %v1728_v25 = vor.u32 %v2099_v16, %v1725_v19  ;;  %v1907_v16 = vld [vmem:[%s2469_s9 + $0x2e8] sm:$0xf] }
  0x4c   : > { %1157 = vmatpush.bf16.msrb.mxu0 %v1632_v55  ;;  %v2163_v22 = vld [vmem:[%s2469_s9 + $0x384] sm:$0xf]  ;;  %v1981_v23 = vld [vmem:[%s2469_s9 + $0x390] sm:$0xf0]  ;;  %1150 = vmatmul.bf16.vlgmr.msra.gmra.mxu3 %v2597_v10  ;;  %v1856_v26 = vor.u32 %v2131_v20, %v1853_v21  ;;  %v2035_v21 = vld [vmem:[%s2469_s9 + $0x3e8] sm:$0xf] }
  0x4d   : > { %1171 = vmatpush.bf16.msrb.mxu1 %v1760_v60  ;;  %v2063_v27 = vld [vmem:[%s2469_s9 + $0x64] sm:$0xf]  ;;  %v1581_v28 = vld [vmem:[%s2469_s9 + $0x70] sm:$0xf0]  ;;  %v1984_v30 = vor.u32 %v2163_v22, %v1981_v23  ;;  %v2178_v22 = vld [vmem:[%s2469_s9 + $0x3f4] sm:$0xf0] }
  0x4e   : > { %1185 = vmatpush.bf16.msrb.mxu2 %v1888_v61  ;;  %v2095_v29 = vld [vmem:[%s2469_s9 + $0x164] sm:$0xf]  ;;  %v1709_v31 = vld [vmem:[%s2469_s9 + $0x170] sm:$0xf0]  ;;  %v1584_v36 = vor.u32 %v2063_v27, %v1581_v28  ;;  %v1635_v27 = vld [vmem:[%s2469_s9 + $0xc8] sm:$0xf] }
  0x4f   : > { %1199 = vmatpush.bf16.msrb.mxu3 %v2016_v1  ;;  %v2127_v32 = vld [vmem:[%s2469_s9 + $0x264] sm:$0xf]  ;;  %v1837_v33 = vld [vmem:[%s2469_s9 + $0x270] sm:$0xf0]  ;;  %v1712_v37 = vor.u32 %v2095_v29, %v1709_v31  ;;  %v2078_v28 = vld [vmem:[%s2469_s9 + $0xd4] sm:$0xf0] }
  0x50   : > { %1158 = vmatpush.bf16.msrb.mxu0 %v1616_v9  ;;  %v2159_v34 = vld [vmem:[%s2469_s9 + $0x364] sm:$0xf]  ;;  %v1965_v35 = vld [vmem:[%s2469_s9 + $0x370] sm:$0xf0]  ;;  %v1840_v38 = vor.u32 %v2127_v32, %v1837_v33  ;;  %v1763_v29 = vld [vmem:[%s2469_s9 + $0x1c8] sm:$0xf] }
  0x51   : > { %1172 = vmatpush.bf16.msrb.mxu1 %v1744_v12  ;;  %v2059_v39 = vld [vmem:[%s2469_s9 + $0x44] sm:$0xf]  ;;  %v1565_v40 = vld [vmem:[%s2469_s9 + $0x50] sm:$0xf0]  ;;  %v1968_v42 = vor.u32 %v2159_v34, %v1965_v35  ;;  %v2082_v12 = vld [vmem:[%s2469_s9 + $0xf4] sm:$0xf0] }
  0x52   : > { %1186 = vmatpush.bf16.msrb.mxu2 %v1872_v13  ;;  %v2091_v41 = vld [vmem:[%s2469_s9 + $0x144] sm:$0xf]  ;;  %v1693_v43 = vld [vmem:[%s2469_s9 + $0x150] sm:$0xf0]  ;;  %v1568_v48 = vor.u32 %v2059_v39, %v1565_v40  ;;  %v1779_v13 = vld [vmem:[%s2469_s9 + $0x1e8] sm:$0xf] }
  0x53   : > { %1200 = vmatpush.bf16.msrb.mxu3 %v2000_v18  ;;  %v2123_v44 = vld [vmem:[%s2469_s9 + $0x244] sm:$0xf]  ;;  %v1821_v45 = vld [vmem:[%s2469_s9 + $0x250] sm:$0xf0]  ;;  %v1696_v49 = vor.u32 %v2091_v41, %v1693_v43  ;;  %v2146_v18 = vld [vmem:[%s2469_s9 + $0x2f4] sm:$0xf0] }
  0x54   : > { %1159 = vmatpush.bf16.msrb.mxu0 %v1600_v24  ;;  %v2155_v46 = vld [vmem:[%s2469_s9 + $0x344] sm:$0xf]  ;;  %v1949_v47 = vld [vmem:[%s2469_s9 + $0x350] sm:$0xf0]  ;;  %v1824_v50 = vor.u32 %v2123_v44, %v1821_v45  ;;  %v1652_v24 = vor.u32 %v2082_v12, %v1651_v11  ;;  %v2110_v31 = vld [vmem:[%s2469_s9 + $0x1d4] sm:$0xf0] }
  0x55   : > { %1173 = vmatpush.bf16.msrb.mxu1 %v1728_v25  ;;  %v2055_v51 = vld [vmem:[%s2469_s9 + $0x24] sm:$0xf]  ;;  %v1549_v52 = vld [vmem:[%s2469_s9 + $0x30] sm:$0xf0]  ;;  %v1952_v54 = vor.u32 %v2155_v46, %v1949_v47  ;;  %v1780_v25 = vor.u32 %v2114_v15, %v1779_v13  ;;  %v1891_v32 = vld [vmem:[%s2469_s9 + $0x2c8] sm:$0xf] }
  0x56   : > { %1187 = vmatpush.bf16.msrb.mxu2 %v1856_v26  ;;  %v2087_v53 = vld [vmem:[%s2469_s9 + $0x124] sm:$0xf]  ;;  %v1677_v55 = vld [vmem:[%s2469_s9 + $0x130] sm:$0xf0]  ;;  %v1552_v61 = vor.u32 %v2055_v51, %v1549_v52  ;;  %v1908_v26 = vor.u32 %v2146_v18, %v1907_v16  ;;  %v2142_v33 = vld [vmem:[%s2469_s9 + $0x2d4] sm:$0xf0] }
  0x57   : > { %1201 = vmatpush.bf16.msrb.mxu3 %v1984_v30  ;;  %v2119_v56 = vld [vmem:[%s2469_s9 + $0x224] sm:$0xf]  ;;  %v1805_v57 = vld [vmem:[%s2469_s9 + $0x230] sm:$0xf0]  ;;  %v1680_v0 = vor.u32 %v2087_v53, %v1677_v55  ;;  %v2036_v30 = vor.u32 %v2178_v22, %v2035_v21  ;;  %v2019_v34 = vld [vmem:[%s2469_s9 + $0x3c8] sm:$0xf] }
  0x58   : > { %1160 = vmatpush.bf16.msrb.mxu0 %v1584_v36  ;;  %v2151_v58 = vld [vmem:[%s2469_s9 + $0x324] sm:$0xf]  ;;  %v1933_v60 = vld [vmem:[%s2469_s9 + $0x330] sm:$0xf0]  ;;  %v1808_v1 = vor.u32 %v2119_v56, %v1805_v57  ;;  %v2174_v35 = vld [vmem:[%s2469_s9 + $0x3d4] sm:$0xf0]  ;;  %v1636_v36 = vor.u32 %v2078_v28, %v1635_v27 }
  0x59   : > { %1174 = vmatpush.bf16.msrb.mxu1 %v1712_v37  ;;  %v2051_v62 = vld [vmem:[%s2469_s9 + $0x4] sm:$0xf]  ;;  %v1533_v63 = vld [vmem:[%s2469_s9 + $0x10] sm:$0xf0]  ;;  %v1936_v6 = vor.u32 %v2151_v58, %v1933_v60  ;;  %v1764_v37 = vor.u32 %v2110_v31, %v1763_v29  ;;  %v1619_v39 = vld [vmem:[%s2469_s9 + $0xa8] sm:$0xf] }
  0x5a   : > { %1188 = vmatpush.bf16.msrb.mxu2 %v1840_v38  ;;  %v2083_v2 = vld [vmem:[%s2469_s9 + $0x104] sm:$0xf]  ;;  %v1661_v3 = vld [vmem:[%s2469_s9 + $0x110] sm:$0xf0]  ;;  %v1536_v14 = vor.u32 %v2051_v62, %v1533_v63  ;;  %v1892_v38 = vor.u32 %v2142_v33, %v1891_v32  ;;  %v2074_v40 = vld [vmem:[%s2469_s9 + $0xb4] sm:$0xf0] }
  0x5b   : > { %1202 = vmatpush.bf16.msrb.mxu3 %v1968_v42  ;;  %v2115_v4 = vld [vmem:[%s2469_s9 + $0x204] sm:$0xf]  ;;  %v1789_v7 = vld [vmem:[%s2469_s9 + $0x210] sm:$0xf0]  ;;  %v1664_v19 = vor.u32 %v2083_v2, %v1661_v3  ;;  %v1747_v41 = vld [vmem:[%s2469_s9 + $0x1a8] sm:$0xf]  ;;  %v2020_v42 = vor.u32 %v2174_v35, %v2019_v34 }
  0x5c   : > { %1161 = vmatpush.bf16.msrb.mxu0 %v1568_v48  ;;  %v2147_v8 = vld [vmem:[%s2469_s9 + $0x304] sm:$0xf]  ;;  %v1917_v9 = vld [vmem:[%s2469_s9 + $0x310] sm:$0xf0]  ;;  %v1792_v20 = vor.u32 %v2115_v4, %v1789_v7  ;;  %v2106_v43 = vld [vmem:[%s2469_s9 + $0x1b4] sm:$0xf0]  ;;  %v1620_v48 = vor.u32 %v2074_v40, %v1619_v39 }
  0x5d   : > { %1175 = vmatpush.bf16.msrb.mxu1 %v1696_v49  ;;  %v1920_v23 = vor.u32 %v2147_v8, %v1917_v9  ;;  %v1875_v44 = vld [vmem:[%s2469_s9 + $0x2a8] sm:$0xf]  ;;  %v2138_v45 = vld [vmem:[%s2469_s9 + $0x2b4] sm:$0xf0]  ;;  %v1748_v49 = vor.u32 %v2106_v43, %v1747_v41 }
  0x5e   : > { %1189 = vmatpush.bf16.msrb.mxu2 %v1824_v50  ;;  %v2003_v46 = vld [vmem:[%s2469_s9 + $0x3a8] sm:$0xf]  ;;  %v2170_v47 = vld [vmem:[%s2469_s9 + $0x3b4] sm:$0xf0]  ;;  %v1876_v50 = vor.u32 %v2138_v45, %v1875_v44 }
  0x5f   : > { %1203 = vmatpush.bf16.msrb.mxu3 %v1952_v54  ;;  %v1603_v51 = vld [vmem:[%s2469_s9 + $0x88] sm:$0xf]  ;;  %v2070_v52 = vld [vmem:[%s2469_s9 + $0x94] sm:$0xf0]  ;;  %v2004_v54 = vor.u32 %v2170_v47, %v2003_v46 }
  0x60   : > { %1162 = vmatpush.bf16.msrb.mxu0 %v1552_v61  ;;  %v1731_v53 = vld [vmem:[%s2469_s9 + $0x188] sm:$0xf]  ;;  %v2102_v55 = vld [vmem:[%s2469_s9 + $0x194] sm:$0xf0]  ;;  %v1604_v61 = vor.u32 %v2070_v52, %v1603_v51  ;;  %v1781_v52 = vld [vmem:[%s2469_s9 + $0x1f8] sm:$0xf0] }
  0x61   : > { %1176 = vmatpush.bf16.msrb.mxu1 %v1680_v0  ;;  %v1859_v56 = vld [vmem:[%s2469_s9 + $0x288] sm:$0xf]  ;;  %v2134_v57 = vld [vmem:[%s2469_s9 + $0x294] sm:$0xf0]  ;;  %v1732_v62 = vor.u32 %v2102_v55, %v1731_v53  ;;  %v2144_v53 = vld [vmem:[%s2469_s9 + $0x2ec] sm:$0xf] }
  0x62   : > { %1190 = vmatpush.bf16.msrb.mxu2 %v1808_v1  ;;  %v1987_v58 = vld [vmem:[%s2469_s9 + $0x388] sm:$0xf]  ;;  %v2166_v60 = vld [vmem:[%s2469_s9 + $0x394] sm:$0xf0]  ;;  %v1860_v63 = vor.u32 %v2134_v57, %v1859_v56  ;;  %v2176_v57 = vld [vmem:[%s2469_s9 + $0x3ec] sm:$0xf] }
  0x63   : > { %1204 = vmatpush.bf16.msrb.mxu3 %v1936_v6  ;;  %v1587_v0 = vld [vmem:[%s2469_s9 + $0x68] sm:$0xf]  ;;  %v2066_v1 = vld [vmem:[%s2469_s9 + $0x74] sm:$0xf0]  ;;  %v1988_v3 = vor.u32 %v2166_v60, %v1987_v58  ;;  %v2037_v58 = vld [vmem:[%s2469_s9 + $0x3f8] sm:$0xf0] }
  0x64   : > { %1163 = vmatpush.bf16.msrb.mxu0 %v1536_v14  ;;  %v1715_v2 = vld [vmem:[%s2469_s9 + $0x168] sm:$0xf]  ;;  %v2098_v4 = vld [vmem:[%s2469_s9 + $0x174] sm:$0xf0]  ;;  %v1588_v11 = vor.u32 %v2066_v1, %v1587_v0  ;;  %v2076_v0 = vld [vmem:[%s2469_s9 + $0xcc] sm:$0xf] }
  0x65   : > { %1177 = vmatpush.bf16.msrb.mxu1 %v1664_v19  ;;  %v1843_v6 = vld [vmem:[%s2469_s9 + $0x268] sm:$0xf]  ;;  %v2130_v7 = vld [vmem:[%s2469_s9 + $0x274] sm:$0xf0]  ;;  %v1716_v12 = vor.u32 %v2098_v4, %v1715_v2  ;;  %v1637_v1 = vld [vmem:[%s2469_s9 + $0xd8] sm:$0xf0] }
  0x66   : > { %1191 = vmatpush.bf16.msrb.mxu2 %v1792_v20  ;;  %v1971_v8 = vld [vmem:[%s2469_s9 + $0x368] sm:$0xf]  ;;  %v2162_v9 = vld [vmem:[%s2469_s9 + $0x374] sm:$0xf0]  ;;  %v1844_v13 = vor.u32 %v2130_v7, %v1843_v6  ;;  %v2108_v2 = vld [vmem:[%s2469_s9 + $0x1cc] sm:$0xf] }
  0x67   : > { %1205 = vmatpush.bf16.msrb.mxu3 %v1920_v23  ;;  %1164 = vmatmul.bf16.vlgmr.msrb.gmra.mxu0 %v2586_v5  ;;  %v1571_v14 = vld [vmem:[%s2469_s9 + $0x48] sm:$0xf]  ;;  %v2062_v15 = vld [vmem:[%s2469_s9 + $0x54] sm:$0xf0]  ;;  %v1972_v18 = vor.u32 %v2162_v9, %v1971_v8  ;;  %v1765_v4 = vld [vmem:[%s2469_s9 + $0x1d8] sm:$0xf0] }
  0x68   : > { %1212 = vmatpush.bf16.msra.mxu0 %v1652_v24  ;;  %1178 = vmatmul.bf16.vlgmr.msrb.gmra.mxu1 %v2605_v17  ;;  %v1699_v16 = vld [vmem:[%s2469_s9 + $0x148] sm:$0xf]  ;;  %v2094_v19 = vld [vmem:[%s2469_s9 + $0x154] sm:$0xf0]  ;;  %v1572_v24 = vor.u32 %v2062_v15, %v1571_v14  ;;  %v2140_v6 = vld [vmem:[%s2469_s9 + $0x2cc] sm:$0xf] }
  0x69   : > { %1226 = vmatpush.bf16.msra.mxu1 %v1780_v25  ;;  %1192 = vmatmul.bf16.vlgmr.msrb.gmra.mxu2 %v2573_v59  ;;  %v1827_v20 = vld [vmem:[%s2469_s9 + $0x248] sm:$0xf]  ;;  %v2126_v21 = vld [vmem:[%s2469_s9 + $0x254] sm:$0xf0]  ;;  %v1700_v25 = vor.u32 %v2094_v19, %v1699_v16  ;;  %v1893_v7 = vld [vmem:[%s2469_s9 + $0x2d8] sm:$0xf0] }
  0x6a   : > { %1240 = vmatpush.bf16.msra.mxu2 %v1908_v26  ;;  %1206 = vmatmul.bf16.vlgmr.msrb.gmra.mxu3 %v2597_v10  ;;  %v1955_v22 = vld [vmem:[%s2469_s9 + $0x348] sm:$0xf]  ;;  %v2158_v23 = vld [vmem:[%s2469_s9 + $0x354] sm:$0xf0]  ;;  %v1828_v26 = vor.u32 %v2126_v21, %v1827_v20  ;;  %v2172_v8 = vld [vmem:[%s2469_s9 + $0x3cc] sm:$0xf] }
  0x6b   : > { %1254 = vmatpush.bf16.msra.mxu3 %v2036_v30  ;;  %v1555_v27 = vld [vmem:[%s2469_s9 + $0x28] sm:$0xf]  ;;  %v2058_v28 = vld [vmem:[%s2469_s9 + $0x34] sm:$0xf0]  ;;  %v1956_v30 = vor.u32 %v2158_v23, %v1955_v22  ;;  %v2021_v9 = vld [vmem:[%s2469_s9 + $0x3d8] sm:$0xf0] }
  0x6c   : > { %1213 = vmatpush.bf16.msra.mxu0 %v1636_v36  ;;  %v1683_v29 = vld [vmem:[%s2469_s9 + $0x128] sm:$0xf]  ;;  %v2090_v31 = vld [vmem:[%s2469_s9 + $0x134] sm:$0xf0]  ;;  %v1556_v36 = vor.u32 %v2058_v28, %v1555_v27  ;;  %v2072_v14 = vld [vmem:[%s2469_s9 + $0xac] sm:$0xf] }
  0x6d   : > { %1227 = vmatpush.bf16.msra.mxu1 %v1764_v37  ;;  %v1811_v32 = vld [vmem:[%s2469_s9 + $0x228] sm:$0xf]  ;;  %v2122_v33 = vld [vmem:[%s2469_s9 + $0x234] sm:$0xf0]  ;;  %v1684_v39 = vor.u32 %v2090_v31, %v1683_v29  ;;  %v1621_v15 = vld [vmem:[%s2469_s9 + $0xb8] sm:$0xf0] }
  0x6e   : > { %1241 = vmatpush.bf16.msra.mxu2 %v1892_v38  ;;  %v1939_v34 = vld [vmem:[%s2469_s9 + $0x328] sm:$0xf]  ;;  %v2154_v35 = vld [vmem:[%s2469_s9 + $0x334] sm:$0xf0]  ;;  %v1812_v40 = vor.u32 %v2122_v33, %v1811_v32  ;;  %v2104_v16 = vld [vmem:[%s2469_s9 + $0x1ac] sm:$0xf] }
  0x6f   : > { %1255 = vmatpush.bf16.msra.mxu3 %v2020_v42  ;;  %v1539_v37 = vld [vmem:[%s2469_s9 + $0x8] sm:$0xf]  ;;  %v2054_v38 = vld [vmem:[%s2469_s9 + $0x14] sm:$0xf0]  ;;  %v1940_v44 = vor.u32 %v2154_v35, %v1939_v34  ;;  %v1749_v19 = vld [vmem:[%s2469_s9 + $0x1b8] sm:$0xf0] }
  0x70   : > { %1214 = vmatpush.bf16.msra.mxu0 %v1620_v48  ;;  %v1667_v41 = vld [vmem:[%s2469_s9 + $0x108] sm:$0xf]  ;;  %v2086_v42 = vld [vmem:[%s2469_s9 + $0x114] sm:$0xf0]  ;;  %v2080_v48 = vld [vmem:[%s2469_s9 + $0xec] sm:$0xf]  ;;  %v1540_v51 = vor.u32 %v2054_v38, %v1539_v37 }
  0x71   : > { %1228 = vmatpush.bf16.msra.mxu1 %v1748_v49  ;;  %v1795_v43 = vld [vmem:[%s2469_s9 + $0x208] sm:$0xf]  ;;  %v2118_v45 = vld [vmem:[%s2469_s9 + $0x214] sm:$0xf0]  ;;  %v1653_v49 = vld [vmem:[%s2469_s9 + $0xf8] sm:$0xf0]  ;;  %v1668_v55 = vor.u32 %v2086_v42, %v1667_v41 }
  0x72   : > { %1242 = vmatpush.bf16.msra.mxu2 %v1876_v50  ;;  %v1923_v46 = vld [vmem:[%s2469_s9 + $0x308] sm:$0xf]  ;;  %v2150_v47 = vld [vmem:[%s2469_s9 + $0x314] sm:$0xf0]  ;;  %v2112_v50 = vld [vmem:[%s2469_s9 + $0x1ec] sm:$0xf]  ;;  %v1796_v56 = vor.u32 %v2118_v45, %v1795_v43 }
  0x73   : > { %1256 = vmatpush.bf16.msra.mxu3 %v2004_v54  ;;  %v1909_v54 = vld [vmem:[%s2469_s9 + $0x2f8] sm:$0xf0]  ;;  %v1924_v60 = vor.u32 %v2150_v47, %v1923_v46  ;;  %v2136_v20 = vld [vmem:[%s2469_s9 + $0x2ac] sm:$0xf] }
  0x74   : > { %1215 = vmatpush.bf16.msra.mxu0 %v1604_v61  ;;  %v1656_v61 = vor.u32 %v2080_v48, %v1653_v49  ;;  %v1877_v21 = vld [vmem:[%s2469_s9 + $0x2b8] sm:$0xf0]  ;;  %v2168_v22 = vld [vmem:[%s2469_s9 + $0x3ac] sm:$0xf] }
  0x75   : > { %1229 = vmatpush.bf16.msra.mxu1 %v1732_v62  ;;  %v1784_v62 = vor.u32 %v2112_v50, %v1781_v52  ;;  %v2005_v23 = vld [vmem:[%s2469_s9 + $0x3b8] sm:$0xf0]  ;;  %v2068_v27 = vld [vmem:[%s2469_s9 + $0x8c] sm:$0xf] }
  0x76   : > { %1243 = vmatpush.bf16.msra.mxu2 %v1860_v63  ;;  %v1912_v63 = vor.u32 %v2144_v53, %v1909_v54  ;;  %v1605_v28 = vld [vmem:[%s2469_s9 + $0x98] sm:$0xf0]  ;;  %v2100_v29 = vld [vmem:[%s2469_s9 + $0x18c] sm:$0xf] }
  0x77   : > { %1257 = vmatpush.bf16.msra.mxu3 %v1988_v3  ;;  %v2040_v3 = vor.u32 %v2176_v57, %v2037_v58  ;;  %v1733_v31 = vld [vmem:[%s2469_s9 + $0x198] sm:$0xf0]  ;;  %v2132_v32 = vld [vmem:[%s2469_s9 + $0x28c] sm:$0xf] }
  0x78   : > { %1216 = vmatpush.bf16.msra.mxu0 %v1588_v11  ;;  %v1640_v11 = vor.u32 %v2076_v0, %v1637_v1  ;;  %v1861_v33 = vld [vmem:[%s2469_s9 + $0x298] sm:$0xf0]  ;;  %v2164_v34 = vld [vmem:[%s2469_s9 + $0x38c] sm:$0xf]  ;;  %v1736_v37 = vor.u32 %v2100_v29, %v1733_v31 }
  0x79   : > { %1230 = vmatpush.bf16.msra.mxu1 %v1716_v12  ;;  %v1768_v12 = vor.u32 %v2108_v2, %v1765_v4  ;;  %v1989_v35 = vld [vmem:[%s2469_s9 + $0x398] sm:$0xf0]  ;;  %v1864_v38 = vor.u32 %v2132_v32, %v1861_v33  ;;  %v2096_v41 = vld [vmem:[%s2469_s9 + $0x16c] sm:$0xf]  ;;  %v2788_v32 = vld [vmem:[%s2477_s10] sm:$0xf] }
  0x7a   : > { %1244 = vmatpush.bf16.msra.mxu2 %v1844_v13  ;;  %v1896_v13 = vor.u32 %v2140_v6, %v1893_v7  ;;  %v1992_v42 = vor.u32 %v2164_v34, %v1989_v35  ;;  %v1717_v43 = vld [vmem:[%s2469_s9 + $0x178] sm:$0xf0]  ;;  %v2160_v46 = vld [vmem:[%s2469_s9 + $0x36c] sm:$0xf]  ;;  %v432_v33 = vperm.slane %v2788_v32, 0 }
  0x7b   : > { %1258 = vmatpush.bf16.msra.mxu3 %v1972_v18  ;;  %v2024_v18 = vor.u32 %v2172_v8, %v2021_v9  ;;  %v1845_v45 = vld [vmem:[%s2469_s9 + $0x278] sm:$0xf0]  ;;  %v1720_v49 = vor.u32 %v2096_v41, %v1717_v43  ;;  %v2092_v53 = vld [vmem:[%s2469_s9 + $0x14c] sm:$0xf] }
  0x7c   : > { %1217 = vmatpush.bf16.msra.mxu0 %v1572_v24  ;;  %v1624_v24 = vor.u32 %v2072_v14, %v1621_v15  ;;  %v1973_v47 = vld [vmem:[%s2469_s9 + $0x378] sm:$0xf0]  ;;  %v2156_v58 = vld [vmem:[%s2469_s9 + $0x34c] sm:$0xf] }
  0x7d   : > { %1231 = vmatpush.bf16.msra.mxu1 %v1700_v25  ;;  %v1752_v25 = vor.u32 %v2104_v16, %v1749_v19  ;;  %v1573_v52 = vld [vmem:[%s2469_s9 + $0x58] sm:$0xf0]  ;;  %v1976_v54 = vor.u32 %v2160_v46, %v1973_v47  ;;  %v2056_v0 = vld [vmem:[%s2469_s9 + $0x2c] sm:$0xf] }
  0x7e   : > { %1245 = vmatpush.bf16.msra.mxu2 %v1828_v26  ;;  %v1880_v26 = vor.u32 %v2136_v20, %v1877_v21  ;;  %v1829_v57 = vld [vmem:[%s2469_s9 + $0x258] sm:$0xf0]  ;;  %v2088_v2 = vld [vmem:[%s2469_s9 + $0x12c] sm:$0xf] }
  0x7f   : > { %1259 = vmatpush.bf16.msra.mxu3 %v1956_v30  ;;  %v2008_v30 = vor.u32 %v2168_v22, %v2005_v23  ;;  %v1557_v1 = vld [vmem:[%s2469_s9 + $0x38] sm:$0xf0]  ;;  %v2120_v6 = vld [vmem:[%s2469_s9 + $0x22c] sm:$0xf] }
  0x80   : > { %1218 = vmatpush.bf16.msra.mxu0 %v1556_v36  ;;  %v1608_v36 = vor.u32 %v2068_v27, %v1605_v28  ;;  %v1685_v4 = vld [vmem:[%s2469_s9 + $0x138] sm:$0xf0]  ;;  %v2152_v8 = vld [vmem:[%s2469_s9 + $0x32c] sm:$0xf] }
  0x81   : > { %1232 = vmatpush.bf16.msra.mxu1 %v1684_v39  ;;  %v2064_v39 = vld [vmem:[%s2469_s9 + $0x6c] sm:$0xf]  ;;  %v1813_v7 = vld [vmem:[%s2469_s9 + $0x238] sm:$0xf0] }
  0x82   : > { %1246 = vmatpush.bf16.msra.mxu2 %v1812_v40  ;;  %v1589_v40 = vld [vmem:[%s2469_s9 + $0x78] sm:$0xf0]  ;;  %v2052_v14 = vld [vmem:[%s2469_s9 + $0xc] sm:$0xf] }
  0x83   : > { %1260 = vmatpush.bf16.msra.mxu3 %v1940_v44  ;;  %v2128_v44 = vld [vmem:[%s2469_s9 + $0x26c] sm:$0xf]  ;;  %v1592_v48 = vor.u32 %v2064_v39, %v1589_v40  ;;  %v1941_v9 = vld [vmem:[%s2469_s9 + $0x338] sm:$0xf0] }
  0x84   : > { %1219 = vmatpush.bf16.msra.mxu0 %v1540_v51  ;;  %v1848_v50 = vor.u32 %v2128_v44, %v1845_v45  ;;  %v2060_v51 = vld [vmem:[%s2469_s9 + $0x4c] sm:$0xf]  ;;  %v1541_v15 = vld [vmem:[%s2469_s9 + $0x18] sm:$0xf0] }
  0x85   : > { %1233 = vmatpush.bf16.msra.mxu1 %v1668_v55  ;;  %v1701_v55 = vld [vmem:[%s2469_s9 + $0x158] sm:$0xf0]  ;;  %v2084_v16 = vld [vmem:[%s2469_s9 + $0x10c] sm:$0xf] }
  0x86   : > { %1247 = vmatpush.bf16.msra.mxu2 %v1796_v56  ;;  %v2124_v56 = vld [vmem:[%s2469_s9 + $0x24c] sm:$0xf]  ;;  %v1669_v19 = vld [vmem:[%s2469_s9 + $0x118] sm:$0xf0] }
  0x87   : > { %1261 = vmatpush.bf16.msra.mxu3 %v1924_v60  ;;  %1220 = vmatmul.bf16.vlgmr.msra.gmra.mxu0 %v2586_v5  ;;  %v1957_v60 = vld [vmem:[%s2469_s9 + $0x358] sm:$0xf0]  ;;  %v2116_v20 = vld [vmem:[%s2469_s9 + $0x20c] sm:$0xf] }
  0x88   : > { %1268 = vmatpush.bf16.msrb.mxu0 %v1656_v61  ;;  %1234 = vmatmul.bf16.vlgmr.msra.gmra.mxu1 %v2605_v17  ;;  %v1576_v61 = vor.u32 %v2060_v51, %v1573_v52  ;;  %v1797_v21 = vld [vmem:[%s2469_s9 + $0x218] sm:$0xf0]  ;;  %v2148_v22 = vld [vmem:[%s2469_s9 + $0x30c] sm:$0xf] }
  0x89   : > { %1282 = vmatpush.bf16.msrb.mxu1 %v1784_v62  ;;  %1248 = vmatmul.bf16.vlgmr.msra.gmra.mxu2 %v2573_v59  ;;  %v1704_v62 = vor.u32 %v2092_v53, %v1701_v55  ;;  %v1925_v23 = vld [vmem:[%s2469_s9 + $0x318] sm:$0xf0]  ;;  %s1512_s9 = sshll.u32 %s2465_s5, 5  ;;  %s2179_s5 = sshll.u32 (%p2432_p9), %s2349_s15, 4 }
  0x8a   : > { %1296 = vmatpush.bf16.msrb.mxu2 %v1912_v63  ;;  %1262 = vmatmul.bf16.vlgmr.msra.gmra.mxu3 %v2597_v10  ;;  %v1832_v63 = vor.u32 %v2124_v56, %v1829_v57  ;;  %v1928_v27 = vor.u32 %v2148_v22, %v1925_v23  ;;  %s2793_s10 = scalar_lea.vmem [#allocation6], %s1512_s9  ;;  %s1352_s12 = scalar_lea.vmem (%p2432_p9), %s2832_s3, %s2179_s5 }
  0x8b   : > { %1310 = vmatpush.bf16.msrb.mxu3 %v2040_v3  ;;  %v1960_v3 = vor.u32 %v2156_v58, %v1957_v60 }
  0x8c   : > { %1269 = vmatpush.bf16.msrb.mxu0 %v1640_v11  ;;  %v1560_v11 = vor.u32 %v2056_v0, %v1557_v1 }
  0x8d   : > { %1283 = vmatpush.bf16.msrb.mxu1 %v1768_v12  ;;  %v1688_v12 = vor.u32 %v2088_v2, %v1685_v4 }
  0x8e   : > { %1297 = vmatpush.bf16.msrb.mxu2 %v1896_v13  ;;  %v1816_v13 = vor.u32 %v2120_v6, %v1813_v7  ;;  %v434_v7 = vperm.slane %v2788_v32, 2 }
  0x8f   : > { %1311 = vmatpush.bf16.msrb.mxu3 %v2024_v18  ;;  %v1944_v18 = vor.u32 %v2152_v8, %v1941_v9 }
  0x90   : > { %1270 = vmatpush.bf16.msrb.mxu0 %v1624_v24  ;;  %v1544_v24 = vor.u32 %v2052_v14, %v1541_v15 }
  0x91   : > { %1284 = vmatpush.bf16.msrb.mxu1 %v1752_v25  ;;  %v1672_v25 = vor.u32 %v2084_v16, %v1669_v19 }
  0x92   : > { %1298 = vmatpush.bf16.msrb.mxu2 %v1880_v26  ;;  %v1800_v26 = vor.u32 %v2116_v20, %v1797_v21 }
  0x93   : > { %1312 = vmatpush.bf16.msrb.mxu3 %v2008_v30 }
  0x94   : > { %1271 = vmatpush.bf16.msrb.mxu0 %v1608_v36 }
  0x95   : > { %1285 = vmatpush.bf16.msrb.mxu1 %v1736_v37 }
  0x96   : > { %1299 = vmatpush.bf16.msrb.mxu2 %v1864_v38 }
  0x97   : > { %1313 = vmatpush.bf16.msrb.mxu3 %v1992_v42 }
  0x98   : > { %1272 = vmatpush.bf16.msrb.mxu0 %v1592_v48 }
  0x99   : > { %1286 = vmatpush.bf16.msrb.mxu1 %v1720_v49 }
  0x9a   : > { %1300 = vmatpush.bf16.msrb.mxu2 %v1848_v50 }
  0x9b   : > { %1314 = vmatpush.bf16.msrb.mxu3 %v1976_v54 }
  0x9c   : > { %1273 = vmatpush.bf16.msrb.mxu0 %v1576_v61 }
  0x9d   : > { %1287 = vmatpush.bf16.msrb.mxu1 %v1704_v62 }
  0x9e   : > { %1301 = vmatpush.bf16.msrb.mxu2 %v1832_v63 }
  0x9f   : > { %1315 = vmatpush.bf16.msrb.mxu3 %v1960_v3 }
  0xa0   : > { %1274 = vmatpush.bf16.msrb.mxu0 %v1560_v11 }
  0xa1   : > { %1288 = vmatpush.bf16.msrb.mxu1 %v1688_v12  ;;  %v435_v12 = vperm.slane %v2788_v32, 3 }
  0xa2   : > { %1302 = vmatpush.bf16.msrb.mxu2 %v1816_v13 }
  0xa3   : > { %1316 = vmatpush.bf16.msrb.mxu3 %v1944_v18 }
  0xa4   : > { %1275 = vmatpush.bf16.msrb.mxu0 %v1544_v24 }
  0xa5   : > { %1289 = vmatpush.bf16.msrb.mxu1 %v1672_v25 }
  0xa6   : > { %1303 = vmatpush.bf16.msrb.mxu2 %v1800_v26 }
  0xa7   : > { %1317 = vmatpush.bf16.msrb.mxu3 %v1928_v27  ;;  %1276 = vmatmul.bf16.vlgmr.msrb.gmra.mxu0 %v2586_v5 }
  0xa8   : > { %1290 = vmatmul.bf16.vlgmr.msrb.gmra.mxu1 %v2605_v17  ;;  %v433_v17 = vperm.slane %v2788_v32, 1 }
  0xa9   : > { %1304 = vmatmul.bf16.vlgmr.msrb.gmra.mxu2 %v2573_v59 }
  0xaa   : > { %1318 = vmatmul.bf16.vlgmr.msrb.gmra.mxu3 %v2597_v10 }
  0xc7   : > { %v1109_v28 = vpop.f32.mrf.mxu0 }
  0xc8   : > { %v1123_v29 = vpop.f32.mrf.mxu1  ;;  %v1110_v36 = vadd.f32 %v1109_v28, %v432_v33 }
  0xca   : > { %v1124_v38 = vadd.f32 %v1123_v29, %v1110_v36 }
  0xcc   : > { %v1137_v30 = vpop.f32.mrf.mxu2 }
  0xcd   : > { %v1138_v40 = vadd.f32 %v1137_v30, %v1124_v38 }
  0xcf   : > { %v1151_v31 = vpop.f32.mrf.mxu3  ;;  %v1111_v34 = vpop.f32.mrf.mxu0 }
  0xd0   : > { %v1125_v35 = vpop.f32.mrf.mxu1  ;;  %v1112_v41 = vadd.f32 %v1111_v34, %v432_v33  ;;  %v1152_v44 = vadd.f32 %v1151_v31, %v1138_v40 }
  0xd2   : > { %v1126_v45 = vadd.f32 %v1125_v35, %v1112_v41  ;;  %v1324_v52 = vmax.f32 %v1152_v44, 0.0 }
  0xd4   : > { %v1139_v37 = vpop.f32.mrf.mxu2 }
  0xd5   : > { %v1140_v53 = vadd.f32 %v1139_v37, %v1126_v45 }
  0xd7   : > { %v1153_v5 = vpop.f32.mrf.mxu3 }
  0xd8   : > { %v1154_v58 = vadd.f32 %v1153_v5, %v1140_v53 }
  0xda   : > { %v1328_v63 = vmax.f32 %v1154_v58, 0.0 }
  0xe4   : > { %v1165_v59 = vpop.f32.mrf.mxu0 }
  0xe5   : > { %v1166_v39 = vadd.f32 %v1165_v59, %v433_v17  ;;  %v1179_v10 = vpop.f32.mrf.mxu1 }
  0xe7   : > { %v1180_v42 = vadd.f32 %v1179_v10, %v1166_v39 }
  0xec   : > { %v1193_v43 = vpop.f32.mrf.mxu2  ;;  %v1167_v49 = vpop.f32.mrf.mxu0 }
  0xed   : > { %v1194_v46 = vadd.f32 %v1193_v43, %v1180_v42  ;;  %v1207_v47 = vpop.f32.mrf.mxu3  ;;  %v1168_v50 = vadd.f32 %v1167_v49, %v433_v17  ;;  %v1181_v51 = vpop.f32.mrf.mxu1 }
  0xef   : > { %v1208_v48 = vadd.f32 %v1207_v47, %v1194_v46  ;;  %v1182_v55 = vadd.f32 %v1181_v51, %v1168_v50 }
  0xf1   : > { %v1325_v54 = vmax.f32 %v1208_v48, 0.0 }
  0xf3   : > { %v1332_v56 = vpack.c.bf16 %v1325_v54, %v1324_v52 }
  0xf4   : > { %v1195_v57 = vpop.f32.mrf.mxu2 }
  0xf5   : > { %1336 = vst [vmem:[%s2793_s10] sm:$0xff] %v1332_v56  ;;  %v1196_v60 = vadd.f32 %v1195_v57, %v1182_v55  ;;  %v1209_v61 = vpop.f32.mrf.mxu3 }
  0xf7   : > { %v1210_v62 = vadd.f32 %v1209_v61, %v1196_v60 }
  0xf9   : > { %v1329_v0 = vmax.f32 %v1210_v62, 0.0 }
  0xfb   : > { %v1334_v1 = vpack.c.bf16 %v1329_v0, %v1328_v63 }
  0xfc   : > { %v1365_v41 = vld [vmem:[%s2793_s10] sm:$0xff] (%p2432_p9) }
  0xfd   : > { %1338 = vst [vmem:[%s2793_s10 + $0x10] sm:$0xff] %v1334_v1 }
  0xfe   : > { %1366 = vst [vmem:[%s1352_s12] sm:$0xff] (%p2432_p9), %v1365_v41 }
 0x104   : > { %v1221_v2 = vpop.f32.mrf.mxu0  ;;  %v1369_v43 = vld [vmem:[%s2793_s10 + $0x10] sm:$0xff] (%p2432_p9) }
 0x105   : > { %v1235_v3 = vpop.f32.mrf.mxu1  ;;  %v1222_v11 = vadd.f32 %v1221_v2, %v434_v7  ;;  %1370 = vst [vmem:[%s1352_s12 + $0x20] sm:$0xff] (%p2432_p9), %v1369_v43 }
 0x107   : > { %v1236_v14 = vadd.f32 %v1235_v3, %v1222_v11 }
 0x10c   : > { %v1249_v4 = vpop.f32.mrf.mxu2  ;;  %v1223_v8 = vpop.f32.mrf.mxu0 }
 0x10d   : > { %v1263_v6 = vpop.f32.mrf.mxu3  ;;  %v1237_v9 = vpop.f32.mrf.mxu1  ;;  %v1250_v20 = vadd.f32 %v1249_v4, %v1236_v14  ;;  %v1224_v21 = vadd.f32 %v1223_v8, %v434_v7 }
 0x10f   : > { %v1264_v24 = vadd.f32 %v1263_v6, %v1250_v20  ;;  %v1238_v25 = vadd.f32 %v1237_v9, %v1224_v21 }
 0x111   : > { %v1326_v31 = vmax.f32 %v1264_v24, 0.0 }
 0x114   : > { %v1251_v13 = vpop.f32.mrf.mxu2 }
 0x115   : > { %v1265_v15 = vpop.f32.mrf.mxu3  ;;  %v1252_v32 = vadd.f32 %v1251_v13, %v1238_v25 }
 0x117   : > { %v1266_v5 = vadd.f32 %v1265_v15, %v1252_v32 }
 0x119   : > { %v1330_v39 = vmax.f32 %v1266_v5, 0.0 }
 0x124   : > { %v1277_v16 = vpop.f32.mrf.mxu0 }
 0x125   : > { %v1278_v18 = vadd.f32 %v1277_v16, %v435_v12  ;;  %v1291_v19 = vpop.f32.mrf.mxu1 }
 0x127   : > { %v1292_v22 = vadd.f32 %v1291_v19, %v1278_v18 }
 0x12c   : > { %v1305_v23 = vpop.f32.mrf.mxu2  ;;  %v1279_v28 = vpop.f32.mrf.mxu0 }
 0x12d   : > { %v1306_v26 = vadd.f32 %v1305_v23, %v1292_v22  ;;  %v1319_v27 = vpop.f32.mrf.mxu3  ;;  %v1280_v30 = vadd.f32 %v1279_v28, %v435_v12  ;;  %v1293_v34 = vpop.f32.mrf.mxu1 }
 0x12f   : > { %v1320_v29 = vadd.f32 %v1319_v27, %v1306_v26  ;;  %v1294_v36 = vadd.f32 %v1293_v34, %v1280_v30 }
 0x131   : > { %v1327_v33 = vmax.f32 %v1320_v29, 0.0 }
 0x133   : > { %v1333_v35 = vpack.c.bf16 %v1327_v33, %v1326_v31 }
 0x134   : > { %v1307_v37 = vpop.f32.mrf.mxu2 }
 0x135   : > { %1337 = vst [vmem:[%s2793_s10 + $0x8] sm:$0xff] %v1333_v35  ;;  %v1308_v17 = vadd.f32 %v1307_v37, %v1294_v36  ;;  %v1321_v38 = vpop.f32.mrf.mxu3 }
 0x137   : > { %v1322_v59 = vadd.f32 %v1321_v38, %v1308_v17 }
 0x139   : > { %v1331_v10 = vmax.f32 %v1322_v59, 0.0  ;;  %1346 = sbr.rel (!%p2432_p9) target bundleno = 326 (0x146), region = 44 }
 0x13b   : > { %v1335_v40 = vpack.c.bf16 %v1331_v10, %v1330_v39 }
 0x13c   : > { %v1367_v42 = vld [vmem:[%s2793_s10 + $0x8] sm:$0xff] (%p2432_p9) }
 0x13d   : > { %1339 = vst [vmem:[%s2793_s10 + $0x18] sm:$0xff] %v1335_v40 }
 0x13e   : > { %1368 = vst [vmem:[%s1352_s12 + $0x8] sm:$0xff] %v1367_v42 }
 0x144   : > { %v1371_v44 = vld [vmem:[%s2793_s10 + $0x18] sm:$0xff] }
 0x145   : > { %1372 = vst [vmem:[%s1352_s12 + $0x28] sm:$0xff] %v1371_v44 }
 0x146 PF: > { %s19_s17 = sadd.s32 1, %s2357_s17   ;;  %s2837_s12 = smov %s2341_s13 }
 0x147   : > { %p16_p1 = scmp.ge.s32.totalorder %s19_s17, 4   ;;  %s2838_s13 = smov %s2345_s14 }
 0x148   : > { %s2839_s14 = smov %s2430_s24  ;;  %s2840_s15 = smov %s2353_s16 }
 0x149   : > { %s2841_s16 = smov %s2843_s19  ;;  %18 = sbr.rel (!%p16_p1) target bundleno = 6 (0x6), region = 111 }
 0x14e   :  { %1388 = vsyncpa [#allocation3], 1 }
 0x14f   :  { %1390 = vsyncpa [#allocation3 + $0x1], 1 }
 0x150   :  { %1391 = vsyncpa [#allocation5], 1 }
 0x151   :  { %1393 = vsyncpa [#allocation5 + $0x1], 1 }

// kernel: model_forward.5
= control target key start
LH: loop header
LB: loop body
LE: loop exit
PB: predicated region body
PF: predicated region fallthrough
CT: control target
= control target key end

     0   :  { %8 = vsyncpa [#allocation3], 0  ;;  %s4831_s0 = inlined_call_operand.vmem [shape: bf16[16,1024], index: 0, kind: input, shape index: {}]   ;;  %s4832_s1 = inlined_call_operand.hbm [shape: bf16[1024,1024], index: 1, kind: input, shape index: {}]   ;;  %s4833_s2 = inlined_call_operand.hbm [shape: f32[1,1024], index: 2, kind: input, shape index: {}]   ;;  %s4834_s3 = inlined_call_operand.vmem [shape: f32[16,1024], index: 3, kind: output, shape index: {}]  }
   0x1   :  { %10 = vsyncpa [#allocation3 + $0x1], 0 }
   0x2   :  { %11 = vsyncpa [#allocation5], 0 }
   0x3   :  { %13 = vsyncpa [#allocation5 + $0x1], 0  ;;  %s4066_s12 = smov 0   ;;  %s4068_s13 = smov 0  }
   0x4   :  { %s4070_s14 = smov 0   ;;  %s4072_s15 = smov 0  }
   0x5   :  { %s4074_s16 = smov 0   ;;  %s4076_s17 = smov 0  }
   0x6 LB: > { %s2523_s18 = sadd.s32 4294967295, %s4041_s17   ;;  %s34_s19 = sadd.s32 1, %s4037_s16  ;;  %s4041_s17 = sphi %s4076_s17, %s19_s17   ;;  %s4037_s16 = sphi %s4074_s16, %s4843_s16   ;;  %s4033_s15 = sphi %s4072_s15, %s4842_s15   ;;  %s4029_s14 = sphi %s4070_s14, %s4841_s14   ;;  %s4025_s13 = sphi %s4068_s13, %s4840_s13   ;;  %s4021_s12 = sphi %s4066_s12, %s4839_s12  }
   0x7   : > { %p36_p0 = scmp.ge.s32.totalorder %s34_s19, 2  ;;  %s75_s20 = sadd.s32 1, %s4029_s14 }
   0x8   : > { %p82_p1 = scmp.ne.s32.totalorder %s4029_s14, %s4025_s13  ;;  %p83_p2 = scmp.eq.s32.totalorder %s4041_s17, 0 }
   0x9   : > { %s4845_s19 = smov (%p36_p0, %s34_s19), 0  ;;  %p88_p4 = scmp.ne.s32.totalorder %s4025_s13, %s4021_s12 }
   0xa   : > { %p4102_p3 = por %p83_p2, %p82_p1  ;;  %s71_s22 = ssub.s32 %s4037_s16, %s4845_s19 }
   0xb   : > { %p89_p5 = scmp.eq.s32.totalorder %s2523_s18, 0  ;;  %p73_p6 = scmp.eq.s32.totalorder %s71_s22, 0 }
   0xc   : > { %p140_p7 = scmp.eq.s32.totalorder %s2523_s18, 1  ;;  %p3875_p10 = scmp.lt.s32.totalorder %s4041_s17, 2 }
   0xd   : > { %p4109_p8 = por %p89_p5, %p88_p4  ;;  %s4122_s26 = sand.u32 1, %s4029_s14  }
   0xe   : > { %s4114_s24 = scalar_select %p73_p6, %s4029_s14, %s75_s20  }
   0xf   : > { %p4116_p9 = por %p140_p7, %p82_p1  ;;  %s3598_s27 = sshll.u32 %s4037_s16, 4 }
  0x10   : > { %s2528_s28 = sshll.u32 %s4122_s26, 11  ;;  %s193_s4 = scalar_lea.hbm %s4832_s1, %s3598_s27 }
  0x11   : > { %s194_s5 = sshll.u32 %s193_s4, 4  ;;  %s185_s6 = scalar_lea.vmem [#allocation2], %s2528_s28  ;;  %s195_s5 = int_to_ptr.hbm [resolvable:$true] %s194_s5 }
  0x12   : > { %s196_s7 = sshll.u32 %s185_s6, 4  ;;  %p4131_p11 = pnand %p3875_p10, %p4102_p3  ;;  %s197_s7 = int_to_ptr.vmem [resolvable:$true] %s196_s7 }
  0x13   : > { %p2533_p12 = scmp.ge.s32.totalorder %s4041_s17, 1  ;;  %s182_s9 = scalar_lea.sflag [#allocation3], %s4122_s26 }
  0x14   : > { %s4043_s10 = smov 512   ;;  %s4044_s11 = smov 256  }
  0x15   : > { %s4045_s12 = smov 16   ;;  %p223_p13 = scmp.lt.s32.totalorder %s4041_s17, 3 }
  0x16   : > { %3871 = dma.hbm_to_vmem [thread:$0]  (!%p4131_p11), %s195_s5, 32768, %s197_s7, %s182_s9, %s4043_s10, %s4044_s11, %s4045_s12  }
  0x17   : > { %s2531_s18 = sshll.u32 %s4122_s26, 2  ;;  %s2532_s20 = sshll.u32 %s4037_s16, 2 }
  0x18   : > { %p224_p0 = pnand %p2533_p12, %p223_p13  ;;  %s214_s27 = scalar_lea.hbm %s4833_s2, %s2532_s20 }
  0x19   : > { %s210_s28 = scalar_lea.vmem [#allocation4], %s2531_s18  ;;  %s216_s30 = sshll.u32 %s214_s27, 4  ;;  %s217_s30 = int_to_ptr.hbm [resolvable:$true] %s216_s30 }
  0x1a   : > { %s218_s29 = sshll.u32 %s210_s28, 4  ;;  %s207_s4 = scalar_lea.sflag [#allocation5], %s4122_s26  ;;  %s219_s29 = int_to_ptr.vmem [resolvable:$true] %s218_s29 }
  0x1b   : > { %3874 = dma.hbm_to_vmem [thread:$0]  (!%p4131_p11), %s217_s30, 64, %s219_s29, %s207_s4  }
  0x1c   : > { %227 = sbr.rel (%p224_p0) target bundleno = 454 (0x1c6), region = 32  ;;  %s4149_s5 = sand.u32 (!%p224_p0), 1, %s4025_s13  }
  0x1d   : > { %s2534_s6 = sshll.u32 (!%p224_p0), %s4149_s5, 11  ;;  %s230_s7 = scalar_lea.sflag (!%p224_p0), [#allocation3], %s4149_s5 }
  0x1e   : > { %s4153_s9 = scalar_lea.vmem (!%p224_p0), [#allocation2], %s2534_s6 }
  0x21   : > { %4012 = dma.done.wait (%p4109_p8), %s230_s7, 32768  }
  0x22   : > { %4014 = vsyncadd (%p4109_p8), %s230_s7, 4294934528  ;;  %s2535_s26 = sshll.u32 %s4149_s5, 2  ;;  %s240_s8 = scalar_lea.sflag [#allocation5], %s4149_s5 }
  0x23   : > { %s4161_s10 = scalar_lea.vmem [#allocation4], %s2535_s26 }
  0x24   : > { %4016 = dma.done.wait (%p4109_p8), %s240_s8, 64  }
  0x25   : > { %4018 = vsyncadd (%p4109_p8), %s240_s8, 4294967232  ;;  %v2683_v0 = vld [vmem:[%s4153_s9 + $0xe0] sm:$0xf]  ;;  %v3637_v1 = vld [vmem:[%s4153_s9 + $0xec] sm:$0xf0] }
  0x26   : > { %v2811_v2 = vld [vmem:[%s4153_s9 + $0x1e0] sm:$0xf]  ;;  %v2684_v3 = vor.u32 %v3637_v1, %v2683_v0  ;;  %v3669_v4 = vld [vmem:[%s4153_s9 + $0x1ec] sm:$0xf0] }
  0x27   : > { %v2939_v5 = vld [vmem:[%s4153_s9 + $0x2e0] sm:$0xf]  ;;  %v3701_v6 = vld [vmem:[%s4153_s9 + $0x2ec] sm:$0xf0]  ;;  %v2812_v7 = vor.u32 %v3669_v4, %v2811_v2 }
  0x28   : > { %v2940_v8 = vor.u32 %v3701_v6, %v2939_v5  ;;  %v3067_v9 = vld [vmem:[%s4153_s9 + $0x3e0] sm:$0xf]  ;;  %v3733_v10 = vld [vmem:[%s4153_s9 + $0x3ec] sm:$0xf0]  ;;  %1892 = vmatpush.bf16.msra.mxu0 %v2684_v3 }
  0x29   : > { %v2667_v11 = vld [vmem:[%s4153_s9 + $0xc0] sm:$0xf]  ;;  %v3068_v12 = vor.u32 %v3733_v10, %v3067_v9  ;;  %v3633_v13 = vld [vmem:[%s4153_s9 + $0xcc] sm:$0xf0]  ;;  %1906 = vmatpush.bf16.msra.mxu1 %v2812_v7 }
  0x2a   : > { %v2795_v14 = vld [vmem:[%s4153_s9 + $0x1c0] sm:$0xf]  ;;  %v3665_v15 = vld [vmem:[%s4153_s9 + $0x1cc] sm:$0xf0]  ;;  %1920 = vmatpush.bf16.msra.mxu2 %v2940_v8  ;;  %v2668_v16 = vor.u32 %v3633_v13, %v2667_v11 }
  0x2b   : > { %v2796_v17 = vor.u32 %v3665_v15, %v2795_v14  ;;  %v2923_v18 = vld [vmem:[%s4153_s9 + $0x2c0] sm:$0xf]  ;;  %v3697_v19 = vld [vmem:[%s4153_s9 + $0x2cc] sm:$0xf0]  ;;  %1934 = vmatpush.bf16.msra.mxu3 %v3068_v12 }
  0x2c   : > { %v3051_v20 = vld [vmem:[%s4153_s9 + $0x3c0] sm:$0xf]  ;;  %v2924_v21 = vor.u32 %v3697_v19, %v2923_v18  ;;  %v3729_v22 = vld [vmem:[%s4153_s9 + $0x3cc] sm:$0xf0]  ;;  %1893 = vmatpush.bf16.msra.mxu0 %v2668_v16 }
  0x2d   : > { %v2651_v23 = vld [vmem:[%s4153_s9 + $0xa0] sm:$0xf]  ;;  %v3629_v24 = vld [vmem:[%s4153_s9 + $0xac] sm:$0xf0]  ;;  %v3052_v25 = vor.u32 %v3729_v22, %v3051_v20  ;;  %1907 = vmatpush.bf16.msra.mxu1 %v2796_v17 }
  0x2e   : > { %v2779_v26 = vld [vmem:[%s4153_s9 + $0x1a0] sm:$0xf]  ;;  %v3661_v27 = vld [vmem:[%s4153_s9 + $0x1ac] sm:$0xf0]  ;;  %v2652_v29 = vor.u32 %v3629_v24, %v2651_v23  ;;  %1921 = vmatpush.bf16.msra.mxu2 %v2924_v21 }
  0x2f   : > { %v2907_v28 = vld [vmem:[%s4153_s9 + $0x2a0] sm:$0xf]  ;;  %v3693_v30 = vld [vmem:[%s4153_s9 + $0x2ac] sm:$0xf0]  ;;  %v2780_v33 = vor.u32 %v3661_v27, %v2779_v26  ;;  %1935 = vmatpush.bf16.msra.mxu3 %v3052_v25 }
  0x30   : > { %v3035_v31 = vld [vmem:[%s4153_s9 + $0x3a0] sm:$0xf]  ;;  %v3725_v32 = vld [vmem:[%s4153_s9 + $0x3ac] sm:$0xf0]  ;;  %v2908_v34 = vor.u32 %v3693_v30, %v2907_v28  ;;  %1894 = vmatpush.bf16.msra.mxu0 %v2652_v29 }
  0x31   : > { %v2635_v35 = vld [vmem:[%s4153_s9 + $0x80] sm:$0xf]  ;;  %v3625_v36 = vld [vmem:[%s4153_s9 + $0x8c] sm:$0xf0]  ;;  %v3036_v38 = vor.u32 %v3725_v32, %v3035_v31  ;;  %1908 = vmatpush.bf16.msra.mxu1 %v2780_v33 }
  0x32   : > { %v2763_v37 = vld [vmem:[%s4153_s9 + $0x180] sm:$0xf]  ;;  %v3657_v39 = vld [vmem:[%s4153_s9 + $0x18c] sm:$0xf0]  ;;  %v2636_v44 = vor.u32 %v3625_v36, %v2635_v35  ;;  %1922 = vmatpush.bf16.msra.mxu2 %v2908_v34 }
  0x33   : > { %v2891_v40 = vld [vmem:[%s4153_s9 + $0x280] sm:$0xf]  ;;  %v3689_v41 = vld [vmem:[%s4153_s9 + $0x28c] sm:$0xf0]  ;;  %v2764_v45 = vor.u32 %v3657_v39, %v2763_v37  ;;  %1936 = vmatpush.bf16.msra.mxu3 %v3036_v38 }
  0x34   : > { %v3019_v42 = vld [vmem:[%s4153_s9 + $0x380] sm:$0xf]  ;;  %v3721_v43 = vld [vmem:[%s4153_s9 + $0x38c] sm:$0xf0]  ;;  %v2892_v46 = vor.u32 %v3689_v41, %v2891_v40  ;;  %1895 = vmatpush.bf16.msra.mxu0 %v2636_v44 }
  0x35   : > { %v2619_v47 = vld [vmem:[%s4153_s9 + $0x60] sm:$0xf]  ;;  %v3621_v48 = vld [vmem:[%s4153_s9 + $0x6c] sm:$0xf0]  ;;  %v3020_v50 = vor.u32 %v3721_v43, %v3019_v42  ;;  %1909 = vmatpush.bf16.msra.mxu1 %v2764_v45 }
  0x36   : > { %v2747_v49 = vld [vmem:[%s4153_s9 + $0x160] sm:$0xf]  ;;  %v3653_v51 = vld [vmem:[%s4153_s9 + $0x16c] sm:$0xf0]  ;;  %v2620_v56 = vor.u32 %v3621_v48, %v2619_v47  ;;  %1923 = vmatpush.bf16.msra.mxu2 %v2892_v46 }
  0x37   : > { %v2875_v52 = vld [vmem:[%s4153_s9 + $0x260] sm:$0xf]  ;;  %v3685_v53 = vld [vmem:[%s4153_s9 + $0x26c] sm:$0xf0]  ;;  %v2748_v57 = vor.u32 %v3653_v51, %v2747_v49  ;;  %1937 = vmatpush.bf16.msra.mxu3 %v3020_v50 }
  0x38   : > { %v3003_v54 = vld [vmem:[%s4153_s9 + $0x360] sm:$0xf]  ;;  %v3717_v55 = vld [vmem:[%s4153_s9 + $0x36c] sm:$0xf0]  ;;  %v2876_v58 = vor.u32 %v3685_v53, %v2875_v52  ;;  %1896 = vmatpush.bf16.msra.mxu0 %v2620_v56 }
  0x39   : > { %v2603_v59 = vld [vmem:[%s4153_s9 + $0x40] sm:$0xf]  ;;  %v3617_v60 = vld [vmem:[%s4153_s9 + $0x4c] sm:$0xf0]  ;;  %v3004_v62 = vor.u32 %v3717_v55, %v3003_v54  ;;  %1910 = vmatpush.bf16.msra.mxu1 %v2748_v57  ;;  %v2547_v54 = vld [vmem:[%s4831_s0 + $0x8] sm:$0xf] }
  0x3a   : > { %v2731_v61 = vld [vmem:[%s4153_s9 + $0x140] sm:$0xf]  ;;  %v3649_v63 = vld [vmem:[%s4153_s9 + $0x14c] sm:$0xf0]  ;;  %v2604_v4 = vor.u32 %v3617_v60, %v2603_v59  ;;  %1924 = vmatpush.bf16.msra.mxu2 %v2876_v58  ;;  %v3604_v59 = vld [vmem:[%s4831_s0 + $0x24] sm:$0xf0] }
  0x3b   : > { %v2859_v0 = vld [vmem:[%s4153_s9 + $0x240] sm:$0xf]  ;;  %v3681_v1 = vld [vmem:[%s4153_s9 + $0x24c] sm:$0xf0]  ;;  %v2732_v5 = vor.u32 %v3649_v63, %v2731_v61  ;;  %1938 = vmatpush.bf16.msra.mxu3 %v3004_v62 }
  0x3c   : > { %v2987_v2 = vld [vmem:[%s4153_s9 + $0x340] sm:$0xf]  ;;  %v3713_v3 = vld [vmem:[%s4153_s9 + $0x34c] sm:$0xf0]  ;;  %v2860_v6 = vor.u32 %v3681_v1, %v2859_v0  ;;  %1897 = vmatpush.bf16.msra.mxu0 %v2604_v4  ;;  %v4266_v1 = vor.u32 %v3604_v59, %v2547_v54 }
  0x3d   : > { %v2587_v7 = vld [vmem:[%s4153_s9 + $0x20] sm:$0xf]  ;;  %v3613_v8 = vld [vmem:[%s4153_s9 + $0x2c] sm:$0xf0]  ;;  %v2988_v10 = vor.u32 %v3713_v3, %v2987_v2  ;;  %1911 = vmatpush.bf16.msra.mxu1 %v2732_v5 }
  0x3e   : > { %v2715_v9 = vld [vmem:[%s4153_s9 + $0x120] sm:$0xf]  ;;  %v3645_v11 = vld [vmem:[%s4153_s9 + $0x12c] sm:$0xf0]  ;;  %v2588_v16 = vor.u32 %v3613_v8, %v2587_v7  ;;  %1925 = vmatpush.bf16.msra.mxu2 %v2860_v6  ;;  %v3599_v6 = vld [vmem:[%s4831_s0 + $0x4] sm:$0xf] }
  0x3f   : > { %v2843_v12 = vld [vmem:[%s4153_s9 + $0x220] sm:$0xf]  ;;  %v3677_v13 = vld [vmem:[%s4153_s9 + $0x22c] sm:$0xf0]  ;;  %v2716_v19 = vor.u32 %v3645_v11, %v2715_v9  ;;  %1939 = vmatpush.bf16.msra.mxu3 %v2988_v10  ;;  %v2541_v7 = vld [vmem:[%s4831_s0 + $0x20] sm:$0xf0] }
  0x40   : > { %v2971_v14 = vld [vmem:[%s4153_s9 + $0x320] sm:$0xf]  ;;  %v3709_v15 = vld [vmem:[%s4153_s9 + $0x32c] sm:$0xf0]  ;;  %v2844_v20 = vor.u32 %v3677_v13, %v2843_v12  ;;  %1898 = vmatpush.bf16.msra.mxu0 %v2588_v16  ;;  %v3600_v8 = vld [vmem:[%s4831_s0 + $0xc] sm:$0xf]  ;;  %v4282_v10 = vor.u32 %v3599_v6, %v2541_v7 }
  0x41   : > { %v2571_v17 = vld [vmem:[%s4153_s9] sm:$0xf]  ;;  %v3609_v18 = vld [vmem:[%s4153_s9 + $0xc] sm:$0xf0]  ;;  %v2972_v24 = vor.u32 %v3709_v15, %v2971_v14  ;;  %1912 = vmatpush.bf16.msra.mxu1 %v2716_v19  ;;  %v2549_v11 = vld [vmem:[%s4831_s0 + $0x28] sm:$0xf0] }
  0x42   : > { %v2699_v21 = vld [vmem:[%s4153_s9 + $0x100] sm:$0xf]  ;;  %v3641_v22 = vld [vmem:[%s4153_s9 + $0x10c] sm:$0xf0]  ;;  %v2572_v31 = vor.u32 %v3609_v18, %v2571_v17  ;;  %1926 = vmatpush.bf16.msra.mxu2 %v2844_v20  ;;  %v4290_v17 = vor.u32 %v3600_v8, %v2549_v11 }
  0x43   : > { %v2827_v23 = vld [vmem:[%s4153_s9 + $0x200] sm:$0xf]  ;;  %v3673_v25 = vld [vmem:[%s4153_s9 + $0x20c] sm:$0xf0]  ;;  %v2700_v35 = vor.u32 %v3641_v22, %v2699_v21  ;;  %1940 = vmatpush.bf16.msra.mxu3 %v2972_v24 }
  0x44   : > { %v2955_v26 = vld [vmem:[%s4153_s9 + $0x300] sm:$0xf]  ;;  %v3705_v27 = vld [vmem:[%s4153_s9 + $0x30c] sm:$0xf0]  ;;  %v2828_v36 = vor.u32 %v3673_v25, %v2827_v23  ;;  %1899 = vmatpush.bf16.msra.mxu0 %v2572_v31 }
  0x45   : > { %v3195_v28 = vld [vmem:[%s4153_s9 + $0x4e0] sm:$0xf]  ;;  %v3765_v29 = vld [vmem:[%s4153_s9 + $0x4ec] sm:$0xf0]  ;;  %v2956_v39 = vor.u32 %v3705_v27, %v2955_v26  ;;  %1913 = vmatpush.bf16.msra.mxu1 %v2700_v35 }
  0x46   : > { %v3323_v30 = vld [vmem:[%s4153_s9 + $0x5e0] sm:$0xf]  ;;  %v3797_v32 = vld [vmem:[%s4153_s9 + $0x5ec] sm:$0xf0]  ;;  %v3196_v40 = vor.u32 %v3765_v29, %v3195_v28  ;;  %1927 = vmatpush.bf16.msra.mxu2 %v2828_v36 }
  0x47   : > { %v3451_v33 = vld [vmem:[%s4153_s9 + $0x6e0] sm:$0xf]  ;;  %v3829_v34 = vld [vmem:[%s4153_s9 + $0x6ec] sm:$0xf0]  ;;  %v3324_v43 = vor.u32 %v3797_v32, %v3323_v30  ;;  %1941 = vmatpush.bf16.msra.mxu3 %v2956_v39 }
  0x48   : > { %v3579_v37 = vld [vmem:[%s4153_s9 + $0x7e0] sm:$0xf]  ;;  %v3861_v38 = vld [vmem:[%s4153_s9 + $0x7ec] sm:$0xf0]  ;;  %v3452_v44 = vor.u32 %v3829_v34, %v3451_v33  ;;  %1948 = vmatpush.bf16.msrb.mxu0 %v3196_v40  ;;  %1914 = vmatmul.bf16.vlgmr.msra.gmra.mxu1 %v4282_v10 }
  0x49   : > { %v3179_v41 = vld [vmem:[%s4153_s9 + $0x4c0] sm:$0xf]  ;;  %v3761_v42 = vld [vmem:[%s4153_s9 + $0x4cc] sm:$0xf0]  ;;  %v3580_v48 = vor.u32 %v3861_v38, %v3579_v37  ;;  %1962 = vmatpush.bf16.msrb.mxu1 %v3324_v43  ;;  %1928 = vmatmul.bf16.vlgmr.msra.gmra.mxu2 %v4266_v1 }
  0x4a   : > { %v3307_v45 = vld [vmem:[%s4153_s9 + $0x5c0] sm:$0xf]  ;;  %v3793_v46 = vld [vmem:[%s4153_s9 + $0x5cc] sm:$0xf0]  ;;  %v3180_v55 = vor.u32 %v3761_v42, %v3179_v41  ;;  %1976 = vmatpush.bf16.msrb.mxu2 %v3452_v44  ;;  %1942 = vmatmul.bf16.vlgmr.msra.gmra.mxu3 %v4290_v17 }
  0x4b   : > { %v3435_v47 = vld [vmem:[%s4153_s9 + $0x6c0] sm:$0xf]  ;;  %v3825_v49 = vld [vmem:[%s4153_s9 + $0x6cc] sm:$0xf0]  ;;  %v3308_v60 = vor.u32 %v3793_v46, %v3307_v45  ;;  %1990 = vmatpush.bf16.msrb.mxu3 %v3580_v48 }
  0x4c   : > { %v3563_v50 = vld [vmem:[%s4153_s9 + $0x7c0] sm:$0xf]  ;;  %v3857_v51 = vld [vmem:[%s4153_s9 + $0x7cc] sm:$0xf0]  ;;  %v3436_v61 = vor.u32 %v3825_v49, %v3435_v47  ;;  %1949 = vmatpush.bf16.msrb.mxu0 %v3180_v55 }
  0x4d   : > { %v2539_v52 = vld [vmem:[%s4831_s0] sm:$0xf]  ;;  %v3757_v57 = vld [vmem:[%s4153_s9 + $0x4ac] sm:$0xf0]  ;;  %v3564_v2 = vor.u32 %v3857_v51, %v3563_v50  ;;  %1963 = vmatpush.bf16.msrb.mxu1 %v3308_v60 }
  0x4e   : > { %v3603_v53 = vld [vmem:[%s4831_s0 + $0x1c] sm:$0xf0]  ;;  %v3789_v63 = vld [vmem:[%s4153_s9 + $0x5ac] sm:$0xf0]  ;;  %1977 = vmatpush.bf16.msrb.mxu2 %v3436_v61 }
  0x4f   : > { %v3163_v56 = vld [vmem:[%s4153_s9 + $0x4a0] sm:$0xf]  ;;  %v4258_v58 = vor.u32 %v3603_v53, %v2539_v52  ;;  %v3821_v3 = vld [vmem:[%s4153_s9 + $0x6ac] sm:$0xf0]  ;;  %1991 = vmatpush.bf16.msrb.mxu3 %v3564_v2 }
  0x50   : > { %v3291_v62 = vld [vmem:[%s4153_s9 + $0x5a0] sm:$0xf]  ;;  %v3853_v5 = vld [vmem:[%s4153_s9 + $0x7ac] sm:$0xf0]  ;;  %v3164_v9 = vor.u32 %v3757_v57, %v3163_v56 }
  0x51   : > { %v3419_v0 = vld [vmem:[%s4153_s9 + $0x6a0] sm:$0xf]  ;;  %1900 = vmatmul.bf16.vlgmr.msra.gmra.mxu0 %v4258_v58  ;;  %v3292_v12 = vor.u32 %v3789_v63, %v3291_v62  ;;  %v3753_v15 = vld [vmem:[%s4153_s9 + $0x48c] sm:$0xf0] }
  0x52   : > { %v3547_v4 = vld [vmem:[%s4153_s9 + $0x7a0] sm:$0xf]  ;;  %v3420_v13 = vor.u32 %v3821_v3, %v3419_v0  ;;  %v3785_v19 = vld [vmem:[%s4153_s9 + $0x58c] sm:$0xf0]  ;;  %1950 = vmatpush.bf16.msrb.mxu0 %v3164_v9  ;;  %v3635_v9 = vld [vmem:[%s4153_s9 + $0xe4] sm:$0xf] }
  0x53   : > { %v3147_v14 = vld [vmem:[%s4153_s9 + $0x480] sm:$0xf]  ;;  %v3548_v18 = vor.u32 %v3853_v5, %v3547_v4  ;;  %v3817_v21 = vld [vmem:[%s4153_s9 + $0x68c] sm:$0xf0]  ;;  %1964 = vmatpush.bf16.msrb.mxu1 %v3292_v12  ;;  %v2685_v12 = vld [vmem:[%s4153_s9 + $0xf0] sm:$0xf0] }
  0x54   : > { %v3275_v16 = vld [vmem:[%s4153_s9 + $0x580] sm:$0xf]  ;;  %v3849_v23 = vld [vmem:[%s4153_s9 + $0x78c] sm:$0xf0]  ;;  %v3148_v24 = vor.u32 %v3753_v15, %v3147_v14  ;;  %1978 = vmatpush.bf16.msrb.mxu2 %v3420_v13  ;;  %v3667_v13 = vld [vmem:[%s4153_s9 + $0x1e4] sm:$0xf] }
  0x55   : > { %v3403_v20 = vld [vmem:[%s4153_s9 + $0x680] sm:$0xf]  ;;  %v3276_v25 = vor.u32 %v3785_v19, %v3275_v16  ;;  %v3749_v28 = vld [vmem:[%s4153_s9 + $0x46c] sm:$0xf0]  ;;  %1992 = vmatpush.bf16.msrb.mxu3 %v3548_v18  ;;  %v2813_v14 = vld [vmem:[%s4153_s9 + $0x1f0] sm:$0xf0] }
  0x56   : > { %v3531_v22 = vld [vmem:[%s4153_s9 + $0x780] sm:$0xf]  ;;  %v3404_v26 = vor.u32 %v3817_v21, %v3403_v20  ;;  %v3781_v31 = vld [vmem:[%s4153_s9 + $0x56c] sm:$0xf0]  ;;  %1951 = vmatpush.bf16.msrb.mxu0 %v3148_v24  ;;  %v3699_v15 = vld [vmem:[%s4153_s9 + $0x2e4] sm:$0xf] }
  0x57   : > { %v3131_v27 = vld [vmem:[%s4153_s9 + $0x460] sm:$0xf]  ;;  %v3532_v30 = vor.u32 %v3849_v23, %v3531_v22  ;;  %v3813_v33 = vld [vmem:[%s4153_s9 + $0x66c] sm:$0xf0]  ;;  %1965 = vmatpush.bf16.msrb.mxu1 %v3276_v25  ;;  %v2941_v16 = vld [vmem:[%s4153_s9 + $0x2f0] sm:$0xf0] }
  0x58   : > { %v3259_v29 = vld [vmem:[%s4153_s9 + $0x560] sm:$0xf]  ;;  %v3845_v35 = vld [vmem:[%s4153_s9 + $0x76c] sm:$0xf0]  ;;  %v3132_v36 = vor.u32 %v3749_v28, %v3131_v27  ;;  %1979 = vmatpush.bf16.msrb.mxu2 %v3404_v26  ;;  %v3731_v18 = vld [vmem:[%s4153_s9 + $0x3e4] sm:$0xf] }
  0x59   : > { %v3387_v32 = vld [vmem:[%s4153_s9 + $0x660] sm:$0xf]  ;;  %v3260_v37 = vor.u32 %v3781_v31, %v3259_v29  ;;  %v3745_v40 = vld [vmem:[%s4153_s9 + $0x44c] sm:$0xf0]  ;;  %1993 = vmatpush.bf16.msrb.mxu3 %v3532_v30  ;;  %v3069_v20 = vld [vmem:[%s4153_s9 + $0x3f0] sm:$0xf0]  ;;  %v2688_v29 = vor.u32 %v3635_v9, %v2685_v12 }
  0x5a   : > { %v3515_v34 = vld [vmem:[%s4153_s9 + $0x760] sm:$0xf]  ;;  %v3388_v38 = vor.u32 %v3813_v33, %v3387_v32  ;;  %v3777_v43 = vld [vmem:[%s4153_s9 + $0x54c] sm:$0xf0]  ;;  %1952 = vmatpush.bf16.msrb.mxu0 %v3132_v36  ;;  %v2563_v25 = vld [vmem:[%s4831_s0 + $0x18] sm:$0xf]  ;;  %v2816_v33 = vor.u32 %v3667_v13, %v2813_v14 }
  0x5b   : > { %v3115_v39 = vld [vmem:[%s4153_s9 + $0x440] sm:$0xf]  ;;  %v3516_v42 = vor.u32 %v3845_v35, %v3515_v34  ;;  %v3809_v45 = vld [vmem:[%s4153_s9 + $0x64c] sm:$0xf0]  ;;  %1966 = vmatpush.bf16.msrb.mxu1 %v3260_v37  ;;  %v3606_v26 = vld [vmem:[%s4831_s0 + $0x34] sm:$0xf0]  ;;  %v2944_v34 = vor.u32 %v3699_v15, %v2941_v16 }
  0x5c   : > { %v3243_v41 = vld [vmem:[%s4153_s9 + $0x540] sm:$0xf]  ;;  %v3841_v47 = vld [vmem:[%s4153_s9 + $0x74c] sm:$0xf0]  ;;  %v3116_v48 = vor.u32 %v3745_v40, %v3115_v39  ;;  %1980 = vmatpush.bf16.msrb.mxu2 %v3388_v38  ;;  %v3601_v27 = vld [vmem:[%s4831_s0 + $0x14] sm:$0xf]  ;;  %v3072_v38 = vor.u32 %v3731_v18, %v3069_v20 }
  0x5d   : > { %v3371_v44 = vld [vmem:[%s4153_s9 + $0x640] sm:$0xf]  ;;  %v3244_v50 = vor.u32 %v3777_v43, %v3243_v41  ;;  %v3741_v52 = vld [vmem:[%s4153_s9 + $0x42c] sm:$0xf0]  ;;  %1994 = vmatpush.bf16.msrb.mxu3 %v3516_v42  ;;  %v2557_v30 = vld [vmem:[%s4831_s0 + $0x30] sm:$0xf0]  ;;  %v4371_v43 = vor.u32 %v3606_v26, %v2563_v25 }
  0x5e   : > { %v3499_v46 = vld [vmem:[%s4153_s9 + $0x740] sm:$0xf]  ;;  %v3372_v51 = vor.u32 %v3809_v45, %v3371_v44  ;;  %v3773_v54 = vld [vmem:[%s4153_s9 + $0x52c] sm:$0xf0]  ;;  %1953 = vmatpush.bf16.msrb.mxu0 %v3116_v48  ;;  %v3602_v31 = vld [vmem:[%s4831_s0 + $0x1c] sm:$0xf]  ;;  %v4373_v44 = vor.u32 %v3601_v27, %v2557_v30 }
  0x5f   : > { %v3099_v49 = vld [vmem:[%s4153_s9 + $0x420] sm:$0xf]  ;;  %v3500_v55 = vor.u32 %v3841_v47, %v3499_v46  ;;  %v3805_v57 = vld [vmem:[%s4153_s9 + $0x62c] sm:$0xf0]  ;;  %1967 = vmatpush.bf16.msrb.mxu1 %v3244_v50  ;;  %v2565_v32 = vld [vmem:[%s4831_s0 + $0x38] sm:$0xf0] }
  0x60   : > { %v3227_v53 = vld [vmem:[%s4153_s9 + $0x520] sm:$0xf]  ;;  %v3837_v60 = vld [vmem:[%s4153_s9 + $0x72c] sm:$0xf0]  ;;  %v3100_v63 = vor.u32 %v3741_v52, %v3099_v49  ;;  %1981 = vmatpush.bf16.msrb.mxu2 %v3372_v51  ;;  %v3631_v35 = vld [vmem:[%s4153_s9 + $0xc4] sm:$0xf]  ;;  %v4377_v47 = vor.u32 %v3602_v31, %v2565_v32 }
  0x61   : > { %v3355_v56 = vld [vmem:[%s4153_s9 + $0x620] sm:$0xf]  ;;  %v3737_v62 = vld [vmem:[%s4153_s9 + $0x40c] sm:$0xf0]  ;;  %v3228_v5 = vor.u32 %v3773_v54, %v3227_v53  ;;  %1995 = vmatpush.bf16.msrb.mxu3 %v3500_v55  ;;  %v2669_v36 = vld [vmem:[%s4153_s9 + $0xd0] sm:$0xf0] }
  0x62   : > { %v3483_v59 = vld [vmem:[%s4153_s9 + $0x720] sm:$0xf]  ;;  %v3769_v2 = vld [vmem:[%s4153_s9 + $0x50c] sm:$0xf0]  ;;  %v3356_v6 = vor.u32 %v3805_v57, %v3355_v56  ;;  %1954 = vmatpush.bf16.msrb.mxu0 %v3100_v63  ;;  %v3663_v37 = vld [vmem:[%s4153_s9 + $0x1c4] sm:$0xf]  ;;  %v2672_v48 = vor.u32 %v3631_v35, %v2669_v36 }
  0x63   : > { %v3083_v61 = vld [vmem:[%s4153_s9 + $0x400] sm:$0xf]  ;;  %v3801_v4 = vld [vmem:[%s4153_s9 + $0x60c] sm:$0xf0]  ;;  %v3484_v11 = vor.u32 %v3837_v60, %v3483_v59  ;;  %1968 = vmatpush.bf16.msrb.mxu1 %v3228_v5  ;;  %v2797_v40 = vld [vmem:[%s4153_s9 + $0x1d0] sm:$0xf0] }
  0x64   : > { %v3211_v0 = vld [vmem:[%s4153_s9 + $0x500] sm:$0xf]  ;;  %v3833_v8 = vld [vmem:[%s4153_s9 + $0x70c] sm:$0xf0]  ;;  %v3084_v19 = vor.u32 %v3737_v62, %v3083_v61  ;;  %1982 = vmatpush.bf16.msrb.mxu2 %v3356_v6  ;;  %v3695_v41 = vld [vmem:[%s4153_s9 + $0x2c4] sm:$0xf]  ;;  %v2800_v49 = vor.u32 %v3663_v37, %v2797_v40 }
  0x65   : > { %v3339_v3 = vld [vmem:[%s4153_s9 + $0x600] sm:$0xf]  ;;  %v2555_v21 = vld [vmem:[%s4831_s0 + $0x10] sm:$0xf]  ;;  %v3212_v23 = vor.u32 %v3769_v2, %v3211_v0  ;;  %1996 = vmatpush.bf16.msrb.mxu3 %v3484_v11  ;;  %v2925_v42 = vld [vmem:[%s4153_s9 + $0x2d0] sm:$0xf0] }
  0x66   : > { %v3467_v7 = vld [vmem:[%s4153_s9 + $0x700] sm:$0xf]  ;;  %v3605_v22 = vld [vmem:[%s4831_s0 + $0x2c] sm:$0xf0]  ;;  %v3340_v24 = vor.u32 %v3801_v4, %v3339_v3  ;;  %1955 = vmatpush.bf16.msrb.mxu0 %v3084_v19  ;;  %v3727_v45 = vld [vmem:[%s4153_s9 + $0x3c4] sm:$0xf]  ;;  %v2928_v50 = vor.u32 %v3695_v41, %v2925_v42 }
  0x67   : > { %v3468_v28 = vor.u32 %v3833_v8, %v3467_v7  ;;  %v4366_v39 = vor.u32 %v3605_v22, %v2555_v21  ;;  %1969 = vmatpush.bf16.msrb.mxu1 %v3212_v23  ;;  %v3053_v46 = vld [vmem:[%s4153_s9 + $0x3d0] sm:$0xf0]  ;;  %v3627_v51 = vld [vmem:[%s4153_s9 + $0xa4] sm:$0xf] }
  0x68   : > { %1983 = vmatpush.bf16.msrb.mxu2 %v3340_v24  ;;  %v2653_v52 = vld [vmem:[%s4153_s9 + $0xb0] sm:$0xf0]  ;;  %v3659_v53 = vld [vmem:[%s4153_s9 + $0x1a4] sm:$0xf]  ;;  %v3056_v54 = vor.u32 %v3727_v45, %v3053_v46 }
  0x69   : > { %1997 = vmatpush.bf16.msrb.mxu3 %v3468_v28  ;;  %1956 = vmatmul.bf16.vlgmr.msrb.gmra.mxu0 %v4366_v39  ;;  %v2781_v55 = vld [vmem:[%s4153_s9 + $0x1b0] sm:$0xf0]  ;;  %v3691_v56 = vld [vmem:[%s4153_s9 + $0x2a4] sm:$0xf]  ;;  %v2656_v61 = vor.u32 %v3627_v51, %v2653_v52 }
  0x6a   : > { %2004 = vmatpush.bf16.msra.mxu0 %v2688_v29  ;;  %v2909_v57 = vld [vmem:[%s4153_s9 + $0x2b0] sm:$0xf0]  ;;  %1970 = vmatmul.bf16.vlgmr.msrb.gmra.mxu1 %v4373_v44  ;;  %v3723_v59 = vld [vmem:[%s4153_s9 + $0x3a4] sm:$0xf]  ;;  %v2784_v62 = vor.u32 %v3659_v53, %v2781_v55 }
  0x6b   : > { %2018 = vmatpush.bf16.msra.mxu1 %v2816_v33  ;;  %1984 = vmatmul.bf16.vlgmr.msrb.gmra.mxu2 %v4371_v43  ;;  %v3037_v60 = vld [vmem:[%s4153_s9 + $0x3b0] sm:$0xf0]  ;;  %v2912_v63 = vor.u32 %v3691_v56, %v2909_v57  ;;  %v3623_v0 = vld [vmem:[%s4153_s9 + $0x84] sm:$0xf] }
  0x6c   : > { %2032 = vmatpush.bf16.msra.mxu2 %v2944_v34  ;;  %1998 = vmatmul.bf16.vlgmr.msrb.gmra.mxu3 %v4377_v47  ;;  %v2637_v2 = vld [vmem:[%s4153_s9 + $0x90] sm:$0xf0]  ;;  %v3655_v3 = vld [vmem:[%s4153_s9 + $0x184] sm:$0xf]  ;;  %v3040_v4 = vor.u32 %v3723_v59, %v3037_v60 }
  0x6d   : > { %2046 = vmatpush.bf16.msra.mxu3 %v3072_v38  ;;  %v2765_v5 = vld [vmem:[%s4153_s9 + $0x190] sm:$0xf0]  ;;  %v3687_v6 = vld [vmem:[%s4153_s9 + $0x284] sm:$0xf]  ;;  %v2640_v11 = vor.u32 %v3623_v0, %v2637_v2 }
  0x6e   : > { %2005 = vmatpush.bf16.msra.mxu0 %v2672_v48  ;;  %v2893_v7 = vld [vmem:[%s4153_s9 + $0x290] sm:$0xf0]  ;;  %v3719_v8 = vld [vmem:[%s4153_s9 + $0x384] sm:$0xf]  ;;  %v2768_v12 = vor.u32 %v3655_v3, %v2765_v5 }
  0x6f   : > { %2019 = vmatpush.bf16.msra.mxu1 %v2800_v49  ;;  %v3021_v9 = vld [vmem:[%s4153_s9 + $0x390] sm:$0xf0]  ;;  %v2896_v13 = vor.u32 %v3687_v6, %v2893_v7  ;;  %v3619_v14 = vld [vmem:[%s4153_s9 + $0x64] sm:$0xf] }
  0x70   : > { %2033 = vmatpush.bf16.msra.mxu2 %v2928_v50  ;;  %v2621_v15 = vld [vmem:[%s4153_s9 + $0x70] sm:$0xf0]  ;;  %v3651_v16 = vld [vmem:[%s4153_s9 + $0x164] sm:$0xf]  ;;  %v3024_v18 = vor.u32 %v3719_v8, %v3021_v9 }
  0x71   : > { %2047 = vmatpush.bf16.msra.mxu3 %v3056_v54  ;;  %v2749_v19 = vld [vmem:[%s4153_s9 + $0x170] sm:$0xf0]  ;;  %v3683_v20 = vld [vmem:[%s4153_s9 + $0x264] sm:$0xf]  ;;  %v2624_v24 = vor.u32 %v3619_v14, %v2621_v15 }
  0x72   : > { %2006 = vmatpush.bf16.msra.mxu0 %v2656_v61  ;;  %v2877_v21 = vld [vmem:[%s4153_s9 + $0x270] sm:$0xf0]  ;;  %v3715_v22 = vld [vmem:[%s4153_s9 + $0x364] sm:$0xf]  ;;  %v2752_v25 = vor.u32 %v3651_v16, %v2749_v19 }
  0x73   : > { %2020 = vmatpush.bf16.msra.mxu1 %v2784_v62  ;;  %v3005_v23 = vld [vmem:[%s4153_s9 + $0x370] sm:$0xf0]  ;;  %v2880_v26 = vor.u32 %v3683_v20, %v2877_v21  ;;  %v3615_v27 = vld [vmem:[%s4153_s9 + $0x44] sm:$0xf] }
  0x74   : > { %2034 = vmatpush.bf16.msra.mxu2 %v2912_v63  ;;  %v2605_v28 = vld [vmem:[%s4153_s9 + $0x50] sm:$0xf0]  ;;  %v3647_v29 = vld [vmem:[%s4153_s9 + $0x144] sm:$0xf]  ;;  %v3008_v30 = vor.u32 %v3715_v22, %v3005_v23 }
  0x75   : > { %2048 = vmatpush.bf16.msra.mxu3 %v3040_v4  ;;  %v2733_v31 = vld [vmem:[%s4153_s9 + $0x150] sm:$0xf0]  ;;  %v3679_v32 = vld [vmem:[%s4153_s9 + $0x244] sm:$0xf]  ;;  %v2608_v36 = vor.u32 %v3615_v27, %v2605_v28 }
  0x76   : > { %2007 = vmatpush.bf16.msra.mxu0 %v2640_v11  ;;  %v2861_v33 = vld [vmem:[%s4153_s9 + $0x250] sm:$0xf0]  ;;  %v3711_v34 = vld [vmem:[%s4153_s9 + $0x344] sm:$0xf]  ;;  %v2736_v37 = vor.u32 %v3647_v29, %v2733_v31 }
  0x77   : > { %2021 = vmatpush.bf16.msra.mxu1 %v2768_v12  ;;  %v2989_v35 = vld [vmem:[%s4153_s9 + $0x350] sm:$0xf0]  ;;  %v2864_v38 = vor.u32 %v3679_v32, %v2861_v33  ;;  %v3611_v40 = vld [vmem:[%s4153_s9 + $0x24] sm:$0xf] }
  0x78   : > { %2035 = vmatpush.bf16.msra.mxu2 %v2896_v13  ;;  %v2589_v41 = vld [vmem:[%s4153_s9 + $0x30] sm:$0xf0]  ;;  %v3643_v42 = vld [vmem:[%s4153_s9 + $0x124] sm:$0xf]  ;;  %v2992_v45 = vor.u32 %v3711_v34, %v2989_v35 }
  0x79   : > { %2049 = vmatpush.bf16.msra.mxu3 %v3024_v18  ;;  %v2717_v46 = vld [vmem:[%s4153_s9 + $0x130] sm:$0xf0]  ;;  %v3675_v48 = vld [vmem:[%s4153_s9 + $0x224] sm:$0xf]  ;;  %v2592_v52 = vor.u32 %v3611_v40, %v2589_v41 }
  0x7a   : > { %2008 = vmatpush.bf16.msra.mxu0 %v2624_v24  ;;  %v2845_v49 = vld [vmem:[%s4153_s9 + $0x230] sm:$0xf0]  ;;  %v3707_v50 = vld [vmem:[%s4153_s9 + $0x324] sm:$0xf]  ;;  %v2720_v55 = vor.u32 %v3643_v42, %v2717_v46 }
  0x7b   : > { %2022 = vmatpush.bf16.msra.mxu1 %v2752_v25  ;;  %v2973_v51 = vld [vmem:[%s4153_s9 + $0x330] sm:$0xf0]  ;;  %v3607_v53 = vld [vmem:[%s4153_s9 + $0x4] sm:$0xf]  ;;  %v2848_v56 = vor.u32 %v3675_v48, %v2845_v49 }
  0x7c   : > { %2036 = vmatpush.bf16.msra.mxu2 %v2880_v26  ;;  %v2573_v54 = vld [vmem:[%s4153_s9 + $0x10] sm:$0xf0]  ;;  %v3639_v57 = vld [vmem:[%s4153_s9 + $0x104] sm:$0xf]  ;;  %v2976_v61 = vor.u32 %v3707_v50, %v2973_v51 }
  0x7d   : > { %2050 = vmatpush.bf16.msra.mxu3 %v3008_v30  ;;  %v2701_v59 = vld [vmem:[%s4153_s9 + $0x110] sm:$0xf0]  ;;  %v3671_v60 = vld [vmem:[%s4153_s9 + $0x204] sm:$0xf]  ;;  %v2576_v5 = vor.u32 %v3607_v53, %v2573_v54 }
  0x7e   : > { %2009 = vmatpush.bf16.msra.mxu0 %v2608_v36  ;;  %v2829_v62 = vld [vmem:[%s4153_s9 + $0x210] sm:$0xf0]  ;;  %v3703_v63 = vld [vmem:[%s4153_s9 + $0x304] sm:$0xf]  ;;  %v2704_v9 = vor.u32 %v3639_v57, %v2701_v59 }
  0x7f   : > { %2023 = vmatpush.bf16.msra.mxu1 %v2736_v37  ;;  %v2957_v0 = vld [vmem:[%s4153_s9 + $0x310] sm:$0xf0]  ;;  %v3763_v2 = vld [vmem:[%s4153_s9 + $0x4e4] sm:$0xf]  ;;  %v2832_v11 = vor.u32 %v3671_v60, %v2829_v62 }
  0x80   : > { %2037 = vmatpush.bf16.msra.mxu2 %v2864_v38  ;;  %v3197_v3 = vld [vmem:[%s4153_s9 + $0x4f0] sm:$0xf0]  ;;  %v3795_v4 = vld [vmem:[%s4153_s9 + $0x5e4] sm:$0xf]  ;;  %v2960_v14 = vor.u32 %v3703_v63, %v2957_v0 }
  0x81   : > { %2051 = vmatpush.bf16.msra.mxu3 %v2992_v45  ;;  %v3325_v6 = vld [vmem:[%s4153_s9 + $0x5f0] sm:$0xf0]  ;;  %v3827_v7 = vld [vmem:[%s4153_s9 + $0x6e4] sm:$0xf]  ;;  %v3200_v15 = vor.u32 %v3763_v2, %v3197_v3 }
  0x82   : > { %2010 = vmatpush.bf16.msra.mxu0 %v2592_v52  ;;  %v3453_v8 = vld [vmem:[%s4153_s9 + $0x6f0] sm:$0xf0]  ;;  %v3859_v12 = vld [vmem:[%s4153_s9 + $0x7e4] sm:$0xf]  ;;  %v3328_v16 = vor.u32 %v3795_v4, %v3325_v6 }
  0x83   : > { %2024 = vmatpush.bf16.msra.mxu1 %v2720_v55  ;;  %v3581_v13 = vld [vmem:[%s4153_s9 + $0x7f0] sm:$0xf0]  ;;  %v3456_v18 = vor.u32 %v3827_v7, %v3453_v8  ;;  %v3759_v19 = vld [vmem:[%s4153_s9 + $0x4c4] sm:$0xf] }
  0x84   : > { %2038 = vmatpush.bf16.msra.mxu2 %v2848_v56  ;;  %v3181_v20 = vld [vmem:[%s4153_s9 + $0x4d0] sm:$0xf0]  ;;  %v3791_v21 = vld [vmem:[%s4153_s9 + $0x5c4] sm:$0xf]  ;;  %v3584_v22 = vor.u32 %v3859_v12, %v3581_v13 }
  0x85   : > { %2052 = vmatpush.bf16.msra.mxu3 %v2976_v61  ;;  %v3309_v23 = vld [vmem:[%s4153_s9 + $0x5d0] sm:$0xf0]  ;;  %v3823_v24 = vld [vmem:[%s4153_s9 + $0x6c4] sm:$0xf]  ;;  %v3184_v28 = vor.u32 %v3759_v19, %v3181_v20 }
  0x86   : > { %2011 = vmatpush.bf16.msra.mxu0 %v2576_v5  ;;  %v3437_v25 = vld [vmem:[%s4153_s9 + $0x6d0] sm:$0xf0]  ;;  %v3855_v26 = vld [vmem:[%s4153_s9 + $0x7c4] sm:$0xf]  ;;  %v3312_v29 = vor.u32 %v3791_v21, %v3309_v23 }
  0x87   : > { %2025 = vmatpush.bf16.msra.mxu1 %v2704_v9  ;;  %v3565_v27 = vld [vmem:[%s4153_s9 + $0x7d0] sm:$0xf0]  ;;  %v3440_v30 = vor.u32 %v3823_v24, %v3437_v25  ;;  %v3755_v31 = vld [vmem:[%s4153_s9 + $0x4a4] sm:$0xf] }
  0x88   : > { %2039 = vmatpush.bf16.msra.mxu2 %v2832_v11  ;;  %v3165_v32 = vld [vmem:[%s4153_s9 + $0x4b0] sm:$0xf0]  ;;  %v3787_v33 = vld [vmem:[%s4153_s9 + $0x5a4] sm:$0xf]  ;;  %v3568_v34 = vor.u32 %v3855_v26, %v3565_v27 }
  0x89   : > { %2053 = vmatpush.bf16.msra.mxu3 %v2960_v14  ;;  %v3293_v35 = vld [vmem:[%s4153_s9 + $0x5b0] sm:$0xf0]  ;;  %v3819_v36 = vld [vmem:[%s4153_s9 + $0x6a4] sm:$0xf]  ;;  %2012 = vmatmul.bf16.vlgmr.msra.gmra.mxu0 %v4258_v58  ;;  %v3168_v41 = vor.u32 %v3755_v31, %v3165_v32 }
  0x8a   : > { %2060 = vmatpush.bf16.msrb.mxu0 %v3200_v15  ;;  %v3421_v37 = vld [vmem:[%s4153_s9 + $0x6b0] sm:$0xf0]  ;;  %v3851_v38 = vld [vmem:[%s4153_s9 + $0x7a4] sm:$0xf]  ;;  %2026 = vmatmul.bf16.vlgmr.msra.gmra.mxu1 %v4282_v10  ;;  %v3296_v42 = vor.u32 %v3787_v33, %v3293_v35 }
  0x8b   : > { %2074 = vmatpush.bf16.msrb.mxu1 %v3328_v16  ;;  %v3549_v40 = vld [vmem:[%s4153_s9 + $0x7b0] sm:$0xf0]  ;;  %2040 = vmatmul.bf16.vlgmr.msra.gmra.mxu2 %v4266_v1  ;;  %v3424_v45 = vor.u32 %v3819_v36, %v3421_v37  ;;  %v3751_v46 = vld [vmem:[%s4153_s9 + $0x484] sm:$0xf] }
  0x8c   : > { %2088 = vmatpush.bf16.msrb.mxu2 %v3456_v18  ;;  %2054 = vmatmul.bf16.vlgmr.msra.gmra.mxu3 %v4290_v17  ;;  %v3149_v48 = vld [vmem:[%s4153_s9 + $0x490] sm:$0xf0]  ;;  %v3783_v49 = vld [vmem:[%s4153_s9 + $0x584] sm:$0xf]  ;;  %v3552_v50 = vor.u32 %v3851_v38, %v3549_v40 }
  0x8d   : > { %2102 = vmatpush.bf16.msrb.mxu3 %v3584_v22  ;;  %v3277_v51 = vld [vmem:[%s4153_s9 + $0x590] sm:$0xf0]  ;;  %v3815_v52 = vld [vmem:[%s4153_s9 + $0x684] sm:$0xf]  ;;  %v3152_v56 = vor.u32 %v3751_v46, %v3149_v48  ;;  %v2691_v48 = vld [vmem:[%s4153_s9 + $0xe8] sm:$0xf] }
  0x8e   : > { %2061 = vmatpush.bf16.msrb.mxu0 %v3184_v28  ;;  %v3405_v53 = vld [vmem:[%s4153_s9 + $0x690] sm:$0xf0]  ;;  %v3847_v54 = vld [vmem:[%s4153_s9 + $0x784] sm:$0xf]  ;;  %v3280_v57 = vor.u32 %v3783_v49, %v3277_v51  ;;  %v3638_v49 = vld [vmem:[%s4153_s9 + $0xf4] sm:$0xf0] }
  0x8f   : > { %2075 = vmatpush.bf16.msrb.mxu1 %v3312_v29  ;;  %v3533_v55 = vld [vmem:[%s4153_s9 + $0x790] sm:$0xf0]  ;;  %v3408_v59 = vor.u32 %v3815_v52, %v3405_v53  ;;  %v3747_v60 = vld [vmem:[%s4153_s9 + $0x464] sm:$0xf]  ;;  %v3670_v52 = vld [vmem:[%s4153_s9 + $0x1f4] sm:$0xf0] }
  0x90   : > { %2089 = vmatpush.bf16.msrb.mxu2 %v3440_v30  ;;  %v3133_v61 = vld [vmem:[%s4153_s9 + $0x470] sm:$0xf0]  ;;  %v3779_v62 = vld [vmem:[%s4153_s9 + $0x564] sm:$0xf]  ;;  %v3536_v63 = vor.u32 %v3847_v54, %v3533_v55  ;;  %v2947_v53 = vld [vmem:[%s4153_s9 + $0x2e8] sm:$0xf] }
  0x91   : > { %2103 = vmatpush.bf16.msrb.mxu3 %v3568_v34  ;;  %v3261_v0 = vld [vmem:[%s4153_s9 + $0x570] sm:$0xf0]  ;;  %v3811_v2 = vld [vmem:[%s4153_s9 + $0x664] sm:$0xf]  ;;  %v3136_v6 = vor.u32 %v3747_v60, %v3133_v61  ;;  %v3702_v54 = vld [vmem:[%s4153_s9 + $0x2f4] sm:$0xf0]  ;;  %v2692_v61 = vor.u32 %v3638_v49, %v2691_v48 }
  0x92   : > { %2062 = vmatpush.bf16.msrb.mxu0 %v3168_v41  ;;  %v3389_v3 = vld [vmem:[%s4153_s9 + $0x670] sm:$0xf0]  ;;  %v3843_v4 = vld [vmem:[%s4153_s9 + $0x764] sm:$0xf]  ;;  %v3264_v7 = vor.u32 %v3779_v62, %v3261_v0  ;;  %v2675_v0 = vld [vmem:[%s4153_s9 + $0xc8] sm:$0xf] }
  0x93   : > { %2076 = vmatpush.bf16.msrb.mxu1 %v3296_v42  ;;  %v3517_v5 = vld [vmem:[%s4153_s9 + $0x770] sm:$0xf0]  ;;  %v3392_v8 = vor.u32 %v3811_v2, %v3389_v3  ;;  %v3743_v9 = vld [vmem:[%s4153_s9 + $0x444] sm:$0xf]  ;;  %v3634_v2 = vld [vmem:[%s4153_s9 + $0xd4] sm:$0xf0] }
  0x94   : > { %2090 = vmatpush.bf16.msrb.mxu2 %v3424_v45  ;;  %v3117_v11 = vld [vmem:[%s4153_s9 + $0x450] sm:$0xf0]  ;;  %v3775_v12 = vld [vmem:[%s4153_s9 + $0x544] sm:$0xf]  ;;  %v3520_v13 = vor.u32 %v3843_v4, %v3517_v5  ;;  %v2803_v3 = vld [vmem:[%s4153_s9 + $0x1c8] sm:$0xf] }
  0x95   : > { %2104 = vmatpush.bf16.msrb.mxu3 %v3552_v50  ;;  %v3245_v14 = vld [vmem:[%s4153_s9 + $0x550] sm:$0xf0]  ;;  %v3807_v15 = vld [vmem:[%s4153_s9 + $0x644] sm:$0xf]  ;;  %v3120_v20 = vor.u32 %v3743_v9, %v3117_v11  ;;  %v2819_v50 = vld [vmem:[%s4153_s9 + $0x1e8] sm:$0xf]  ;;  %v2676_v11 = vor.u32 %v3634_v2, %v2675_v0 }
  0x96   : > { %2063 = vmatpush.bf16.msrb.mxu0 %v3152_v56  ;;  %v3373_v16 = vld [vmem:[%s4153_s9 + $0x650] sm:$0xf0]  ;;  %v3839_v18 = vld [vmem:[%s4153_s9 + $0x744] sm:$0xf]  ;;  %v3248_v21 = vor.u32 %v3775_v12, %v3245_v14  ;;  %v2820_v62 = vor.u32 %v3670_v52, %v2819_v50  ;;  %v3666_v5 = vld [vmem:[%s4153_s9 + $0x1d4] sm:$0xf0] }
  0x97   : > { %2077 = vmatpush.bf16.msrb.mxu1 %v3280_v57  ;;  %v3501_v19 = vld [vmem:[%s4153_s9 + $0x750] sm:$0xf0]  ;;  %v3376_v22 = vor.u32 %v3807_v15, %v3373_v16  ;;  %v3739_v23 = vld [vmem:[%s4153_s9 + $0x424] sm:$0xf]  ;;  %v3075_v57 = vld [vmem:[%s4153_s9 + $0x3e8] sm:$0xf]  ;;  %v2804_v12 = vor.u32 %v3666_v5, %v2803_v3 }
  0x98   : > { %2091 = vmatpush.bf16.msrb.mxu2 %v3408_v59  ;;  %v3101_v24 = vld [vmem:[%s4153_s9 + $0x430] sm:$0xf0]  ;;  %v3771_v25 = vld [vmem:[%s4153_s9 + $0x524] sm:$0xf]  ;;  %v3504_v26 = vor.u32 %v3839_v18, %v3501_v19  ;;  %v3734_v59 = vld [vmem:[%s4153_s9 + $0x3f4] sm:$0xf0] }
  0x99   : > { %2105 = vmatpush.bf16.msrb.mxu3 %v3536_v63  ;;  %v3229_v27 = vld [vmem:[%s4153_s9 + $0x530] sm:$0xf0]  ;;  %v3803_v28 = vld [vmem:[%s4153_s9 + $0x624] sm:$0xf]  ;;  %v3104_v32 = vor.u32 %v3739_v23, %v3101_v24  ;;  %v2948_v63 = vor.u32 %v3702_v54, %v2947_v53  ;;  %v3076_v4 = vor.u32 %v3734_v59, %v3075_v57  ;;  %v3730_v9 = vld [vmem:[%s4153_s9 + $0x3d4] sm:$0xf0] }
  0x9a   : > { %2064 = vmatpush.bf16.msrb.mxu0 %v3136_v6  ;;  %v3357_v29 = vld [vmem:[%s4153_s9 + $0x630] sm:$0xf0]  ;;  %v3835_v30 = vld [vmem:[%s4153_s9 + $0x724] sm:$0xf]  ;;  %v3232_v35 = vor.u32 %v3771_v25, %v3229_v27  ;;  %v2931_v6 = vld [vmem:[%s4153_s9 + $0x2c8] sm:$0xf] }
  0x9b   : > { %2078 = vmatpush.bf16.msrb.mxu1 %v3264_v7  ;;  %v3485_v31 = vld [vmem:[%s4153_s9 + $0x730] sm:$0xf0]  ;;  %v3735_v33 = vld [vmem:[%s4153_s9 + $0x404] sm:$0xf]  ;;  %v3360_v36 = vor.u32 %v3803_v28, %v3357_v29  ;;  %v3698_v7 = vld [vmem:[%s4153_s9 + $0x2d4] sm:$0xf0] }
  0x9c   : > { %2092 = vmatpush.bf16.msrb.mxu2 %v3392_v8  ;;  %v3085_v34 = vld [vmem:[%s4153_s9 + $0x410] sm:$0xf0]  ;;  %v3767_v37 = vld [vmem:[%s4153_s9 + $0x504] sm:$0xf]  ;;  %v3488_v41 = vor.u32 %v3835_v30, %v3485_v31  ;;  %v3059_v8 = vld [vmem:[%s4153_s9 + $0x3c8] sm:$0xf] }
  0x9d   : > { %2106 = vmatpush.bf16.msrb.mxu3 %v3520_v13  ;;  %v3213_v38 = vld [vmem:[%s4153_s9 + $0x510] sm:$0xf0]  ;;  %v3799_v40 = vld [vmem:[%s4153_s9 + $0x604] sm:$0xf]  ;;  %v3088_v51 = vor.u32 %v3735_v33, %v3085_v34  ;;  %v2932_v13 = vor.u32 %v3698_v7, %v2931_v6  ;;  %v2659_v14 = vld [vmem:[%s4153_s9 + $0xa8] sm:$0xf]  ;;  %v3060_v18 = vor.u32 %v3730_v9, %v3059_v8 }
  0x9e   : > { %2065 = vmatpush.bf16.msrb.mxu0 %v3120_v20  ;;  %v3341_v42 = vld [vmem:[%s4153_s9 + $0x610] sm:$0xf0]  ;;  %v3831_v45 = vld [vmem:[%s4153_s9 + $0x704] sm:$0xf]  ;;  %v3216_v55 = vor.u32 %v3767_v37, %v3213_v38  ;;  %v3630_v15 = vld [vmem:[%s4153_s9 + $0xb4] sm:$0xf0] }
  0x9f   : > { %2079 = vmatpush.bf16.msrb.mxu1 %v3248_v21  ;;  %v3469_v46 = vld [vmem:[%s4153_s9 + $0x710] sm:$0xf0]  ;;  %v3344_v56 = vor.u32 %v3799_v40, %v3341_v42  ;;  %v2787_v16 = vld [vmem:[%s4153_s9 + $0x1a8] sm:$0xf]  ;;  %v3662_v19 = vld [vmem:[%s4153_s9 + $0x1b4] sm:$0xf0]  ;;  %v2660_v24 = vor.u32 %v3630_v15, %v2659_v14 }
  0xa0   : > { %2093 = vmatpush.bf16.msrb.mxu2 %v3376_v22  ;;  %v3472_v60 = vor.u32 %v3831_v45, %v3469_v46  ;;  %v2915_v20 = vld [vmem:[%s4153_s9 + $0x2a8] sm:$0xf]  ;;  %v3694_v21 = vld [vmem:[%s4153_s9 + $0x2b4] sm:$0xf0]  ;;  %v2788_v25 = vor.u32 %v3662_v19, %v2787_v16 }
  0xa1   : > { %2107 = vmatpush.bf16.msrb.mxu3 %v3504_v26  ;;  %v3043_v22 = vld [vmem:[%s4153_s9 + $0x3a8] sm:$0xf]  ;;  %v3726_v23 = vld [vmem:[%s4153_s9 + $0x3b4] sm:$0xf0]  ;;  %v2916_v26 = vor.u32 %v3694_v21, %v2915_v20 }
  0xa2   : > { %2066 = vmatpush.bf16.msrb.mxu0 %v3104_v32  ;;  %v2643_v27 = vld [vmem:[%s4153_s9 + $0x88] sm:$0xf]  ;;  %v3626_v28 = vld [vmem:[%s4153_s9 + $0x94] sm:$0xf0]  ;;  %v3044_v30 = vor.u32 %v3726_v23, %v3043_v22 }
  0xa3   : > { %2080 = vmatpush.bf16.msrb.mxu1 %v3232_v35  ;;  %v2771_v29 = vld [vmem:[%s4153_s9 + $0x188] sm:$0xf]  ;;  %v3658_v31 = vld [vmem:[%s4153_s9 + $0x194] sm:$0xf0] }
  0xa4   : > { %2094 = vmatpush.bf16.msrb.mxu2 %v3360_v36  ;;  %v2899_v32 = vld [vmem:[%s4153_s9 + $0x288] sm:$0xf]  ;;  %v3690_v33 = vld [vmem:[%s4153_s9 + $0x294] sm:$0xf0]  ;;  %v2644_v36 = vor.u32 %v3626_v28, %v2643_v27  ;;  %v2772_v37 = vor.u32 %v3658_v31, %v2771_v29 }
  0xa5   : > { %2108 = vmatpush.bf16.msrb.mxu3 %v3488_v41  ;;  %v3027_v34 = vld [vmem:[%s4153_s9 + $0x388] sm:$0xf]  ;;  %v3722_v35 = vld [vmem:[%s4153_s9 + $0x394] sm:$0xf0]  ;;  %v2900_v38 = vor.u32 %v3690_v33, %v2899_v32 }
  0xa6   : > { %2067 = vmatpush.bf16.msrb.mxu0 %v3088_v51  ;;  %v2627_v40 = vld [vmem:[%s4153_s9 + $0x68] sm:$0xf]  ;;  %v3622_v41 = vld [vmem:[%s4153_s9 + $0x74] sm:$0xf0]  ;;  %v3028_v45 = vor.u32 %v3722_v35, %v3027_v34 }
  0xa7   : > { %2081 = vmatpush.bf16.msrb.mxu1 %v3216_v55  ;;  %v2755_v42 = vld [vmem:[%s4153_s9 + $0x168] sm:$0xf]  ;;  %v3654_v46 = vld [vmem:[%s4153_s9 + $0x174] sm:$0xf0]  ;;  %v2628_v52 = vor.u32 %v3622_v41, %v2627_v40 }
  0xa8   : > { %2095 = vmatpush.bf16.msrb.mxu2 %v3344_v56  ;;  %v2883_v48 = vld [vmem:[%s4153_s9 + $0x268] sm:$0xf]  ;;  %v3686_v49 = vld [vmem:[%s4153_s9 + $0x274] sm:$0xf0]  ;;  %v2756_v53 = vor.u32 %v3654_v46, %v2755_v42 }
  0xa9   : > { %2109 = vmatpush.bf16.msrb.mxu3 %v3472_v60  ;;  %2068 = vmatmul.bf16.vlgmr.msrb.gmra.mxu0 %v4366_v39  ;;  %v3011_v50 = vld [vmem:[%s4153_s9 + $0x368] sm:$0xf]  ;;  %v3718_v51 = vld [vmem:[%s4153_s9 + $0x374] sm:$0xf0]  ;;  %v2884_v54 = vor.u32 %v3686_v49, %v2883_v48 }
  0xaa   : > { %2116 = vmatpush.bf16.msra.mxu0 %v2692_v61  ;;  %2082 = vmatmul.bf16.vlgmr.msrb.gmra.mxu1 %v4373_v44  ;;  %v2611_v55 = vld [vmem:[%s4153_s9 + $0x48] sm:$0xf]  ;;  %v3618_v56 = vld [vmem:[%s4153_s9 + $0x54] sm:$0xf0]  ;;  %v3012_v59 = vor.u32 %v3718_v51, %v3011_v50 }
  0xab   : > { %2130 = vmatpush.bf16.msra.mxu1 %v2820_v62  ;;  %2096 = vmatmul.bf16.vlgmr.msrb.gmra.mxu2 %v4371_v43  ;;  %v2739_v57 = vld [vmem:[%s4153_s9 + $0x148] sm:$0xf]  ;;  %v3650_v60 = vld [vmem:[%s4153_s9 + $0x154] sm:$0xf0]  ;;  %v2612_v2 = vor.u32 %v3618_v56, %v2611_v55 }
  0xac   : > { %2144 = vmatpush.bf16.msra.mxu2 %v2948_v63  ;;  %2110 = vmatmul.bf16.vlgmr.msrb.gmra.mxu3 %v4377_v47  ;;  %v2867_v61 = vld [vmem:[%s4153_s9 + $0x248] sm:$0xf]  ;;  %v3682_v62 = vld [vmem:[%s4153_s9 + $0x254] sm:$0xf0]  ;;  %v2740_v3 = vor.u32 %v3650_v60, %v2739_v57 }
  0xad   : > { %2158 = vmatpush.bf16.msra.mxu3 %v3076_v4  ;;  %v2995_v63 = vld [vmem:[%s4153_s9 + $0x348] sm:$0xf]  ;;  %v3714_v0 = vld [vmem:[%s4153_s9 + $0x354] sm:$0xf0]  ;;  %v2868_v4 = vor.u32 %v3682_v62, %v2867_v61 }
  0xae   : > { %2117 = vmatpush.bf16.msra.mxu0 %v2676_v11  ;;  %v2595_v5 = vld [vmem:[%s4153_s9 + $0x28] sm:$0xf]  ;;  %v3614_v6 = vld [vmem:[%s4153_s9 + $0x34] sm:$0xf0]  ;;  %v2996_v8 = vor.u32 %v3714_v0, %v2995_v63 }
  0xaf   : > { %2131 = vmatpush.bf16.msra.mxu1 %v2804_v12  ;;  %v2723_v7 = vld [vmem:[%s4153_s9 + $0x128] sm:$0xf]  ;;  %v3646_v9 = vld [vmem:[%s4153_s9 + $0x134] sm:$0xf0]  ;;  %v2596_v15 = vor.u32 %v3614_v6, %v2595_v5 }
  0xb0   : > { %2145 = vmatpush.bf16.msra.mxu2 %v2932_v13  ;;  %v2851_v11 = vld [vmem:[%s4153_s9 + $0x228] sm:$0xf]  ;;  %v3678_v12 = vld [vmem:[%s4153_s9 + $0x234] sm:$0xf0]  ;;  %v2724_v19 = vor.u32 %v3646_v9, %v2723_v7 }
  0xb1   : > { %2159 = vmatpush.bf16.msra.mxu3 %v3060_v18  ;;  %v2979_v13 = vld [vmem:[%s4153_s9 + $0x328] sm:$0xf]  ;;  %v3710_v14 = vld [vmem:[%s4153_s9 + $0x334] sm:$0xf0]  ;;  %v2852_v20 = vor.u32 %v3678_v12, %v2851_v11 }
  0xb2   : > { %2118 = vmatpush.bf16.msra.mxu0 %v2660_v24  ;;  %v2579_v16 = vld [vmem:[%s4153_s9 + $0x8] sm:$0xf]  ;;  %v3610_v18 = vld [vmem:[%s4153_s9 + $0x14] sm:$0xf0]  ;;  %v2980_v24 = vor.u32 %v3710_v14, %v2979_v13 }
  0xb3   : > { %2132 = vmatpush.bf16.msra.mxu1 %v2788_v25  ;;  %v2707_v21 = vld [vmem:[%s4153_s9 + $0x108] sm:$0xf]  ;;  %v3642_v22 = vld [vmem:[%s4153_s9 + $0x114] sm:$0xf0]  ;;  %v2580_v31 = vor.u32 %v3610_v18, %v2579_v16 }
  0xb4   : > { %2146 = vmatpush.bf16.msra.mxu2 %v2916_v26  ;;  %v2835_v23 = vld [vmem:[%s4153_s9 + $0x208] sm:$0xf]  ;;  %v3674_v25 = vld [vmem:[%s4153_s9 + $0x214] sm:$0xf0]  ;;  %v2708_v35 = vor.u32 %v3642_v22, %v2707_v21 }
  0xb5   : > { %2160 = vmatpush.bf16.msra.mxu3 %v3044_v30  ;;  %v2963_v26 = vld [vmem:[%s4153_s9 + $0x308] sm:$0xf]  ;;  %v3706_v27 = vld [vmem:[%s4153_s9 + $0x314] sm:$0xf0] }
  0xb6   : > { %2119 = vmatpush.bf16.msra.mxu0 %v2644_v36  ;;  %v3203_v28 = vld [vmem:[%s4153_s9 + $0x4e8] sm:$0xf]  ;;  %v3766_v29 = vld [vmem:[%s4153_s9 + $0x4f4] sm:$0xf0]  ;;  %v2836_v36 = vor.u32 %v3674_v25, %v2835_v23  ;;  %v2964_v40 = vor.u32 %v3706_v27, %v2963_v26 }
  0xb7   : > { %2133 = vmatpush.bf16.msra.mxu1 %v2772_v37  ;;  %v3331_v30 = vld [vmem:[%s4153_s9 + $0x5e8] sm:$0xf]  ;;  %v3798_v32 = vld [vmem:[%s4153_s9 + $0x5f4] sm:$0xf0]  ;;  %v3204_v41 = vor.u32 %v3766_v29, %v3203_v28 }
  0xb8   : > { %2147 = vmatpush.bf16.msra.mxu2 %v2900_v38  ;;  %v3459_v33 = vld [vmem:[%s4153_s9 + $0x6e8] sm:$0xf]  ;;  %v3830_v34 = vld [vmem:[%s4153_s9 + $0x6f4] sm:$0xf0]  ;;  %v3332_v42 = vor.u32 %v3798_v32, %v3331_v30 }
  0xb9   : > { %2161 = vmatpush.bf16.msra.mxu3 %v3028_v45  ;;  %v3587_v37 = vld [vmem:[%s4153_s9 + $0x7e8] sm:$0xf]  ;;  %v3862_v38 = vld [vmem:[%s4153_s9 + $0x7f4] sm:$0xf0]  ;;  %v3460_v45 = vor.u32 %v3830_v34, %v3459_v33 }
  0xba   : > { %2120 = vmatpush.bf16.msra.mxu0 %v2628_v52  ;;  %v3187_v46 = vld [vmem:[%s4153_s9 + $0x4c8] sm:$0xf]  ;;  %v3762_v48 = vld [vmem:[%s4153_s9 + $0x4d4] sm:$0xf0]  ;;  %v3588_v50 = vor.u32 %v3862_v38, %v3587_v37 }
  0xbb   : > { %2134 = vmatpush.bf16.msra.mxu1 %v2756_v53  ;;  %v3315_v49 = vld [vmem:[%s4153_s9 + $0x5c8] sm:$0xf]  ;;  %v3794_v51 = vld [vmem:[%s4153_s9 + $0x5d4] sm:$0xf0]  ;;  %v3188_v56 = vor.u32 %v3762_v48, %v3187_v46 }
  0xbc   : > { %2148 = vmatpush.bf16.msra.mxu2 %v2884_v54  ;;  %v3443_v52 = vld [vmem:[%s4153_s9 + $0x6c8] sm:$0xf]  ;;  %v3826_v53 = vld [vmem:[%s4153_s9 + $0x6d4] sm:$0xf0]  ;;  %v3316_v57 = vor.u32 %v3794_v51, %v3315_v49 }
  0xbd   : > { %2162 = vmatpush.bf16.msra.mxu3 %v3012_v59  ;;  %v3571_v54 = vld [vmem:[%s4153_s9 + $0x7c8] sm:$0xf]  ;;  %v3858_v55 = vld [vmem:[%s4153_s9 + $0x7d4] sm:$0xf0]  ;;  %v3444_v59 = vor.u32 %v3826_v53, %v3443_v52 }
  0xbe   : > { %2121 = vmatpush.bf16.msra.mxu0 %v2612_v2  ;;  %v3171_v60 = vld [vmem:[%s4153_s9 + $0x4a8] sm:$0xf]  ;;  %v3758_v61 = vld [vmem:[%s4153_s9 + $0x4b4] sm:$0xf0]  ;;  %v3572_v63 = vor.u32 %v3858_v55, %v3571_v54 }
  0xbf   : > { %2135 = vmatpush.bf16.msra.mxu1 %v2740_v3  ;;  %v3299_v62 = vld [vmem:[%s4153_s9 + $0x5a8] sm:$0xf]  ;;  %v3790_v0 = vld [vmem:[%s4153_s9 + $0x5b4] sm:$0xf0]  ;;  %v3172_v6 = vor.u32 %v3758_v61, %v3171_v60 }
  0xc0   : > { %2149 = vmatpush.bf16.msra.mxu2 %v2868_v4  ;;  %v3427_v2 = vld [vmem:[%s4153_s9 + $0x6a8] sm:$0xf]  ;;  %v3822_v3 = vld [vmem:[%s4153_s9 + $0x6b4] sm:$0xf0]  ;;  %v3300_v7 = vor.u32 %v3790_v0, %v3299_v62 }
  0xc1   : > { %2163 = vmatpush.bf16.msra.mxu3 %v2996_v8  ;;  %v3555_v4 = vld [vmem:[%s4153_s9 + $0x7a8] sm:$0xf]  ;;  %v3854_v5 = vld [vmem:[%s4153_s9 + $0x7b4] sm:$0xf0]  ;;  %v3428_v8 = vor.u32 %v3822_v3, %v3427_v2 }
  0xc2   : > { %2122 = vmatpush.bf16.msra.mxu0 %v2596_v15  ;;  %v3155_v9 = vld [vmem:[%s4153_s9 + $0x488] sm:$0xf]  ;;  %v3754_v11 = vld [vmem:[%s4153_s9 + $0x494] sm:$0xf0]  ;;  %v3556_v13 = vor.u32 %v3854_v5, %v3555_v4 }
  0xc3   : > { %2136 = vmatpush.bf16.msra.mxu1 %v2724_v19  ;;  %v3283_v12 = vld [vmem:[%s4153_s9 + $0x588] sm:$0xf]  ;;  %v3786_v14 = vld [vmem:[%s4153_s9 + $0x594] sm:$0xf0] }
  0xc4   : > { %2150 = vmatpush.bf16.msra.mxu2 %v2852_v20  ;;  %v3411_v15 = vld [vmem:[%s4153_s9 + $0x688] sm:$0xf]  ;;  %v3818_v16 = vld [vmem:[%s4153_s9 + $0x694] sm:$0xf0]  ;;  %v3156_v20 = vor.u32 %v3754_v11, %v3155_v9  ;;  %v3284_v21 = vor.u32 %v3786_v14, %v3283_v12 }
  0xc5   : > { %2164 = vmatpush.bf16.msra.mxu3 %v2980_v24  ;;  %v3539_v18 = vld [vmem:[%s4153_s9 + $0x788] sm:$0xf]  ;;  %v3850_v19 = vld [vmem:[%s4153_s9 + $0x794] sm:$0xf0]  ;;  %v3412_v22 = vor.u32 %v3818_v16, %v3411_v15  ;;  %v1915_v62 = vpop.f32.mrf.mxu1  ;;  %v3636_v16 = vld [vmem:[%s4153_s9 + $0xec] sm:$0xf] }
  0xc6   : > { %2123 = vmatpush.bf16.msra.mxu0 %v2580_v31  ;;  %v3139_v23 = vld [vmem:[%s4153_s9 + $0x468] sm:$0xf]  ;;  %v3750_v24 = vld [vmem:[%s4153_s9 + $0x474] sm:$0xf0]  ;;  %v3540_v26 = vor.u32 %v3850_v19, %v3539_v18  ;;  %v2693_v18 = vld [vmem:[%s4153_s9 + $0xf8] sm:$0xf0] }
  0xc7   : > { %2137 = vmatpush.bf16.msra.mxu1 %v2708_v35  ;;  %v3267_v25 = vld [vmem:[%s4153_s9 + $0x568] sm:$0xf]  ;;  %v3782_v27 = vld [vmem:[%s4153_s9 + $0x574] sm:$0xf0]  ;;  %v3140_v32 = vor.u32 %v3750_v24, %v3139_v23  ;;  %v3668_v19 = vld [vmem:[%s4153_s9 + $0x1ec] sm:$0xf] }
  0xc8   : > { %2151 = vmatpush.bf16.msra.mxu2 %v2836_v36  ;;  %v3395_v28 = vld [vmem:[%s4153_s9 + $0x668] sm:$0xf]  ;;  %v3814_v29 = vld [vmem:[%s4153_s9 + $0x674] sm:$0xf0]  ;;  %v3268_v34 = vor.u32 %v3782_v27, %v3267_v25  ;;  %v2949_v23 = vld [vmem:[%s4153_s9 + $0x2f8] sm:$0xf0] }
  0xc9   : > { %2165 = vmatpush.bf16.msra.mxu3 %v2964_v40  ;;  %2124 = vmatmul.bf16.vlgmr.msra.gmra.mxu0 %v4258_v58  ;;  %v3523_v30 = vld [vmem:[%s4153_s9 + $0x768] sm:$0xf]  ;;  %v3846_v31 = vld [vmem:[%s4153_s9 + $0x774] sm:$0xf0]  ;;  %v3396_v35 = vor.u32 %v3814_v29, %v3395_v28  ;;  %v3732_v27 = vld [vmem:[%s4153_s9 + $0x3ec] sm:$0xf] }
  0xca   : > { %2172 = vmatpush.bf16.msrb.mxu0 %v3204_v41  ;;  %2138 = vmatmul.bf16.vlgmr.msra.gmra.mxu1 %v4282_v10  ;;  %v3123_v33 = vld [vmem:[%s4153_s9 + $0x448] sm:$0xf]  ;;  %v3746_v36 = vld [vmem:[%s4153_s9 + $0x454] sm:$0xf0]  ;;  %v3524_v40 = vor.u32 %v3846_v31, %v3523_v30  ;;  %v3077_v28 = vld [vmem:[%s4153_s9 + $0x3f8] sm:$0xf0] }
  0xcb   : > { %2186 = vmatpush.bf16.msrb.mxu1 %v3332_v42  ;;  %2152 = vmatmul.bf16.vlgmr.msra.gmra.mxu2 %v4266_v1  ;;  %v3251_v37 = vld [vmem:[%s4153_s9 + $0x548] sm:$0xf]  ;;  %v3778_v38 = vld [vmem:[%s4153_s9 + $0x554] sm:$0xf0]  ;;  %v3124_v49 = vor.u32 %v3746_v36, %v3123_v33  ;;  %v3632_v36 = vld [vmem:[%s4153_s9 + $0xcc] sm:$0xf] }
  0xcc   : > { %2200 = vmatpush.bf16.msrb.mxu2 %v3460_v45  ;;  %2166 = vmatmul.bf16.vlgmr.msra.gmra.mxu3 %v4290_v17  ;;  %v3379_v41 = vld [vmem:[%s4153_s9 + $0x648] sm:$0xf]  ;;  %v3810_v42 = vld [vmem:[%s4153_s9 + $0x654] sm:$0xf0]  ;;  %v4618_v45 = vld [vmem:[%s4161_s10] sm:$0xf]  ;;  %v3252_v51 = vor.u32 %v3778_v38, %v3251_v37  ;;  %v1929_v24 = vpop.f32.mrf.mxu2 }
  0xcd   : > { %2214 = vmatpush.bf16.msrb.mxu3 %v3588_v50  ;;  %v3507_v46 = vld [vmem:[%s4153_s9 + $0x748] sm:$0xf]  ;;  %v3842_v48 = vld [vmem:[%s4153_s9 + $0x754] sm:$0xf0]  ;;  %v3380_v52 = vor.u32 %v3810_v42, %v3379_v41  ;;  %v564_v53 = vperm.slane %v4618_v45, 0  ;;  %v1943_v29 = vpop.f32.mrf.mxu3  ;;  %s2536_s10 = sshll.u32 %s4149_s5, 6 }
  0xce   : > { %2173 = vmatpush.bf16.msrb.mxu0 %v3188_v56  ;;  %v3107_v50 = vld [vmem:[%s4153_s9 + $0x428] sm:$0xf]  ;;  %v1901_v54 = vpop.f32.mrf.mxu0  ;;  %v3742_v55 = vld [vmem:[%s4153_s9 + $0x434] sm:$0xf0]  ;;  %v2677_v37 = vld [vmem:[%s4153_s9 + $0xd8] sm:$0xf0] }
  0xcf   : > { %2187 = vmatpush.bf16.msrb.mxu1 %v3316_v57  ;;  %v3235_v56 = vld [vmem:[%s4153_s9 + $0x528] sm:$0xf]  ;;  %v3508_v57 = vor.u32 %v3842_v48, %v3507_v46  ;;  %v3806_v61 = vld [vmem:[%s4153_s9 + $0x634] sm:$0xf0]  ;;  %v3108_v2 = vor.u32 %v3742_v55, %v3107_v50  ;;  %v1902_v11 = vadd.f32 %v1901_v54, %v564_v53  ;;  %v3664_v38 = vld [vmem:[%s4153_s9 + $0x1cc] sm:$0xf]  ;;  %v1917_v48 = vpop.f32.mrf.mxu1 }
  0xd0   : > { %2201 = vmatpush.bf16.msrb.mxu2 %v3444_v59  ;;  %v3774_v59 = vld [vmem:[%s4153_s9 + $0x534] sm:$0xf0]  ;;  %v3363_v60 = vld [vmem:[%s4153_s9 + $0x628] sm:$0xf]  ;;  %v2805_v41 = vld [vmem:[%s4153_s9 + $0x1d8] sm:$0xf0] }
  0xd1   : > { %2215 = vmatpush.bf16.msrb.mxu3 %v3572_v63  ;;  %v3491_v63 = vld [vmem:[%s4153_s9 + $0x728] sm:$0xf]  ;;  %v3838_v0 = vld [vmem:[%s4153_s9 + $0x734] sm:$0xf0]  ;;  %v3236_v5 = vor.u32 %v3774_v59, %v3235_v56  ;;  %v1916_v30 = vadd.f32 %v1915_v62, %v1902_v11  ;;  %v3696_v42 = vld [vmem:[%s4153_s9 + $0x2cc] sm:$0xf]  ;;  %v2808_v55 = vor.u32 %v3664_v38, %v2805_v41 }
  0xd2   : > { %2174 = vmatpush.bf16.msrb.mxu0 %v3172_v6  ;;  %v3091_v3 = vld [vmem:[%s4153_s9 + $0x408] sm:$0xf]  ;;  %v3738_v4 = vld [vmem:[%s4153_s9 + $0x414] sm:$0xf0]  ;;  %v3364_v6 = vor.u32 %v3806_v61, %v3363_v60  ;;  %v3492_v12 = vor.u32 %v3838_v0, %v3491_v63  ;;  %v2933_v46 = vld [vmem:[%s4153_s9 + $0x2d8] sm:$0xf0] }
  0xd3   : > { %2188 = vmatpush.bf16.msrb.mxu1 %v3300_v7  ;;  %v3219_v7 = vld [vmem:[%s4153_s9 + $0x508] sm:$0xf]  ;;  %v3834_v15 = vld [vmem:[%s4153_s9 + $0x714] sm:$0xf0]  ;;  %v3061_v50 = vld [vmem:[%s4153_s9 + $0x3d8] sm:$0xf0]  ;;  %v2936_v56 = vor.u32 %v3696_v42, %v2933_v46 }
  0xd4   : > { %2202 = vmatpush.bf16.msrb.mxu2 %v3428_v8  ;;  %v3770_v8 = vld [vmem:[%s4153_s9 + $0x514] sm:$0xf0]  ;;  %v3347_v9 = vld [vmem:[%s4153_s9 + $0x608] sm:$0xf]  ;;  %v2661_v59 = vld [vmem:[%s4153_s9 + $0xb8] sm:$0xf0] }
  0xd5   : > { %2216 = vmatpush.bf16.msrb.mxu3 %v3556_v13  ;;  %v3802_v13 = vld [vmem:[%s4153_s9 + $0x614] sm:$0xf0]  ;;  %v3475_v14 = vld [vmem:[%s4153_s9 + $0x708] sm:$0xf]  ;;  %v3220_v25 = vor.u32 %v3770_v8, %v3219_v7  ;;  %v3660_v60 = vld [vmem:[%s4153_s9 + $0x1ac] sm:$0xf] }
  0xd6   : > { %2175 = vmatpush.bf16.msrb.mxu0 %v3156_v20  ;;  %v3092_v20 = vor.u32 %v3738_v4, %v3091_v3  ;;  %v3476_v31 = vor.u32 %v3834_v15, %v3475_v14  ;;  %v2789_v62 = vld [vmem:[%s4153_s9 + $0x1b8] sm:$0xf0]  ;;  %v3692_v63 = vld [vmem:[%s4153_s9 + $0x2ac] sm:$0xf]  ;;  %s4708_s23 = scalar_lea.vmem [#allocation6], %s2536_s10  ;;  %s3863_s5 = sshll.u32 (%p4116_p9), %s4033_s15, 5 }
  0xd7   : > { %2189 = vmatpush.bf16.msrb.mxu1 %v3284_v21  ;;  %v2821_v21 = vld [vmem:[%s4153_s9 + $0x1f8] sm:$0xf0]  ;;  %v2792_v7 = vor.u32 %v3660_v60, %v2789_v62  ;;  %v3624_v11 = vld [vmem:[%s4153_s9 + $0x8c] sm:$0xf]  ;;  %s2368_s12 = scalar_lea.vmem (%p4116_p9), %s4834_s3, %s3863_s5 }
  0xd8   : > { %2203 = vmatpush.bf16.msrb.mxu2 %v3412_v22  ;;  %v3700_v22 = vld [vmem:[%s4153_s9 + $0x2ec] sm:$0xf]  ;;  %v2824_v33 = vor.u32 %v3668_v19, %v2821_v21  ;;  %v2917_v0 = vld [vmem:[%s4153_s9 + $0x2b8] sm:$0xf0] }
  0xd9   : > { %2217 = vmatpush.bf16.msrb.mxu3 %v3540_v26  ;;  %v3348_v26 = vor.u32 %v3802_v13, %v3347_v9  ;;  %v2920_v8 = vor.u32 %v3692_v63, %v2917_v0  ;;  %v1945_v9 = vpop.f32.mrf.mxu3  ;;  %v3656_v13 = vld [vmem:[%s4153_s9 + $0x18c] sm:$0xf]  ;;  %v2773_v15 = vld [vmem:[%s4153_s9 + $0x198] sm:$0xf0] }
  0xda   : > { %2176 = vmatpush.bf16.msrb.mxu0 %v3140_v32  ;;  %v2696_v32 = vor.u32 %v3636_v16, %v2693_v18  ;;  %v3688_v16 = vld [vmem:[%s4153_s9 + $0x28c] sm:$0xf]  ;;  %v2901_v18 = vld [vmem:[%s4153_s9 + $0x298] sm:$0xf0] }
  0xdb   : > { %2190 = vmatpush.bf16.msrb.mxu1 %v3268_v34  ;;  %v2952_v34 = vor.u32 %v3700_v22, %v2949_v23  ;;  %v3029_v21 = vld [vmem:[%s4153_s9 + $0x398] sm:$0xf0]  ;;  %v3712_v60 = vld [vmem:[%s4153_s9 + $0x34c] sm:$0xf] }
  0xdc   : > { %2204 = vmatpush.bf16.msrb.mxu2 %v3396_v35  ;;  %v1903_v35 = vpop.f32.mrf.mxu0 }
  0xdd   : > { %2218 = vmatpush.bf16.msrb.mxu3 %v3524_v40  ;;  %v3080_v40 = vor.u32 %v3732_v27, %v3077_v28  ;;  %v1904_v54 = vadd.f32 %v1903_v35, %v564_v53  ;;  %v3724_v53 = vld [vmem:[%s4153_s9 + $0x3ac] sm:$0xf]  ;;  %v2904_v27 = vor.u32 %v3688_v16, %v2901_v18  ;;  %v2581_v18 = vld [vmem:[%s4153_s9 + $0x18] sm:$0xf0] }
  0xde   : > { %2177 = vmatpush.bf16.msrb.mxu0 %v3124_v49  ;;  %v3728_v49 = vld [vmem:[%s4153_s9 + $0x3cc] sm:$0xf] }
  0xdf   : > { %2191 = vmatpush.bf16.msrb.mxu1 %v3252_v51  ;;  %v1930_v51 = vadd.f32 %v1929_v24, %v1916_v30  ;;  %v3064_v61 = vor.u32 %v3728_v49, %v3061_v50  ;;  %v3620_v28 = vld [vmem:[%s4153_s9 + $0x6c] sm:$0xf]  ;;  %v2741_v50 = vld [vmem:[%s4153_s9 + $0x158] sm:$0xf0] }
  0xe0   : > { %2205 = vmatpush.bf16.msrb.mxu2 %v3380_v52  ;;  %v2680_v52 = vor.u32 %v3632_v36, %v2677_v37  ;;  %v3652_v30 = vld [vmem:[%s4153_s9 + $0x16c] sm:$0xf]  ;;  %v3013_v37 = vld [vmem:[%s4153_s9 + $0x378] sm:$0xf0] }
  0xe1   : > { %2219 = vmatpush.bf16.msrb.mxu3 %v3508_v57  ;;  %v3628_v57 = vld [vmem:[%s4153_s9 + $0xac] sm:$0xf]  ;;  %v1944_v3 = vadd.f32 %v1943_v29, %v1930_v51  ;;  %v2629_v29 = vld [vmem:[%s4153_s9 + $0x78] sm:$0xf0] }
  0xe2   : > { %2178 = vmatpush.bf16.msrb.mxu0 %v3108_v2  ;;  %v3045_v2 = vld [vmem:[%s4153_s9 + $0x3b8] sm:$0xf0]  ;;  %v2664_v4 = vor.u32 %v3628_v57, %v2661_v59  ;;  %v3716_v36 = vld [vmem:[%s4153_s9 + $0x36c] sm:$0xf]  ;;  %v2632_v38 = vor.u32 %v3620_v28, %v2629_v29 }
  0xe3   : > { %2192 = vmatpush.bf16.msrb.mxu1 %v3236_v5  ;;  %v1931_v5 = vpop.f32.mrf.mxu2  ;;  %v3048_v14 = vor.u32 %v3724_v53, %v3045_v2  ;;  %v3648_v49 = vld [vmem:[%s4153_s9 + $0x14c] sm:$0xf]  ;;  %v3016_v51 = vor.u32 %v3716_v36, %v3013_v37  ;;  %v2965_v29 = vld [vmem:[%s4153_s9 + $0x318] sm:$0xf0] }
  0xe4   : > { %2206 = vmatpush.bf16.msrb.mxu2 %v3364_v6  ;;  %v1918_v6 = vadd.f32 %v1917_v48, %v1904_v54  ;;  %v2613_v48 = vld [vmem:[%s4153_s9 + $0x58] sm:$0xf0]  ;;  %v3680_v54 = vld [vmem:[%s4153_s9 + $0x24c] sm:$0xf]  ;;  %v2744_v63 = vor.u32 %v3648_v49, %v2741_v50 }
  0xe5   : > { %2220 = vmatpush.bf16.msrb.mxu3 %v3492_v12  ;;  %v2645_v12 = vld [vmem:[%s4153_s9 + $0x98] sm:$0xf0]  ;;  %v3608_v16 = vld [vmem:[%s4153_s9 + $0xc] sm:$0xf] }
  0xe6   : > { %2179 = vmatpush.bf16.msrb.mxu0 %v3092_v20  ;;  %v1957_v19 = vpop.f32.mrf.mxu0  ;;  %v3720_v20 = vld [vmem:[%s4153_s9 + $0x38c] sm:$0xf]  ;;  %v2648_v23 = vor.u32 %v3624_v11, %v2645_v12  ;;  %v2853_v11 = vld [vmem:[%s4153_s9 + $0x238] sm:$0xf0] }
  0xe7   : > { %2193 = vmatpush.bf16.msrb.mxu1 %v3220_v25  ;;  %v1958_v22 = vadd.f32 %v1957_v19, %v1944_v3  ;;  %v1971_v24 = vpop.f32.mrf.mxu1  ;;  %v1932_v25 = vadd.f32 %v1931_v5, %v1918_v6  ;;  %v3612_v3 = vld [vmem:[%s4153_s9 + $0x2c] sm:$0xf]  ;;  %v3333_v36 = vld [vmem:[%s4153_s9 + $0x5f8] sm:$0xf0] }
  0xe8   : > { %2207 = vmatpush.bf16.msrb.mxu2 %v3348_v26  ;;  %v2776_v26 = vor.u32 %v3656_v13, %v2773_v15  ;;  %v3644_v5 = vld [vmem:[%s4153_s9 + $0x12c] sm:$0xf] }
  0xe9   : > { %2221 = vmatpush.bf16.msrb.mxu3 %v3476_v31  ;;  %2180 = vmatmul.bf16.vlgmr.msrb.gmra.mxu0 %v4366_v39  ;;  %v3032_v31 = vor.u32 %v3720_v20, %v3029_v21  ;;  %v1972_v35 = vadd.f32 %v1971_v24, %v1958_v22  ;;  %v1946_v41 = vadd.f32 %v1945_v9, %v1932_v25  ;;  %v3676_v9 = vld [vmem:[%s4153_s9 + $0x22c] sm:$0xf] }
  0xea   : > { %2228 = vmatpush.bf16.msra.mxu0 %v2696_v32  ;;  %2194 = vmatmul.bf16.vlgmr.msrb.gmra.mxu1 %v4373_v44  ;;  %v2757_v32 = vld [vmem:[%s4153_s9 + $0x178] sm:$0xf0]  ;;  %v3708_v13 = vld [vmem:[%s4153_s9 + $0x32c] sm:$0xf]  ;;  %v2856_v21 = vor.u32 %v3676_v9, %v2853_v11 }
  0xeb   : > { %2242 = vmatpush.bf16.msra.mxu1 %v2824_v33  ;;  %2208 = vmatmul.bf16.vlgmr.msrb.gmra.mxu2 %v4371_v43  ;;  %v3684_v33 = vld [vmem:[%s4153_s9 + $0x26c] sm:$0xf]  ;;  %v2760_v42 = vor.u32 %v3652_v30, %v2757_v32  ;;  %v3429_v11 = vld [vmem:[%s4153_s9 + $0x6b8] sm:$0xf0] }
  0xec   : > { %2256 = vmatpush.bf16.msra.mxu2 %v2952_v34  ;;  %2222 = vmatmul.bf16.vlgmr.msrb.gmra.mxu3 %v4377_v47  ;;  %v2885_v34 = vld [vmem:[%s4153_s9 + $0x278] sm:$0xf0]  ;;  %v3640_v22 = vld [vmem:[%s4153_s9 + $0x10c] sm:$0xf] }
  0xed   : > { %2270 = vmatpush.bf16.msra.mxu3 %v3080_v40  ;;  %v3616_v40 = vld [vmem:[%s4153_s9 + $0x4c] sm:$0xf]  ;;  %v2888_v46 = vor.u32 %v3684_v33, %v2885_v34  ;;  %v3205_v33 = vld [vmem:[%s4153_s9 + $0x4f8] sm:$0xf0] }
  0xee   : > { %2229 = vmatpush.bf16.msra.mxu0 %v2680_v52  ;;  %v1985_v52 = vpop.f32.mrf.mxu2  ;;  %v1959_v57 = vpop.f32.mrf.mxu0  ;;  %v2616_v62 = vor.u32 %v3616_v40, %v2613_v48  ;;  %v3672_v24 = vld [vmem:[%s4153_s9 + $0x20c] sm:$0xf]  ;;  %v3589_v48 = vld [vmem:[%s4153_s9 + $0x7f8] sm:$0xf0] }
  0xef   : > { %2243 = vmatpush.bf16.msra.mxu1 %v2808_v55  ;;  %v2869_v55 = vld [vmem:[%s4153_s9 + $0x258] sm:$0xf0]  ;;  %v1999_v59 = vpop.f32.mrf.mxu3  ;;  %v1960_v0 = vadd.f32 %v1959_v57, %v1946_v41  ;;  %v3704_v28 = vld [vmem:[%s4153_s9 + $0x30c] sm:$0xf] }
  0xf0   : > { %2257 = vmatpush.bf16.msra.mxu2 %v2936_v56  ;;  %v1986_v56 = vadd.f32 %v1985_v52, %v1972_v35  ;;  %v2872_v2 = vor.u32 %v3680_v54, %v2869_v55  ;;  %v3764_v32 = vld [vmem:[%s4153_s9 + $0x4ec] sm:$0xf]  ;;  %v2584_v35 = vor.u32 %v3608_v16, %v2581_v18  ;;  %v2968_v49 = vor.u32 %v3704_v28, %v2965_v29  ;;  %v3157_v18 = vld [vmem:[%s4153_s9 + $0x498] sm:$0xf0] }
  0xf1   : > { %2271 = vmatpush.bf16.msra.mxu3 %v3064_v61  ;;  %v2997_v61 = vld [vmem:[%s4153_s9 + $0x358] sm:$0xf0]  ;;  %v3796_v34 = vld [vmem:[%s4153_s9 + $0x5ec] sm:$0xf]  ;;  %v3208_v50 = vor.u32 %v3764_v32, %v3205_v33 }
  0xf2   : > { %2230 = vmatpush.bf16.msra.mxu0 %v2664_v4  ;;  %v2000_v53 = vadd.f32 %v1999_v59, %v1986_v56  ;;  %v2597_v4 = vld [vmem:[%s4153_s9 + $0x38] sm:$0xf0]  ;;  %v3000_v6 = vor.u32 %v3712_v60, %v2997_v61  ;;  %v3828_v37 = vld [vmem:[%s4153_s9 + $0x6ec] sm:$0xf]  ;;  %v3336_v54 = vor.u32 %v3796_v34, %v3333_v36 }
  0xf3   : > { %2244 = vmatpush.bf16.msra.mxu1 %v2792_v7  ;;  %v1973_v7 = vpop.f32.mrf.mxu1  ;;  %v2600_v15 = vor.u32 %v3612_v3, %v2597_v4  ;;  %v3189_v56 = vld [vmem:[%s4153_s9 + $0x4d8] sm:$0xf0]  ;;  %v3792_v57 = vld [vmem:[%s4153_s9 + $0x5cc] sm:$0xf] }
  0xf4   : > { %2258 = vmatpush.bf16.msra.mxu2 %v2920_v8  ;;  %v2725_v8 = vld [vmem:[%s4153_s9 + $0x138] sm:$0xf0]  ;;  %v2340_v12 = vmax.f32 %v2000_v53, 0.0  ;;  %v1974_v19 = vadd.f32 %v1973_v7, %v1960_v0  ;;  %v3824_v61 = vld [vmem:[%s4153_s9 + $0x6cc] sm:$0xf] }
  0xf5   : > { %2272 = vmatpush.bf16.msra.mxu3 %v3048_v14  ;;  %v2981_v14 = vld [vmem:[%s4153_s9 + $0x338] sm:$0xf0]  ;;  %v2728_v20 = vor.u32 %v3644_v5, %v2725_v8  ;;  %v3756_v4 = vld [vmem:[%s4153_s9 + $0x4ac] sm:$0xf] }
  0xf6   : > { %2231 = vmatpush.bf16.msra.mxu0 %v2648_v23  ;;  %2348 = vst [vmem:[%s4708_s23] sm:$0xff] %v2340_v12  ;;  %v2709_v23 = vld [vmem:[%s4153_s9 + $0x118] sm:$0xf0]  ;;  %v2984_v25 = vor.u32 %v3708_v13, %v2981_v14  ;;  %v3820_v9 = vld [vmem:[%s4153_s9 + $0x6ac] sm:$0xf] }
  0xf7   : > { %2245 = vmatpush.bf16.msra.mxu1 %v2776_v26  ;;  %v1987_v26 = vpop.f32.mrf.mxu2  ;;  %v2712_v41 = vor.u32 %v3640_v22, %v2709_v23  ;;  %v3317_v60 = vld [vmem:[%s4153_s9 + $0x5d8] sm:$0xf0]  ;;  %v3852_v12 = vld [vmem:[%s4153_s9 + $0x7ac] sm:$0xf] }
  0xf8   : > { %2259 = vmatpush.bf16.msra.mxu2 %v2904_v27  ;;  %v2837_v27 = vld [vmem:[%s4153_s9 + $0x218] sm:$0xf0]  ;;  %v1988_v30 = vadd.f32 %v1987_v26, %v1974_v19  ;;  %v3752_v16 = vld [vmem:[%s4153_s9 + $0x48c] sm:$0xf] }
  0xf9   : > { %2273 = vmatpush.bf16.msra.mxu3 %v3032_v31  ;;  %v2001_v31 = vpop.f32.mrf.mxu3  ;;  %v3573_v0 = vld [vmem:[%s4153_s9 + $0x7d8] sm:$0xf0]  ;;  %v3784_v19 = vld [vmem:[%s4153_s9 + $0x58c] sm:$0xf]  ;;  %v3160_v23 = vor.u32 %v3752_v16, %v3157_v18 }
  0xfa   : > { %2232 = vmatpush.bf16.msra.mxu0 %v2632_v38  ;;  %v3461_v38 = vld [vmem:[%s4153_s9 + $0x6f8] sm:$0xf0]  ;;  %v2002_v40 = vadd.f32 %v2001_v31, %v1988_v30  ;;  %v3848_v22 = vld [vmem:[%s4153_s9 + $0x78c] sm:$0xf] }
  0xfb   : > { %2246 = vmatpush.bf16.msra.mxu1 %v2760_v42  ;;  %v2840_v42 = vor.u32 %v3672_v24, %v2837_v27  ;;  %v3464_v55 = vor.u32 %v3828_v37, %v3461_v38  ;;  %v3173_v5 = vld [vmem:[%s4153_s9 + $0x4b8] sm:$0xf0]  ;;  %v3748_v26 = vld [vmem:[%s4153_s9 + $0x46c] sm:$0xf] }
  0xfc   : > { %2260 = vmatpush.bf16.msra.mxu2 %v2888_v46  ;;  %v3860_v46 = vld [vmem:[%s4153_s9 + $0x7ec] sm:$0xf]  ;;  %v2344_v52 = vmax.f32 %v2002_v40, 0.0  ;;  %v3301_v8 = vld [vmem:[%s4153_s9 + $0x5b8] sm:$0xf0]  ;;  %v3176_v14 = vor.u32 %v3756_v4, %v3173_v5 }
  0xfd   : > { %2274 = vmatpush.bf16.msra.mxu3 %v3016_v51  ;;  %v3760_v51 = vld [vmem:[%s4153_s9 + $0x4cc] sm:$0xf]  ;;  %v3592_v59 = vor.u32 %v3860_v46, %v3589_v48  ;;  %v3557_v13 = vld [vmem:[%s4153_s9 + $0x7b8] sm:$0xf0] }
  0xfe   : > { %2233 = vmatpush.bf16.msra.mxu0 %v2616_v62  ;;  %v3445_v62 = vld [vmem:[%s4153_s9 + $0x6d8] sm:$0xf0]  ;;  %2352 = vst [vmem:[%s4708_s23 + $0x20] sm:$0xff] %v2344_v52  ;;  %v3192_v53 = vor.u32 %v3760_v51, %v3189_v56  ;;  %v3780_v28 = vld [vmem:[%s4153_s9 + $0x56c] sm:$0xf] }
  0xff   : > { %2247 = vmatpush.bf16.msra.mxu1 %v2744_v63  ;;  %v3856_v63 = vld [vmem:[%s4153_s9 + $0x7cc] sm:$0xf]  ;;  %v3448_v3 = vor.u32 %v3824_v61, %v3445_v62  ;;  %v3141_v27 = vld [vmem:[%s4153_s9 + $0x478] sm:$0xf0] }
 0x100   : > { %2261 = vmatpush.bf16.msra.mxu2 %v2872_v2  ;;  %v3320_v2 = vor.u32 %v3792_v57, %v3317_v60  ;;  %v3576_v7 = vor.u32 %v3856_v63, %v3573_v0  ;;  %v3269_v30 = vld [vmem:[%s4153_s9 + $0x578] sm:$0xf0]  ;;  %v3812_v31 = vld [vmem:[%s4153_s9 + $0x66c] sm:$0xf] }
 0x101   : > { %2275 = vmatpush.bf16.msra.mxu3 %v3000_v6  ;;  %v3788_v6 = vld [vmem:[%s4153_s9 + $0x5ac] sm:$0xf]  ;;  %v3397_v32 = vld [vmem:[%s4153_s9 + $0x678] sm:$0xf0]  ;;  %v3272_v36 = vor.u32 %v3780_v28, %v3269_v30 }
 0x102   : > { %2234 = vmatpush.bf16.msra.mxu0 %v2600_v15  ;;  %v3432_v15 = vor.u32 %v3820_v9, %v3429_v11  ;;  %v3844_v33 = vld [vmem:[%s4153_s9 + $0x76c] sm:$0xf]  ;;  %v3525_v34 = vld [vmem:[%s4153_s9 + $0x778] sm:$0xf0]  ;;  %v3400_v37 = vor.u32 %v3812_v31, %v3397_v32 }
 0x103   : > { %2248 = vmatpush.bf16.msra.mxu1 %v2728_v20  ;;  %v3285_v20 = vld [vmem:[%s4153_s9 + $0x598] sm:$0xf0]  ;;  %v3744_v38 = vld [vmem:[%s4153_s9 + $0x44c] sm:$0xf] }
 0x104   : > { %2262 = vmatpush.bf16.msra.mxu2 %v2856_v21  ;;  %v3413_v21 = vld [vmem:[%s4153_s9 + $0x698] sm:$0xf0]  ;;  %v3288_v24 = vor.u32 %v3784_v19, %v3285_v20  ;;  %v3808_v48 = vld [vmem:[%s4153_s9 + $0x64c] sm:$0xf] }
 0x105   : > { %2276 = vmatpush.bf16.msra.mxu3 %v2984_v25  ;;  %v3125_v40 = vld [vmem:[%s4153_s9 + $0x458] sm:$0xf0]  ;;  %v3772_v61 = vld [vmem:[%s4153_s9 + $0x52c] sm:$0xf] }
 0x106   : > { %2235 = vmatpush.bf16.msra.mxu0 %v2584_v35  ;;  %v3144_v35 = vor.u32 %v3748_v26, %v3141_v27  ;;  %v3253_v46 = vld [vmem:[%s4153_s9 + $0x558] sm:$0xf0]  ;;  %v3128_v52 = vor.u32 %v3744_v38, %v3125_v40  ;;  %v2013_v57 = vpop.f32.mrf.mxu0  ;;  %v3804_v0 = vld [vmem:[%s4153_s9 + $0x62c] sm:$0xf] }
 0x107   : > { %2249 = vmatpush.bf16.msra.mxu1 %v2712_v41  ;;  %v3776_v41 = vld [vmem:[%s4153_s9 + $0x54c] sm:$0xf]  ;;  %v3509_v51 = vld [vmem:[%s4153_s9 + $0x758] sm:$0xf0] }
 0x108   : > { %2263 = vmatpush.bf16.msra.mxu2 %v2840_v42  ;;  %v3528_v42 = vor.u32 %v3844_v33, %v3525_v34  ;;  %v3109_v60 = vld [vmem:[%s4153_s9 + $0x438] sm:$0xf0]  ;;  %v3768_v11 = vld [vmem:[%s4153_s9 + $0x50c] sm:$0xf] }
 0x109   : > { %2277 = vmatpush.bf16.msra.mxu3 %v2968_v49  ;;  %2236 = vmatmul.bf16.vlgmr.msra.gmra.mxu0 %v4258_v58  ;;  %v3560_v58 = vor.u32 %v3852_v12, %v3557_v13  ;;  %v3381_v49 = vld [vmem:[%s4153_s9 + $0x658] sm:$0xf0]  ;;  %v3832_v16 = vld [vmem:[%s4153_s9 + $0x70c] sm:$0xf] }
 0x10a   : > { %2284 = vmatpush.bf16.msrb.mxu0 %v3208_v50  ;;  %2250 = vmatmul.bf16.vlgmr.msra.gmra.mxu1 %v4282_v10  ;;  %v3541_v10 = vld [vmem:[%s4153_s9 + $0x798] sm:$0xf0]  ;;  %v3840_v50 = vld [vmem:[%s4153_s9 + $0x74c] sm:$0xf]  ;;  %v3384_v56 = vor.u32 %v3808_v48, %v3381_v49 }
 0x10b   : > { %2298 = vmatpush.bf16.msrb.mxu1 %v3336_v54  ;;  %2264 = vmatmul.bf16.vlgmr.msra.gmra.mxu2 %v4266_v1  ;;  %v3304_v1 = vor.u32 %v3788_v6, %v3301_v8  ;;  %v3544_v29 = vor.u32 %v3848_v22, %v3541_v10  ;;  %v565_v54 = vperm.slane %v4618_v45, 1  ;;  %v3512_v62 = vor.u32 %v3840_v50, %v3509_v51  ;;  %v3237_v63 = vld [vmem:[%s4153_s9 + $0x538] sm:$0xf0]  ;;  %v3736_v8 = vld [vmem:[%s4153_s9 + $0x40c] sm:$0xf] }
 0x10c   : > { %2312 = vmatpush.bf16.msrb.mxu2 %v3464_v55  ;;  %2278 = vmatmul.bf16.vlgmr.msra.gmra.mxu3 %v4290_v17  ;;  %v3816_v17 = vld [vmem:[%s4153_s9 + $0x68c] sm:$0xf]  ;;  %v3256_v55 = vor.u32 %v3776_v41, %v3253_v46  ;;  %v3493_v4 = vld [vmem:[%s4153_s9 + $0x738] sm:$0xf0]  ;;  %v3240_v6 = vor.u32 %v3772_v61, %v3237_v63 }
 0x10d   : > { %2326 = vmatpush.bf16.msrb.mxu3 %v3592_v59  ;;  %v3416_v25 = vor.u32 %v3816_v17, %v3413_v21  ;;  %v3740_v59 = vld [vmem:[%s4153_s9 + $0x42c] sm:$0xf]  ;;  %v3093_v9 = vld [vmem:[%s4153_s9 + $0x418] sm:$0xf0]  ;;  %v2014_v12 = vadd.f32 %v2013_v57, %v565_v54 }
 0x10e   : > { %2285 = vmatpush.bf16.msrb.mxu0 %v3192_v53  ;;  %v3365_v53 = vld [vmem:[%s4153_s9 + $0x638] sm:$0xf0]  ;;  %v3112_v5 = vor.u32 %v3740_v59, %v3109_v60  ;;  %v3096_v19 = vor.u32 %v3736_v8, %v3093_v9 }
 0x10f   : > { %2299 = vmatpush.bf16.msrb.mxu1 %v3320_v2  ;;  %v2027_v2 = vpop.f32.mrf.mxu1  ;;  %v3477_v18 = vld [vmem:[%s4153_s9 + $0x718] sm:$0xf0]  ;;  %v2055_v21 = vpop.f32.mrf.mxu3 }
 0x110   : > { %2313 = vmatpush.bf16.msrb.mxu2 %v3448_v3  ;;  %v3836_v3 = vld [vmem:[%s4153_s9 + $0x72c] sm:$0xf]  ;;  %v2028_v22 = vadd.f32 %v2027_v2, %v2014_v12  ;;  %v3480_v10 = vor.u32 %v3832_v16, %v3477_v18 }
 0x111   : > { %2327 = vmatpush.bf16.msrb.mxu3 %v3576_v7  ;;  %v3368_v7 = vor.u32 %v3804_v0, %v3365_v53  ;;  %v3496_v13 = vor.u32 %v3836_v3, %v3493_v4 }
 0x112   : > { %2286 = vmatpush.bf16.msrb.mxu0 %v3176_v14  ;;  %v3221_v14 = vld [vmem:[%s4153_s9 + $0x518] sm:$0xf0] }
 0x113   : > { %2300 = vmatpush.bf16.msrb.mxu1 %v3304_v1  ;;  %v3800_v1 = vld [vmem:[%s4153_s9 + $0x60c] sm:$0xf]  ;;  %v3224_v20 = vor.u32 %v3768_v11, %v3221_v14 }
 0x114   : > { %2314 = vmatpush.bf16.msrb.mxu2 %v3432_v15  ;;  %v3349_v15 = vld [vmem:[%s4153_s9 + $0x618] sm:$0xf0] }
 0x115   : > { %2328 = vmatpush.bf16.msrb.mxu3 %v3560_v58  ;;  %v2041_v58 = vpop.f32.mrf.mxu2  ;;  %v3352_v17 = vor.u32 %v3800_v1, %v3349_v15 }
 0x116   : > { %2287 = vmatpush.bf16.msrb.mxu0 %v3160_v23  ;;  %v2015_v23 = vpop.f32.mrf.mxu0 }
 0x117   : > { %2301 = vmatpush.bf16.msrb.mxu1 %v3288_v24  ;;  %v2029_v24 = vpop.f32.mrf.mxu1  ;;  %v2016_v26 = vadd.f32 %v2015_v23, %v565_v54  ;;  %v2057_v30 = vpop.f32.mrf.mxu3  ;;  %v566_v54 = vperm.slane %v4618_v45, 2 }
 0x118   : > { %2315 = vmatpush.bf16.msrb.mxu2 %v3416_v25  ;;  %v2042_v25 = vadd.f32 %v2041_v58, %v2028_v22 }
 0x119   : > { %2329 = vmatpush.bf16.msrb.mxu3 %v3544_v29  ;;  %v2030_v29 = vadd.f32 %v2029_v24, %v2016_v26  ;;  %v567_v24 = vperm.slane %v4618_v45, 3 }
 0x11a   : > { %2288 = vmatpush.bf16.msrb.mxu0 %v3144_v35  ;;  %v2056_v27 = vadd.f32 %v2055_v21, %v2042_v25 }
 0x11b   : > { %2302 = vmatpush.bf16.msrb.mxu1 %v3272_v36 }
 0x11c   : > { %2316 = vmatpush.bf16.msrb.mxu2 %v3400_v37 }
 0x11d   : > { %2330 = vmatpush.bf16.msrb.mxu3 %v3528_v42  ;;  %v2043_v28 = vpop.f32.mrf.mxu2 }
 0x11e   : > { %2289 = vmatpush.bf16.msrb.mxu0 %v3128_v52  ;;  %v2044_v34 = vadd.f32 %v2043_v28, %v2030_v29 }
 0x11f   : > { %2303 = vmatpush.bf16.msrb.mxu1 %v3256_v55 }
 0x120   : > { %2317 = vmatpush.bf16.msrb.mxu2 %v3384_v56  ;;  %v2058_v36 = vadd.f32 %v2057_v30, %v2044_v34 }
 0x121   : > { %2331 = vmatpush.bf16.msrb.mxu3 %v3512_v62 }
 0x122   : > { %2290 = vmatpush.bf16.msrb.mxu0 %v3112_v5 }
 0x123   : > { %2304 = vmatpush.bf16.msrb.mxu1 %v3240_v6 }
 0x124   : > { %2318 = vmatpush.bf16.msrb.mxu2 %v3368_v7 }
 0x125   : > { %2332 = vmatpush.bf16.msrb.mxu3 %v3496_v13 }
 0x126   : > { %2291 = vmatpush.bf16.msrb.mxu0 %v3096_v19  ;;  %v2069_v31 = vpop.f32.mrf.mxu0 }
 0x127   : > { %2305 = vmatpush.bf16.msrb.mxu1 %v3224_v20  ;;  %v2070_v32 = vadd.f32 %v2069_v31, %v2056_v27  ;;  %v2083_v33 = vpop.f32.mrf.mxu1 }
 0x128   : > { %2319 = vmatpush.bf16.msrb.mxu2 %v3352_v17 }
 0x129   : > { %2333 = vmatpush.bf16.msrb.mxu3 %v3480_v10  ;;  %2292 = vmatmul.bf16.vlgmr.msrb.gmra.mxu0 %v4366_v39  ;;  %v2084_v35 = vadd.f32 %v2083_v33, %v2070_v32 }
 0x12a   : > { %2306 = vmatmul.bf16.vlgmr.msrb.gmra.mxu1 %v4373_v44 }
 0x12b   : > { %2320 = vmatmul.bf16.vlgmr.msrb.gmra.mxu2 %v4371_v43 }
 0x12c   : > { %2334 = vmatmul.bf16.vlgmr.msrb.gmra.mxu3 %v4377_v47 }
 0x12e   : > { %v2097_v39 = vpop.f32.mrf.mxu2  ;;  %v2071_v38 = vpop.f32.mrf.mxu0 }
 0x12f   : > { %v2098_v37 = vadd.f32 %v2097_v39, %v2084_v35  ;;  %v2111_v44 = vpop.f32.mrf.mxu3  ;;  %v2072_v40 = vadd.f32 %v2071_v38, %v2058_v36  ;;  %v2085_v41 = vpop.f32.mrf.mxu1 }
 0x131   : > { %v2112_v43 = vadd.f32 %v2111_v44, %v2098_v37  ;;  %v2086_v42 = vadd.f32 %v2085_v41, %v2072_v40 }
 0x133   : > { %v2341_v47 = vmax.f32 %v2112_v43, 0.0 }
 0x135   : > { %2349 = vst [vmem:[%s4708_s23 + $0x8] sm:$0xff] %v2341_v47 }
 0x136   : > { %v2099_v46 = vpop.f32.mrf.mxu2 }
 0x137   : > { %v2100_v48 = vadd.f32 %v2099_v46, %v2086_v42  ;;  %v2113_v49 = vpop.f32.mrf.mxu3 }
 0x139   : > { %v2114_v50 = vadd.f32 %v2113_v49, %v2100_v48 }
 0x13b   : > { %v2345_v51 = vmax.f32 %v2114_v50, 0.0 }
 0x13d   : > { %2353 = vst [vmem:[%s4708_s23 + $0x28] sm:$0xff] %v2345_v51 }
 0x146   : > { %v2125_v52 = vpop.f32.mrf.mxu0 }
 0x147   : > { %v2139_v55 = vpop.f32.mrf.mxu1  ;;  %v2126_v56 = vadd.f32 %v2125_v52, %v566_v54 }
 0x149   : > { %v2140_v60 = vadd.f32 %v2139_v55, %v2126_v56 }
 0x14e   : > { %v2153_v57 = vpop.f32.mrf.mxu2  ;;  %v2127_v61 = vpop.f32.mrf.mxu0 }
 0x14f   : > { %v2167_v59 = vpop.f32.mrf.mxu3  ;;  %v2141_v62 = vpop.f32.mrf.mxu1  ;;  %v2154_v63 = vadd.f32 %v2153_v57, %v2140_v60  ;;  %v2128_v0 = vadd.f32 %v2127_v61, %v566_v54  ;;  %v2381_v60 = vld [vmem:[%s4708_s23] sm:$0xff] (%p4116_p9)  ;;  %v2383_v61 = vld [vmem:[%s4708_s23 + $0x8] sm:$0xff] (%p4116_p9) }
 0x150   : > { %2382 = vst [vmem:[%s2368_s12] sm:$0xff] (%p4116_p9), %v2381_v60 }
 0x151   : > { %v2168_v53 = vadd.f32 %v2167_v59, %v2154_v63  ;;  %v2142_v3 = vadd.f32 %v2141_v62, %v2128_v0  ;;  %2384 = vst [vmem:[%s2368_s12 + $0x8] sm:$0xff] (%p4116_p9), %v2383_v61  ;;  %v2389_v0 = vld [vmem:[%s4708_s23 + $0x20] sm:$0xff] (%p4116_p9) }
 0x152   : > { %2390 = vst [vmem:[%s2368_s12 + $0x40] sm:$0xff] (%p4116_p9), %v2389_v0 }
 0x156   : > { %v2155_v2 = vpop.f32.mrf.mxu2 }
 0x157   : > { %v2169_v4 = vpop.f32.mrf.mxu3  ;;  %v2156_v8 = vadd.f32 %v2155_v2, %v2142_v3 }
 0x159   : > { %v2170_v11 = vadd.f32 %v2169_v4, %v2156_v8 }
 0x166   : > { %v2181_v5 = vpop.f32.mrf.mxu0 }
 0x167   : > { %v2182_v6 = vadd.f32 %v2181_v5, %v2168_v53  ;;  %v2195_v7 = vpop.f32.mrf.mxu1  ;;  %v2391_v53 = vld [vmem:[%s4708_s23 + $0x28] sm:$0xff] (%p4116_p9) }
 0x168   : > { %2392 = vst [vmem:[%s2368_s12 + $0x48] sm:$0xff] (%p4116_p9), %v2391_v53 }
 0x169   : > { %v2196_v9 = vadd.f32 %v2195_v7, %v2182_v6 }
 0x16e   : > { %v2209_v12 = vpop.f32.mrf.mxu2  ;;  %v2183_v14 = vpop.f32.mrf.mxu0 }
 0x16f   : > { %v2210_v13 = vadd.f32 %v2209_v12, %v2196_v9  ;;  %v2223_v1 = vpop.f32.mrf.mxu3  ;;  %v2184_v15 = vadd.f32 %v2183_v14, %v2170_v11  ;;  %v2197_v18 = vpop.f32.mrf.mxu1 }
 0x171   : > { %v2224_v16 = vadd.f32 %v2223_v1, %v2210_v13  ;;  %v2198_v58 = vadd.f32 %v2197_v18, %v2184_v15 }
 0x173   : > { %v2342_v19 = vmax.f32 %v2224_v16, 0.0 }
 0x175   : > { %2350 = vst [vmem:[%s4708_s23 + $0x10] sm:$0xff] %v2342_v19 }
 0x176   : > { %v2211_v20 = vpop.f32.mrf.mxu2 }
 0x177   : > { %v2212_v17 = vadd.f32 %v2211_v20, %v2198_v58  ;;  %v2225_v21 = vpop.f32.mrf.mxu3 }
 0x179   : > { %v2226_v22 = vadd.f32 %v2225_v21, %v2212_v17 }
 0x17b   : > { %v2346_v10 = vmax.f32 %v2226_v22, 0.0 }
 0x17c   : > { %v2385_v62 = vld [vmem:[%s4708_s23 + $0x10] sm:$0xff] (%p4116_p9) }
 0x17d   : > { %2354 = vst [vmem:[%s4708_s23 + $0x30] sm:$0xff] %v2346_v10 }
 0x17e   : > { %2386 = vst [vmem:[%s2368_s12 + $0x10] sm:$0xff] (%p4116_p9), %v2385_v62 }
 0x184   : > { %v2393_v2 = vld [vmem:[%s4708_s23 + $0x30] sm:$0xff] (%p4116_p9) }
 0x185   : > { %2394 = vst [vmem:[%s2368_s12 + $0x50] sm:$0xff] (%p4116_p9), %v2393_v2 }
 0x186   : > { %v2237_v23 = vpop.f32.mrf.mxu0 }
 0x187   : > { %v2251_v25 = vpop.f32.mrf.mxu1  ;;  %v2238_v26 = vadd.f32 %v2237_v23, %v567_v24 }
 0x189   : > { %v2252_v29 = vadd.f32 %v2251_v25, %v2238_v26 }
 0x18e   : > { %v2265_v27 = vpop.f32.mrf.mxu2  ;;  %v2239_v30 = vpop.f32.mrf.mxu0 }
 0x18f   : > { %v2279_v28 = vpop.f32.mrf.mxu3  ;;  %v2253_v31 = vpop.f32.mrf.mxu1  ;;  %v2266_v32 = vadd.f32 %v2265_v27, %v2252_v29  ;;  %v2240_v33 = vadd.f32 %v2239_v30, %v567_v24 }
 0x191   : > { %v2280_v35 = vadd.f32 %v2279_v28, %v2266_v32  ;;  %v2254_v36 = vadd.f32 %v2253_v31, %v2240_v33 }
 0x196   : > { %v2267_v34 = vpop.f32.mrf.mxu2 }
 0x197   : > { %v2281_v39 = vpop.f32.mrf.mxu3  ;;  %v2268_v40 = vadd.f32 %v2267_v34, %v2254_v36 }
 0x199   : > { %v2282_v41 = vadd.f32 %v2281_v39, %v2268_v40 }
 0x1a6   : > { %v2293_v37 = vpop.f32.mrf.mxu0 }
 0x1a7   : > { %v2294_v38 = vadd.f32 %v2293_v37, %v2280_v35  ;;  %v2307_v44 = vpop.f32.mrf.mxu1 }
 0x1a9   : > { %v2308_v43 = vadd.f32 %v2307_v44, %v2294_v38 }
 0x1ae   : > { %v2321_v45 = vpop.f32.mrf.mxu2  ;;  %v2295_v46 = vpop.f32.mrf.mxu0 }
 0x1af   : > { %v2322_v47 = vadd.f32 %v2321_v45, %v2308_v43  ;;  %v2335_v42 = vpop.f32.mrf.mxu3  ;;  %v2296_v49 = vadd.f32 %v2295_v46, %v2282_v41  ;;  %v2309_v51 = vpop.f32.mrf.mxu1 }
 0x1b1   : > { %v2336_v48 = vadd.f32 %v2335_v42, %v2322_v47  ;;  %v2310_v52 = vadd.f32 %v2309_v51, %v2296_v49 }
 0x1b3   : > { %v2343_v50 = vmax.f32 %v2336_v48, 0.0 }
 0x1b5   : > { %2351 = vst [vmem:[%s4708_s23 + $0x18] sm:$0xff] %v2343_v50 }
 0x1b6   : > { %v2323_v54 = vpop.f32.mrf.mxu2 }
 0x1b7   : > { %v2324_v55 = vadd.f32 %v2323_v54, %v2310_v52  ;;  %v2337_v56 = vpop.f32.mrf.mxu3 }
 0x1b9   : > { %v2338_v57 = vadd.f32 %v2337_v56, %v2324_v55  ;;  %2362 = sbr.rel (!%p4116_p9) target bundleno = 454 (0x1c6), region = 44 }
 0x1bb   : > { %v2347_v59 = vmax.f32 %v2338_v57, 0.0 }
 0x1bc   : > { %v2387_v63 = vld [vmem:[%s4708_s23 + $0x18] sm:$0xff] (%p4116_p9) }
 0x1bd   : > { %2355 = vst [vmem:[%s4708_s23 + $0x38] sm:$0xff] %v2347_v59 }
 0x1be   : > { %2388 = vst [vmem:[%s2368_s12 + $0x18] sm:$0xff] %v2387_v63 }
 0x1c4   : > { %v2395_v3 = vld [vmem:[%s4708_s23 + $0x38] sm:$0xff] }
 0x1c5   : > { %2396 = vst [vmem:[%s2368_s12 + $0x58] sm:$0xff] %v2395_v3 }
 0x1c6 PF: > { %s19_s17 = sadd.s32 1, %s4041_s17   ;;  %s4839_s12 = smov %s4025_s13 }
 0x1c7   : > { %p16_p1 = scmp.ge.s32.totalorder %s19_s17, 4   ;;  %s4840_s13 = smov %s4029_s14 }
 0x1c8   : > { %s4841_s14 = smov %s4114_s24  ;;  %s4842_s15 = smov %s4037_s16 }
 0x1c9   : > { %s4843_s16 = smov %s4845_s19  ;;  %18 = sbr.rel (!%p16_p1) target bundleno = 6 (0x6), region = 111 }
 0x1ce   :  { %2412 = vsyncpa [#allocation3], 1 }
 0x1cf   :  { %2414 = vsyncpa [#allocation3 + $0x1], 1 }
 0x1d0   :  { %2415 = vsyncpa [#allocation5], 1 }
 0x1d1   :  { %2417 = vsyncpa [#allocation5 + $0x1], 1 }

</bundles_post_ra>
